<compile_context>
chip_gen: v7x
topology: tpu7x:2x2x1
jax: 0.10.0
libtpu: 0.0.40
codegen_flags: <defaults>
</compile_context>

<pallas_src>
import math

import jax
import jax.numpy as jnp
from jax.experimental import pallas as pl
from jax.experimental.pallas import tpu as pltpu

# ----------------------------- config ---------------------------------------
DIM = 32
DEPTH = 2
HEADS = 4
SCALAR_KEY_DIM = 8
SCALAR_VALUE_DIM = 8
POINT_KEY_DIM = 4
POINT_VALUE_DIM = 4
PAIRWISE_DIM = 16
DIMS = 3                      # InvariantPointAttention.DIMS
EPS = 1e-8
NUM_ATTN_LOGITS = 3.0         # scalar + point + pairwise

SCALAR_SCALE = (NUM_ATTN_LOGITS * SCALAR_KEY_DIM) ** -0.5
POINT_SCALE = ((NUM_ATTN_LOGITS * POINT_KEY_DIM) * (9.0 / 2.0)) ** -0.5
PAIR_SCALE = NUM_ATTN_LOGITS ** -0.5

HDS = HEADS * SCALAR_KEY_DIM        # 32
HDV = HEADS * SCALAR_VALUE_DIM      # 32
HPK = HEADS * POINT_KEY_DIM         # 16
HPV = HEADS * POINT_VALUE_DIM       # 16
QKV_OUT = 2 * HDS + HDV + 3 * (2 * HPK + HPV)     # 240

# feats (attention output) column layout
OFF_LX = HDV                          # 32
OFF_LY = OFF_LX + HPV                 # 48
OFF_LZ = OFF_LY + HPV                 # 64
OFF_PN = OFF_LZ + HPV                 # 80
OFF_PW = OFF_PN + HPV                 # 96
FEATS_DIM = OFF_PW + HEADS * PAIRWISE_DIM   # 160


# --------------------------- fused layer kernel ------------------------------
def _ipa_layer_kernel(x_ref, pair_ref, mcol_ref, mrow_ref, rot_ref, trn_ref,
                      wqkv_ref, coef_ref, wbias_ref, bpair_ref, exp_ref, fold_ref,
                      wout_ref, vecs_ref, w0_ref, w1_ref, w2_ref,
                      o_ref, feats_ref):
    f32 = jnp.float32
    N = x_ref.shape[1]
    Ds, Dv = SCALAR_KEY_DIM, SCALAR_VALUE_DIM
    Pk, Pv, Dp = POINT_KEY_DIM, POINT_VALUE_DIM, PAIRWISE_DIM

    x = x_ref[0]                                   # (N, DIM)
    pair = pair_ref[0]                             # (N, N*Dp)  lane-dense pair tile
    rot = rot_ref[0]                               # (N, 9)     rot[:, c*3+r] = R[c, r]
    trn = trn_ref[0]                               # (N, 3)

    # additive attention mask built in-kernel from per-token validity
    valid = mcol_ref[0] * mrow_ref[0]              # (N,1)*(1,N) -> (N,N)
    addmask = jnp.where(valid > 0.5, 0.0, -1e9)

    # --- fused scalar + point Q/K/V projection: one 240-lane MXU matmul ---
    qkv = jnp.dot(x, wqkv_ref[...], preferred_element_type=f32)   # (N, 240)

    qs = qkv[:, 0:HDS] * SCALAR_SCALE
    ks = qkv[:, HDS:2 * HDS]
    vs = qkv[:, 2 * HDS:2 * HDS + HDV]
    c0 = 2 * HDS + HDV
    qpx = qkv[:, c0:c0 + HPK]
    qpy = qkv[:, c0 + HPK:c0 + 2 * HPK]
    qpz = qkv[:, c0 + 2 * HPK:c0 + 3 * HPK]
    c0 += 3 * HPK
    kpx = qkv[:, c0:c0 + HPK]
    kpy = qkv[:, c0 + HPK:c0 + 2 * HPK]
    kpz = qkv[:, c0 + 2 * HPK:c0 + 3 * HPK]
    c0 += 3 * HPK
    vpx = qkv[:, c0:c0 + HPV]
    vpy = qkv[:, c0 + HPV:c0 + 2 * HPV]
    vpz = qkv[:, c0 + 2 * HPV:c0 + 3 * HPV]

    r = [rot[:, i:i + 1] for i in range(9)]        # nine (N,1) rotation columns
    tx, ty, tz = trn[:, 0:1], trn[:, 1:2], trn[:, 2:3]

    def to_global(px, py, pz):
        # g_r = sum_c p_c * R[c, r] + t_r  (lane-dense elementwise, no per-point slices)
        gx = px * r[0] + py * r[3] + pz * r[6] + tx
        gy = px * r[1] + py * r[4] + pz * r[7] + ty
        gz = px * r[2] + py * r[5] + pz * r[8] + tz
        return gx, gy, gz

    coef = coef_ref[...]                           # (1, HPK) = sqrt(0.5*softplus(w_h)*scale)
    qgx, qgy, qgz = to_global(qpx, qpy, qpz)
    kgx, kgy, kgz = to_global(kpx, kpy, kpz)
    vgx, vgy, vgz = to_global(vpx, vpy, vpz)
    qgx, qgy, qgz = qgx * coef, qgy * coef, qgz * coef
    kgx, kgy, kgz = kgx * coef, kgy * coef, kgz * coef

    q_sq = qgx * qgx + qgy * qgy + qgz * qgz       # (N, HPK)
    k_sq = kgx * kgx + kgy * kgy + kgz * kgz

    # --- pairwise attention bias for ALL heads: one MXU matmul (hoisted) ---
    # bias_all[i, h*N + j] = PAIR_SCALE * sum_d pair[i, j, d] * w_pair_bias[d, h]
    bias_all = jnp.dot(pair, wbias_ref[...], preferred_element_type=f32)   # (N, H*N)
    bpair = bpair_ref[...]                          # (1, H), pre-scaled

    exp_mat = exp_ref[...]                          # (N, N*Dp)  0/1 expansion
    fold_mat = fold_ref[...]                        # (N*Dp, Dp) 0/1 fold

    for h in range(HEADS):
        s0, s1 = h * Ds, (h + 1) * Ds
        p0, p1 = h * Pk, (h + 1) * Pk

        # scalar logits (MXU, f32 for softmax precision)
        logits = jnp.dot(qs[:, s0:s1], ks[:, s0:s1].T, preferred_element_type=f32)
        # point-distance logits via |q|^2 + |k|^2 - 2 q.k (q/k pre-scaled per head)
        cross = (jnp.dot(qgx[:, p0:p1], kgx[:, p0:p1].T, preferred_element_type=f32)
                 + jnp.dot(qgy[:, p0:p1], kgy[:, p0:p1].T, preferred_element_type=f32)
                 + jnp.dot(qgz[:, p0:p1], kgz[:, p0:p1].T, preferred_element_type=f32))
        qsq_h = jnp.sum(q_sq[:, p0:p1], axis=-1, keepdims=True)
        ksq_h = jnp.sum(k_sq[:, p0:p1], axis=-1, keepdims=True)
        logits = logits - (qsq_h + ksq_h.T - 2.0 * cross)
        logits = logits + bias_all[:, h * N:(h + 1) * N] + bpair[:, h:h + 1] + addmask

        # softmax over keys; denominator reciprocal on the EUP slot
        mx = jnp.max(logits, axis=-1, keepdims=True)
        ex = jnp.exp(logits - mx)
        attn = ex * pl.reciprocal(jnp.sum(ex, axis=-1, keepdims=True), approx=True)

        # aggregations (all MXU, f32)
        o_s = jnp.dot(attn, vs[:, h * Dv:(h + 1) * Dv], preferred_element_type=f32)
        ogx = jnp.dot(attn, vgx[:, h * Pv:(h + 1) * Pv], preferred_element_type=f32)
        ogy = jnp.dot(attn, vgy[:, h * Pv:(h + 1) * Pv], preferred_element_type=f32)
        ogz = jnp.dot(attn, vgz[:, h * Pv:(h + 1) * Pv], preferred_element_type=f32)
        # attention-weighted pairwise aggregation via lane-dense expand/fold matmuls
        o_w = jnp.dot(jnp.dot(attn, exp_mat, preferred_element_type=f32) * pair,
                      fold_mat, preferred_element_type=f32)            # (N, Dp)

        # aggregated value points back to the local frame: R^T (p - t), then norms
        rx, ry, rz = ogx - tx, ogy - ty, ogz - tz
        lx = rx * r[0] + ry * r[1] + rz * r[2]
        ly = rx * r[3] + ry * r[4] + rz * r[5]
        lz = rx * r[6] + ry * r[7] + rz * r[8]
        pn = jnp.sqrt(lx * lx + ly * ly + lz * lz + EPS)

        feats_ref[:, h * Dv:(h + 1) * Dv] = o_s
        feats_ref[:, OFF_LX + h * Pv:OFF_LX + (h + 1) * Pv] = lx
        feats_ref[:, OFF_LY + h * Pv:OFF_LY + (h + 1) * Pv] = ly
        feats_ref[:, OFF_LZ + h * Pv:OFF_LZ + (h + 1) * Pv] = lz
        feats_ref[:, OFF_PN + h * Pv:OFF_PN + (h + 1) * Pv] = pn
        feats_ref[:, OFF_PW + h * Dp:OFF_PW + (h + 1) * Dp] = o_w

    feats = feats_ref[...]                          # (N, 160)

    # --- attention out-proj + residual + LN + 3-layer FFN + residual + LN ---
    vecs = vecs_ref[...]   # rows: b_out, attn_g, attn_b, ff_b0, ff_b1, ff_b2, ff_g, ff_b

    def layer_norm(v, g, b):
        mu = jnp.mean(v, axis=-1, keepdims=True)
        var = jnp.mean(jnp.square(v - mu), axis=-1, keepdims=True)
        return (v - mu) * jax.lax.rsqrt(var + 1e-5) * g + b

    h1 = jnp.dot(feats, wout_ref[...], preferred_element_type=f32) + vecs[0:1] + x
    h1 = layer_norm(h1, vecs[1:2], vecs[2:3])                 # attn_norm (post_norm)
    y = jnp.maximum(jnp.dot(h1, w0_ref[...], preferred_element_type=f32) + vecs[3:4], 0.0)
    y = jnp.maximum(jnp.dot(y, w1_ref[...], preferred_element_type=f32) + vecs[4:5], 0.0)
    y = jnp.dot(y, w2_ref[...], preferred_element_type=f32) + vecs[5:6]
    o_ref[0] = layer_norm(y + h1, vecs[6:7], vecs[7:8])       # ff residual + ff_norm


def _rep_spec(arr):
    zeros = (0,) * arr.ndim
    return pl.BlockSpec(arr.shape, lambda b, z=zeros: z)


def pallas_ipa_layer(x, pair_flat, mask_col, mask_row, rot_flat, translations,
                     w_qkv, coef_row, w_bias_big, b_pair, exp_mat, fold_mat,
                     w_out, vecs, w0, w1, w2):
    B, N, D = x.shape
    NDp = pair_flat.shape[-1]
    return pl.pallas_call(
        _ipa_layer_kernel,
        grid=(B,),
        in_specs=[
            pl.BlockSpec((1, N, D), lambda b: (b, 0, 0)),       # x (residual stream)
            pl.BlockSpec((1, N, NDp), lambda b: (b, 0, 0)),     # pair (lane-dense)
            pl.BlockSpec((1, N, 1), lambda b: (b, 0, 0)),       # seq mask (column)
            pl.BlockSpec((1, 1, N), lambda b: (b, 0, 0)),       # seq mask (row)
            pl.BlockSpec((1, N, 9), lambda b: (b, 0, 0)),       # rotations
            pl.BlockSpec((1, N, 3), lambda b: (b, 0, 0)),       # translations
            _rep_spec(w_qkv), _rep_spec(coef_row), _rep_spec(w_bias_big),
            _rep_spec(b_pair), _rep_spec(exp_mat), _rep_spec(fold_mat),
            _rep_spec(w_out), _rep_spec(vecs),
            _rep_spec(w0), _rep_spec(w1), _rep_spec(w2),
        ],
        out_specs=pl.BlockSpec((1, N, D), lambda b: (b, 0, 0)),
        out_shape=jax.ShapeDtypeStruct((B, N, D), jnp.float32),
        scratch_shapes=[pltpu.VMEM((N, FEATS_DIM), jnp.float32)],
        input_output_aliases={0: 0},                            # residual stream in-place
        compiler_params=pltpu.CompilerParams(
            dimension_semantics=("parallel",)),                 # B over the 2 v7x TCs
    )(x, pair_flat, mask_col, mask_row, rot_flat, translations,
      w_qkv, coef_row, w_bias_big, b_pair, exp_mat, fold_mat,
      w_out, vecs, w0, w1, w2)


# --------------------------- frame math (tiny jnp glue) -----------------------
def quaternion_to_matrix(q):
    r, i, j, k = q[..., 0], q[..., 1], q[..., 2], q[..., 3]
    two_s = 2.0 / jnp.sum(q * q, axis=-1)
    o = jnp.stack([
        1 - two_s * (j * j + k * k), two_s * (i * j - k * r), two_s * (i * k + j * r),
        two_s * (i * j + k * r), 1 - two_s * (i * i + k * k), two_s * (j * k - i * r),
        two_s * (i * k - j * r), two_s * (j * k + i * r), 1 - two_s * (i * i + j * j),
    ], axis=-1)
    return o.reshape(q.shape[:-1] + (3, 3))


def quaternion_multiply(a, b):
    aw, ax, ay, az = a[..., 0], a[..., 1], a[..., 2], a[..., 3]
    bw, bx, by, bz = b[..., 0], b[..., 1], b[..., 2], b[..., 3]
    ow = aw * bw - ax * bx - ay * by - az * bz
    ox = aw * bx + ax * bw + ay * bz - az * by
    oy = aw * by - ax * bz + ay * bw + az * bx
    oz = aw * bz + ax * by - ay * bx + az * bw
    out = jnp.stack([ow, ox, oy, oz], axis=-1)
    # standardize (non-negative real part), matching pytorch3d.quaternion_multiply
    return jnp.where(out[..., :1] < 0, -out, out)


def local_to_global(points, rotations, translations):
    # InvariantPointAttention.transform_from_local_to_global_frame
    return jnp.einsum("bnc,bncr->bnr", points, rotations) + translations


# --------------------------- IPA block / model --------------------------------
def ipa_layer(block_p, x, pair_flat, mask_col, mask_row, rotations, translations,
              exp_mat, fold_mat):
    B, N, _ = x.shape
    attn = block_p["attn"]

    # per-head point-attention weight folded into q/k point coords:
    # coef*dist^2 == |sqrt(coef)(q - k)|^2
    pw = jax.nn.softplus(attn["point_weights"])                    # (H,)
    coef = jnp.sqrt(0.5 * pw * POINT_SCALE)                        # (H,)
    coef_row = jnp.repeat(coef, POINT_KEY_DIM).reshape(1, HPK)

    # pair-bias block weight for the single in-kernel matmul:
    # W_big[j*Dp + d, h*N + j] = PAIR_SCALE * w_pair_bias[d, h]
    wbt = attn["w_pair_bias"].T * PAIR_SCALE                       # (H, Dp)
    eye = jnp.eye(N, dtype=jnp.float32)
    w_bias_big = jnp.einsum("jk,hd->jdhk", eye, wbt).reshape(N * PAIRWISE_DIM, HEADS * N)
    b_pair = (attn["b_pair_bias"] * PAIR_SCALE).reshape(1, HEADS)

    # pack all (DIM,) row-vector params into one (8, DIM) tile
    vecs = jnp.stack([
        attn["b_out"], block_p["attn_norm_g"], block_p["attn_norm_b"],
        block_p["ff_b0"], block_p["ff_b1"], block_p["ff_b2"],
        block_p["ff_norm_g"], block_p["ff_norm_b"]], axis=0)

    rot_flat = rotations.reshape(B, N, 9)

    return pallas_ipa_layer(x, pair_flat, mask_col, mask_row, rot_flat, translations,
                            attn["w_qkv"], coef_row, w_bias_big, b_pair,
                            exp_mat, fold_mat, attn["w_out"], vecs,
                            block_p["ff_w0"], block_p["ff_w1"], block_p["ff_w2"])


def ipa_transformer_forward(params, single_repr, pairwise_repr, seq_mask=None,
                            translations=None, quaternions=None):
    B, N, _ = single_repr.shape
    x = single_repr.astype(jnp.float32)
    if quaternions is None:
        quaternions = jnp.zeros((B, N, 4), jnp.float32).at[..., 0].set(1.0)
    if translations is None:
        translations = jnp.zeros((B, N, 3), jnp.float32)
    if seq_mask is None:
        m = jnp.ones((B, N), jnp.float32)
    else:
        m = seq_mask.astype(jnp.float32)
    mask_col = m.reshape(B, N, 1)
    mask_row = m.reshape(B, 1, N)

    # lane-dense pair layout (free row-major reshape done once in HBM)
    pair_flat = pairwise_repr.reshape(B, N, N * PAIRWISE_DIM).astype(jnp.float32)

    # constant expand/fold matrices for the attention-weighted pairwise aggregation
    exp_mat = jnp.repeat(jnp.eye(N, dtype=jnp.float32), PAIRWISE_DIM, axis=1)  # (N, N*Dp)
    fold_mat = jnp.tile(jnp.eye(PAIRWISE_DIM, dtype=jnp.float32), (N, 1))      # (N*Dp, Dp)

    for layer in params["layers"]:
        rotations = jax.lax.stop_gradient(quaternion_to_matrix(quaternions))  # detach_rotations
        x = ipa_layer(layer["block"], x, pair_flat, mask_col, mask_row,
                      rotations, translations, exp_mat, fold_mat)
        # tiny frame-update linear: plain jnp (XLA fuses; pallas_call would be overhead)
        upd = jnp.einsum("bnd,de->bne", x, layer["w_frame"]) + layer["b_frame"]
        q_upd, t_upd = upd[..., :DIMS], upd[..., DIMS:]
        q_upd = jnp.concatenate([jnp.ones((B, N, 1), jnp.float32), q_upd], axis=-1)
        q_upd = q_upd / jnp.linalg.norm(q_upd, axis=-1, keepdims=True)
        quaternions = quaternion_multiply(quaternions, q_upd)
        translations = local_to_global(t_upd, rotations, translations)

    points_local = jnp.einsum("bnd,de->bne", x, params["w_points"]) + params["b_points"]
    rotations = quaternion_to_matrix(quaternions)
    return local_to_global(points_local, rotations, translations)


# ------------------------------- params ---------------------------------------
def init_params(key):
    def dense(k, fan_in, fan_out, bias=True):
        kw, kb = jax.random.split(k)
        bound = 1.0 / math.sqrt(fan_in)
        w = jax.random.uniform(kw, (fan_in, fan_out), jnp.float32, -bound, bound)
        b = (jax.random.uniform(kb, (fan_out,), jnp.float32, -bound, bound)
             if bias else jnp.zeros((fan_out,), jnp.float32))
        return w, b

    def coord_major(w):
        # (DIM, H*P*3) columns (head, point, coord) -> (DIM, 3*H*P) columns (coord, head, point)
        hp = w.shape[1] // 3
        return w.reshape(DIM, hp, 3).transpose(0, 2, 1).reshape(DIM, 3 * hp)

    keys = jax.random.split(key, DEPTH + 1)
    layers = []
    for d in range(DEPTH):
        lk = jax.random.split(keys[d], 12)
        wq_s, _ = dense(lk[0], DIM, HDS, bias=False)
        wk_s, _ = dense(lk[1], DIM, HDS, bias=False)
        wv_s, _ = dense(lk[2], DIM, HDV, bias=False)
        wq_p, _ = dense(lk[3], DIM, HPK * 3, bias=False)
        wk_p, _ = dense(lk[4], DIM, HPK * 3, bias=False)
        wv_p, _ = dense(lk[5], DIM, HPV * 3, bias=False)
        w_pair, b_pair = dense(lk[6], PAIRWISE_DIM, HEADS)
        w_out, b_out = dense(lk[7], FEATS_DIM, DIM)

        attn = {
            # fused projection weight: [q_s | k_s | v_s | q_p(x,y,z) | k_p(x,y,z) | v_p(x,y,z)]
            "w_qkv": jnp.concatenate([wq_s, wk_s, wv_s,
                                      coord_major(wq_p), coord_major(wk_p),
                                      coord_major(wv_p)], axis=1),
            "point_weights": jnp.full((HEADS,), math.log(math.expm1(1.0)), jnp.float32),
            "w_pair_bias": w_pair, "b_pair_bias": b_pair,
            "w_out": w_out, "b_out": b_out,
        }
        block = {
            "attn": attn,
            "attn_norm_g": jnp.ones((DIM,), jnp.float32),
            "attn_norm_b": jnp.zeros((DIM,), jnp.float32),
            "ff_norm_g": jnp.ones((DIM,), jnp.float32),
            "ff_norm_b": jnp.zeros((DIM,), jnp.float32),
        }
        block["ff_w0"], block["ff_b0"] = dense(lk[8], DIM, DIM)
        block["ff_w1"], block["ff_b1"] = dense(lk[9], DIM, DIM)
        block["ff_w2"], block["ff_b2"] = dense(lk[10], DIM, DIM)

        w_frame, b_frame = dense(lk[11], DIM, 2 * DIMS)
        layers.append({"block": block, "w_frame": w_frame, "b_frame": b_frame})

    w_points, b_points = dense(keys[-1], DIM, DIMS)
    return {"layers": layers, "w_points": w_points, "b_points": b_points}


# ------------------------------- main ------------------------------------------
if __name__ == "__main__":
    key = jax.random.PRNGKey(0)
    kparams, kx, kpair = jax.random.split(key, 3)
    params = init_params(kparams)

    B, N = 2, 8
    single_repr = jax.random.normal(kx, (B, N, DIM), jnp.float32)
    pairwise_repr = jax.random.normal(kpair, (B, N, N, PAIRWISE_DIM), jnp.float32)
    sequence_mask = jnp.ones((B, N), dtype=bool).at[1, -2:].set(False)

    fwd = jax.jit(ipa_transformer_forward)
    points_global = fwd(params, single_repr, pairwise_repr, sequence_mask)
    jax.block_until_ready(points_global)
    assert points_global.shape == (B, N, DIMS)
    assert bool(jnp.all(jnp.isfinite(points_global)))
    print("KERNEL_OK")
</pallas_src>

<mosaic_0001>
module attributes {stable_mosaic.version = 11 : i64} {
  func.func @_ipa_layer_kernel(%arg0: i32, %arg1: memref<1x8x32xf32, #tpu.memory_space<vmem>>, %arg2: memref<1x8x128xf32, #tpu.memory_space<vmem>>, %arg3: memref<1x8x1xf32, #tpu.memory_space<vmem>>, %arg4: memref<1x1x8xf32, #tpu.memory_space<vmem>>, %arg5: memref<1x8x9xf32, #tpu.memory_space<vmem>>, %arg6: memref<1x8x3xf32, #tpu.memory_space<vmem>>, %arg7: memref<32x240xf32, #tpu.memory_space<vmem>>, %arg8: memref<1x16xf32, #tpu.memory_space<vmem>>, %arg9: memref<128x32xf32, #tpu.memory_space<vmem>>, %arg10: memref<1x4xf32, #tpu.memory_space<vmem>>, %arg11: memref<8x128xf32, #tpu.memory_space<vmem>>, %arg12: memref<128x16xf32, #tpu.memory_space<vmem>>, %arg13: memref<160x32xf32, #tpu.memory_space<vmem>>, %arg14: memref<8x32xf32, #tpu.memory_space<vmem>>, %arg15: memref<32x32xf32, #tpu.memory_space<vmem>>, %arg16: memref<32x32xf32, #tpu.memory_space<vmem>>, %arg17: memref<32x32xf32, #tpu.memory_space<vmem>>, %arg18: memref<1x8x32xf32, #tpu.memory_space<vmem>>, %arg19: memref<8x160xf32, #tpu.memory_space<vmem>>) attributes {dimension_semantics = [#tpu.dimension_semantics<parallel>], iteration_bounds = array<i64: 2>, scalar_prefetch = 0 : i64, scratch_operands = 1 : i64, tpu.core_type = #tpu.core_type<tc>, window_params = [{transform_indices = @transform_0, window_bounds = array<i64: 1, 8, 32>}, {transform_indices = @transform_1, window_bounds = array<i64: 1, 8, 128>}, {transform_indices = @transform_2, window_bounds = array<i64: 1, 8, 1>}, {transform_indices = @transform_3, window_bounds = array<i64: 1, 1, 8>}, {transform_indices = @transform_4, window_bounds = array<i64: 1, 8, 9>}, {transform_indices = @transform_5, window_bounds = array<i64: 1, 8, 3>}, {pipeline_mode = #tpu.pipeline_mode<synchronous>, transform_indices = @transform_6, window_bounds = array<i64: 32, 240>}, {pipeline_mode = #tpu.pipeline_mode<synchronous>, transform_indices = @transform_7, window_bounds = array<i64: 1, 16>}, {pipeline_mode = #tpu.pipeline_mode<synchronous>, transform_indices = @transform_8, window_bounds = array<i64: 128, 32>}, {pipeline_mode = #tpu.pipeline_mode<synchronous>, transform_indices = @transform_9, window_bounds = array<i64: 1, 4>}, {pipeline_mode = #tpu.pipeline_mode<synchronous>, transform_indices = @transform_10, window_bounds = array<i64: 8, 128>}, {pipeline_mode = #tpu.pipeline_mode<synchronous>, transform_indices = @transform_11, window_bounds = array<i64: 128, 16>}, {pipeline_mode = #tpu.pipeline_mode<synchronous>, transform_indices = @transform_12, window_bounds = array<i64: 160, 32>}, {pipeline_mode = #tpu.pipeline_mode<synchronous>, transform_indices = @transform_13, window_bounds = array<i64: 8, 32>}, {pipeline_mode = #tpu.pipeline_mode<synchronous>, transform_indices = @transform_14, window_bounds = array<i64: 32, 32>}, {pipeline_mode = #tpu.pipeline_mode<synchronous>, transform_indices = @transform_15, window_bounds = array<i64: 32, 32>}, {pipeline_mode = #tpu.pipeline_mode<synchronous>, transform_indices = @transform_16, window_bounds = array<i64: 32, 32>}, {transform_indices = @transform_17, window_bounds = array<i64: 1, 8, 32>}]} {
    %c0 = arith.constant 0 : index
    %c0_0 = arith.constant 0 : index
    %c0_1 = arith.constant 0 : index
    %0 = vector.load %arg1[%c0, %c0_0, %c0_1] : memref<1x8x32xf32, #tpu.memory_space<vmem>>, vector<1x8x32xf32>
    %1 = vector.shape_cast %0 : vector<1x8x32xf32> to vector<8x32xf32>
    %c0_2 = arith.constant 0 : index
    %c0_3 = arith.constant 0 : index
    %c0_4 = arith.constant 0 : index
    %2 = vector.load %arg2[%c0_2, %c0_3, %c0_4] : memref<1x8x128xf32, #tpu.memory_space<vmem>>, vector<1x8x128xf32>
    %3 = vector.shape_cast %2 : vector<1x8x128xf32> to vector<8x128xf32>
    %c0_5 = arith.constant 0 : index
    %c0_6 = arith.constant 0 : index
    %c0_7 = arith.constant 0 : index
    %4 = vector.load %arg5[%c0_5, %c0_6, %c0_7] : memref<1x8x9xf32, #tpu.memory_space<vmem>>, vector<1x8x9xf32>
    %5 = vector.shape_cast %4 : vector<1x8x9xf32> to vector<8x9xf32>
    %c0_8 = arith.constant 0 : index
    %c0_9 = arith.constant 0 : index
    %c0_10 = arith.constant 0 : index
    %6 = vector.load %arg6[%c0_8, %c0_9, %c0_10] : memref<1x8x3xf32, #tpu.memory_space<vmem>>, vector<1x8x3xf32>
    %7 = vector.shape_cast %6 : vector<1x8x3xf32> to vector<8x3xf32>
    %c0_11 = arith.constant 0 : index
    %c0_12 = arith.constant 0 : index
    %c0_13 = arith.constant 0 : index
    %8 = vector.load %arg3[%c0_11, %c0_12, %c0_13] : memref<1x8x1xf32, #tpu.memory_space<vmem>>, vector<1x8x1xf32>
    %9 = vector.shape_cast %8 : vector<1x8x1xf32> to vector<8x1xf32>
    %c0_14 = arith.constant 0 : index
    %c0_15 = arith.constant 0 : index
    %c0_16 = arith.constant 0 : index
    %10 = vector.load %arg4[%c0_14, %c0_15, %c0_16] : memref<1x1x8xf32, #tpu.memory_space<vmem>>, vector<1x1x8xf32>
    %11 = vector.shape_cast %10 : vector<1x1x8xf32> to vector<1x8xf32>
    %12 = vector.broadcast %9 : vector<8x1xf32> to vector<8x8xf32>
    %13 = vector.broadcast %11 : vector<1x8xf32> to vector<8x8xf32>
    %14 = arith.mulf %12, %13 : vector<8x8xf32>
    %cst = arith.constant 5.000000e-01 : f32
    %15 = vector.broadcast %cst : f32 to vector<8x8xf32>
    %16 = arith.cmpf ogt, %14, %15 : vector<8x8xf32>
    %cst_17 = arith.constant 0.000000e+00 : f32
    %cst_18 = arith.constant -1.000000e+09 : f32
    %17 = vector.broadcast %cst_17 : f32 to vector<8x8xf32>
    %18 = vector.broadcast %cst_18 : f32 to vector<8x8xf32>
    %19 = arith.select %16, %17, %18 : vector<8x8xi1>, vector<8x8xf32>
    %c0_19 = arith.constant 0 : index
    %c0_20 = arith.constant 0 : index
    %20 = vector.load %arg7[%c0_19, %c0_20] : memref<32x240xf32, #tpu.memory_space<vmem>>, vector<32x240xf32>
    %cst_21 = arith.constant dense<0.000000e+00> : vector<8x240xf32>
    %21 = tpu.matmul %1, %20, %cst_21 {dimension_numbers = #tpu.dot_dimension_numbers<[1], [0], [0], [1], [0, 0, 1, 1], [], []>} : vector<8x32xf32>, vector<32x240xf32>, vector<8x240xf32> -> vector<8x240xf32>
    %22 = vector.extract_strided_slice %21 {offsets = [0, 0], sizes = [8, 32], strides = [1, 1]} : vector<8x240xf32> to vector<8x32xf32>
    %cst_22 = arith.constant 0.204124153 : f32
    %23 = vector.broadcast %cst_22 : f32 to vector<8x32xf32>
    %24 = arith.mulf %22, %23 : vector<8x32xf32>
    %25 = vector.extract_strided_slice %21 {offsets = [0, 32], sizes = [8, 32], strides = [1, 1]} : vector<8x240xf32> to vector<8x32xf32>
    %26 = vector.extract_strided_slice %21 {offsets = [0, 64], sizes = [8, 32], strides = [1, 1]} : vector<8x240xf32> to vector<8x32xf32>
    %27 = vector.extract_strided_slice %21 {offsets = [0, 96], sizes = [8, 16], strides = [1, 1]} : vector<8x240xf32> to vector<8x16xf32>
    %28 = vector.extract_strided_slice %21 {offsets = [0, 112], sizes = [8, 16], strides = [1, 1]} : vector<8x240xf32> to vector<8x16xf32>
    %29 = vector.extract_strided_slice %21 {offsets = [0, 128], sizes = [8, 16], strides = [1, 1]} : vector<8x240xf32> to vector<8x16xf32>
    %30 = vector.extract_strided_slice %21 {offsets = [0, 144], sizes = [8, 16], strides = [1, 1]} : vector<8x240xf32> to vector<8x16xf32>
    %31 = vector.extract_strided_slice %21 {offsets = [0, 160], sizes = [8, 16], strides = [1, 1]} : vector<8x240xf32> to vector<8x16xf32>
    %32 = vector.extract_strided_slice %21 {offsets = [0, 176], sizes = [8, 16], strides = [1, 1]} : vector<8x240xf32> to vector<8x16xf32>
    %33 = vector.extract_strided_slice %21 {offsets = [0, 192], sizes = [8, 16], strides = [1, 1]} : vector<8x240xf32> to vector<8x16xf32>
    %34 = vector.extract_strided_slice %21 {offsets = [0, 208], sizes = [8, 16], strides = [1, 1]} : vector<8x240xf32> to vector<8x16xf32>
    %35 = vector.extract_strided_slice %21 {offsets = [0, 224], sizes = [8, 16], strides = [1, 1]} : vector<8x240xf32> to vector<8x16xf32>
    %36 = vector.extract_strided_slice %5 {offsets = [0, 0], sizes = [8, 1], strides = [1, 1]} : vector<8x9xf32> to vector<8x1xf32>
    %37 = vector.extract_strided_slice %5 {offsets = [0, 1], sizes = [8, 1], strides = [1, 1]} : vector<8x9xf32> to vector<8x1xf32>
    %38 = vector.extract_strided_slice %5 {offsets = [0, 2], sizes = [8, 1], strides = [1, 1]} : vector<8x9xf32> to vector<8x1xf32>
    %39 = vector.extract_strided_slice %5 {offsets = [0, 3], sizes = [8, 1], strides = [1, 1]} : vector<8x9xf32> to vector<8x1xf32>
    %40 = vector.extract_strided_slice %5 {offsets = [0, 4], sizes = [8, 1], strides = [1, 1]} : vector<8x9xf32> to vector<8x1xf32>
    %41 = vector.extract_strided_slice %5 {offsets = [0, 5], sizes = [8, 1], strides = [1, 1]} : vector<8x9xf32> to vector<8x1xf32>
    %42 = vector.extract_strided_slice %5 {offsets = [0, 6], sizes = [8, 1], strides = [1, 1]} : vector<8x9xf32> to vector<8x1xf32>
    %43 = vector.extract_strided_slice %5 {offsets = [0, 7], sizes = [8, 1], strides = [1, 1]} : vector<8x9xf32> to vector<8x1xf32>
    %44 = vector.extract_strided_slice %5 {offsets = [0, 8], sizes = [8, 1], strides = [1, 1]} : vector<8x9xf32> to vector<8x1xf32>
    %45 = vector.extract_strided_slice %7 {offsets = [0, 0], sizes = [8, 1], strides = [1, 1]} : vector<8x3xf32> to vector<8x1xf32>
    %46 = vector.extract_strided_slice %7 {offsets = [0, 1], sizes = [8, 1], strides = [1, 1]} : vector<8x3xf32> to vector<8x1xf32>
    %47 = vector.extract_strided_slice %7 {offsets = [0, 2], sizes = [8, 1], strides = [1, 1]} : vector<8x3xf32> to vector<8x1xf32>
    %c0_23 = arith.constant 0 : index
    %c0_24 = arith.constant 0 : index
    %48 = vector.load %arg8[%c0_23, %c0_24] : memref<1x16xf32, #tpu.memory_space<vmem>>, vector<1x16xf32>
    %49 = vector.broadcast %36 : vector<8x1xf32> to vector<8x16xf32>
    %50 = arith.mulf %27, %49 : vector<8x16xf32>
    %51 = vector.broadcast %39 : vector<8x1xf32> to vector<8x16xf32>
    %52 = arith.mulf %28, %51 : vector<8x16xf32>
    %53 = arith.addf %50, %52 : vector<8x16xf32>
    %54 = vector.broadcast %42 : vector<8x1xf32> to vector<8x16xf32>
    %55 = arith.mulf %29, %54 : vector<8x16xf32>
    %56 = arith.addf %53, %55 : vector<8x16xf32>
    %57 = vector.broadcast %45 : vector<8x1xf32> to vector<8x16xf32>
    %58 = arith.addf %56, %57 : vector<8x16xf32>
    %59 = vector.broadcast %37 : vector<8x1xf32> to vector<8x16xf32>
    %60 = arith.mulf %27, %59 : vector<8x16xf32>
    %61 = vector.broadcast %40 : vector<8x1xf32> to vector<8x16xf32>
    %62 = arith.mulf %28, %61 : vector<8x16xf32>
    %63 = arith.addf %60, %62 : vector<8x16xf32>
    %64 = vector.broadcast %43 : vector<8x1xf32> to vector<8x16xf32>
    %65 = arith.mulf %29, %64 : vector<8x16xf32>
    %66 = arith.addf %63, %65 : vector<8x16xf32>
    %67 = vector.broadcast %46 : vector<8x1xf32> to vector<8x16xf32>
    %68 = arith.addf %66, %67 : vector<8x16xf32>
    %69 = vector.broadcast %38 : vector<8x1xf32> to vector<8x16xf32>
    %70 = arith.mulf %27, %69 : vector<8x16xf32>
    %71 = vector.broadcast %41 : vector<8x1xf32> to vector<8x16xf32>
    %72 = arith.mulf %28, %71 : vector<8x16xf32>
    %73 = arith.addf %70, %72 : vector<8x16xf32>
    %74 = vector.broadcast %44 : vector<8x1xf32> to vector<8x16xf32>
    %75 = arith.mulf %29, %74 : vector<8x16xf32>
    %76 = arith.addf %73, %75 : vector<8x16xf32>
    %77 = vector.broadcast %47 : vector<8x1xf32> to vector<8x16xf32>
    %78 = arith.addf %76, %77 : vector<8x16xf32>
    %79 = vector.broadcast %36 : vector<8x1xf32> to vector<8x16xf32>
    %80 = arith.mulf %30, %79 : vector<8x16xf32>
    %81 = vector.broadcast %39 : vector<8x1xf32> to vector<8x16xf32>
    %82 = arith.mulf %31, %81 : vector<8x16xf32>
    %83 = arith.addf %80, %82 : vector<8x16xf32>
    %84 = vector.broadcast %42 : vector<8x1xf32> to vector<8x16xf32>
    %85 = arith.mulf %32, %84 : vector<8x16xf32>
    %86 = arith.addf %83, %85 : vector<8x16xf32>
    %87 = vector.broadcast %45 : vector<8x1xf32> to vector<8x16xf32>
    %88 = arith.addf %86, %87 : vector<8x16xf32>
    %89 = vector.broadcast %37 : vector<8x1xf32> to vector<8x16xf32>
    %90 = arith.mulf %30, %89 : vector<8x16xf32>
    %91 = vector.broadcast %40 : vector<8x1xf32> to vector<8x16xf32>
    %92 = arith.mulf %31, %91 : vector<8x16xf32>
    %93 = arith.addf %90, %92 : vector<8x16xf32>
    %94 = vector.broadcast %43 : vector<8x1xf32> to vector<8x16xf32>
    %95 = arith.mulf %32, %94 : vector<8x16xf32>
    %96 = arith.addf %93, %95 : vector<8x16xf32>
    %97 = vector.broadcast %46 : vector<8x1xf32> to vector<8x16xf32>
    %98 = arith.addf %96, %97 : vector<8x16xf32>
    %99 = vector.broadcast %38 : vector<8x1xf32> to vector<8x16xf32>
    %100 = arith.mulf %30, %99 : vector<8x16xf32>
    %101 = vector.broadcast %41 : vector<8x1xf32> to vector<8x16xf32>
    %102 = arith.mulf %31, %101 : vector<8x16xf32>
    %103 = arith.addf %100, %102 : vector<8x16xf32>
    %104 = vector.broadcast %44 : vector<8x1xf32> to vector<8x16xf32>
    %105 = arith.mulf %32, %104 : vector<8x16xf32>
    %106 = arith.addf %103, %105 : vector<8x16xf32>
    %107 = vector.broadcast %47 : vector<8x1xf32> to vector<8x16xf32>
    %108 = arith.addf %106, %107 : vector<8x16xf32>
    %109 = vector.broadcast %36 : vector<8x1xf32> to vector<8x16xf32>
    %110 = arith.mulf %33, %109 : vector<8x16xf32>
    %111 = vector.broadcast %39 : vector<8x1xf32> to vector<8x16xf32>
    %112 = arith.mulf %34, %111 : vector<8x16xf32>
    %113 = arith.addf %110, %112 : vector<8x16xf32>
    %114 = vector.broadcast %42 : vector<8x1xf32> to vector<8x16xf32>
    %115 = arith.mulf %35, %114 : vector<8x16xf32>
    %116 = arith.addf %113, %115 : vector<8x16xf32>
    %117 = vector.broadcast %45 : vector<8x1xf32> to vector<8x16xf32>
    %118 = arith.addf %116, %117 : vector<8x16xf32>
    %119 = vector.broadcast %37 : vector<8x1xf32> to vector<8x16xf32>
    %120 = arith.mulf %33, %119 : vector<8x16xf32>
    %121 = vector.broadcast %40 : vector<8x1xf32> to vector<8x16xf32>
    %122 = arith.mulf %34, %121 : vector<8x16xf32>
    %123 = arith.addf %120, %122 : vector<8x16xf32>
    %124 = vector.broadcast %43 : vector<8x1xf32> to vector<8x16xf32>
    %125 = arith.mulf %35, %124 : vector<8x16xf32>
    %126 = arith.addf %123, %125 : vector<8x16xf32>
    %127 = vector.broadcast %46 : vector<8x1xf32> to vector<8x16xf32>
    %128 = arith.addf %126, %127 : vector<8x16xf32>
    %129 = vector.broadcast %38 : vector<8x1xf32> to vector<8x16xf32>
    %130 = arith.mulf %33, %129 : vector<8x16xf32>
    %131 = vector.broadcast %41 : vector<8x1xf32> to vector<8x16xf32>
    %132 = arith.mulf %34, %131 : vector<8x16xf32>
    %133 = arith.addf %130, %132 : vector<8x16xf32>
    %134 = vector.broadcast %44 : vector<8x1xf32> to vector<8x16xf32>
    %135 = arith.mulf %35, %134 : vector<8x16xf32>
    %136 = arith.addf %133, %135 : vector<8x16xf32>
    %137 = vector.broadcast %47 : vector<8x1xf32> to vector<8x16xf32>
    %138 = arith.addf %136, %137 : vector<8x16xf32>
    %139 = vector.broadcast %48 : vector<1x16xf32> to vector<8x16xf32>
    %140 = arith.mulf %58, %139 : vector<8x16xf32>
    %141 = vector.broadcast %48 : vector<1x16xf32> to vector<8x16xf32>
    %142 = arith.mulf %68, %141 : vector<8x16xf32>
    %143 = vector.broadcast %48 : vector<1x16xf32> to vector<8x16xf32>
    %144 = arith.mulf %78, %143 : vector<8x16xf32>
    %145 = vector.broadcast %48 : vector<1x16xf32> to vector<8x16xf32>
    %146 = arith.mulf %88, %145 : vector<8x16xf32>
    %147 = vector.broadcast %48 : vector<1x16xf32> to vector<8x16xf32>
    %148 = arith.mulf %98, %147 : vector<8x16xf32>
    %149 = vector.broadcast %48 : vector<1x16xf32> to vector<8x16xf32>
    %150 = arith.mulf %108, %149 : vector<8x16xf32>
    %151 = arith.mulf %140, %140 : vector<8x16xf32>
    %152 = arith.mulf %142, %142 : vector<8x16xf32>
    %153 = arith.addf %151, %152 : vector<8x16xf32>
    %154 = arith.mulf %144, %144 : vector<8x16xf32>
    %155 = arith.addf %153, %154 : vector<8x16xf32>
    %156 = arith.mulf %146, %146 : vector<8x16xf32>
    %157 = arith.mulf %148, %148 : vector<8x16xf32>
    %158 = arith.addf %156, %157 : vector<8x16xf32>
    %159 = arith.mulf %150, %150 : vector<8x16xf32>
    %160 = arith.addf %158, %159 : vector<8x16xf32>
    %c0_25 = arith.constant 0 : index
    %c0_26 = arith.constant 0 : index
    %161 = vector.load %arg9[%c0_25, %c0_26] : memref<128x32xf32, #tpu.memory_space<vmem>>, vector<128x32xf32>
    %cst_27 = arith.constant dense<0.000000e+00> : vector<8x32xf32>
    %162 = tpu.matmul %3, %161, %cst_27 {dimension_numbers = #tpu.dot_dimension_numbers<[1], [0], [0], [1], [0, 0, 1, 1], [], []>} : vector<8x128xf32>, vector<128x32xf32>, vector<8x32xf32> -> vector<8x32xf32>
    %c0_28 = arith.constant 0 : index
    %c0_29 = arith.constant 0 : index
    %163 = vector.load %arg10[%c0_28, %c0_29] : memref<1x4xf32, #tpu.memory_space<vmem>>, vector<1x4xf32>
    %c0_30 = arith.constant 0 : index
    %c0_31 = arith.constant 0 : index
    %164 = vector.load %arg11[%c0_30, %c0_31] : memref<8x128xf32, #tpu.memory_space<vmem>>, vector<8x128xf32>
    %c0_32 = arith.constant 0 : index
    %c0_33 = arith.constant 0 : index
    %165 = vector.load %arg12[%c0_32, %c0_33] : memref<128x16xf32, #tpu.memory_space<vmem>>, vector<128x16xf32>
    %166 = vector.extract_strided_slice %24 {offsets = [0, 0], sizes = [8, 8], strides = [1, 1]} : vector<8x32xf32> to vector<8x8xf32>
    %167 = vector.extract_strided_slice %25 {offsets = [0, 0], sizes = [8, 8], strides = [1, 1]} : vector<8x32xf32> to vector<8x8xf32>
    %168 = tpu.transpose %167, [1, 0] : vector<8x8xf32> -> vector<8x8xf32>
    %cst_34 = arith.constant dense<0.000000e+00> : vector<8x8xf32>
    %169 = tpu.matmul %166, %168, %cst_34 {dimension_numbers = #tpu.dot_dimension_numbers<[1], [0], [0], [1], [0, 0, 1, 1], [], []>} : vector<8x8xf32>, vector<8x8xf32>, vector<8x8xf32> -> vector<8x8xf32>
    %170 = vector.extract_strided_slice %140 {offsets = [0, 0], sizes = [8, 4], strides = [1, 1]} : vector<8x16xf32> to vector<8x4xf32>
    %171 = vector.extract_strided_slice %146 {offsets = [0, 0], sizes = [8, 4], strides = [1, 1]} : vector<8x16xf32> to vector<8x4xf32>
    %172 = tpu.transpose %171, [1, 0] : vector<8x4xf32> -> vector<4x8xf32>
    %cst_35 = arith.constant dense<0.000000e+00> : vector<8x8xf32>
    %173 = tpu.matmul %170, %172, %cst_35 {dimension_numbers = #tpu.dot_dimension_numbers<[1], [0], [0], [1], [0, 0, 1, 1], [], []>} : vector<8x4xf32>, vector<4x8xf32>, vector<8x8xf32> -> vector<8x8xf32>
    %174 = vector.extract_strided_slice %142 {offsets = [0, 0], sizes = [8, 4], strides = [1, 1]} : vector<8x16xf32> to vector<8x4xf32>
    %175 = vector.extract_strided_slice %148 {offsets = [0, 0], sizes = [8, 4], strides = [1, 1]} : vector<8x16xf32> to vector<8x4xf32>
    %176 = tpu.transpose %175, [1, 0] : vector<8x4xf32> -> vector<4x8xf32>
    %cst_36 = arith.constant dense<0.000000e+00> : vector<8x8xf32>
    %177 = tpu.matmul %174, %176, %cst_36 {dimension_numbers = #tpu.dot_dimension_numbers<[1], [0], [0], [1], [0, 0, 1, 1], [], []>} : vector<8x4xf32>, vector<4x8xf32>, vector<8x8xf32> -> vector<8x8xf32>
    %178 = arith.addf %173, %177 : vector<8x8xf32>
    %179 = vector.extract_strided_slice %144 {offsets = [0, 0], sizes = [8, 4], strides = [1, 1]} : vector<8x16xf32> to vector<8x4xf32>
    %180 = vector.extract_strided_slice %150 {offsets = [0, 0], sizes = [8, 4], strides = [1, 1]} : vector<8x16xf32> to vector<8x4xf32>
    %181 = tpu.transpose %180, [1, 0] : vector<8x4xf32> -> vector<4x8xf32>
    %cst_37 = arith.constant dense<0.000000e+00> : vector<8x8xf32>
    %182 = tpu.matmul %179, %181, %cst_37 {dimension_numbers = #tpu.dot_dimension_numbers<[1], [0], [0], [1], [0, 0, 1, 1], [], []>} : vector<8x4xf32>, vector<4x8xf32>, vector<8x8xf32> -> vector<8x8xf32>
    %183 = arith.addf %178, %182 : vector<8x8xf32>
    %184 = vector.extract_strided_slice %155 {offsets = [0, 0], sizes = [8, 4], strides = [1, 1]} : vector<8x16xf32> to vector<8x4xf32>
    %cst_38 = arith.constant dense<0.000000e+00> : vector<8xf32>
    %185 = vector.multi_reduction <add>, %184, %cst_38 [1] : vector<8x4xf32> to vector<8xf32>
    %186 = vector.shape_cast %185 : vector<8xf32> to vector<8x1xf32>
    %187 = vector.extract_strided_slice %160 {offsets = [0, 0], sizes = [8, 4], strides = [1, 1]} : vector<8x16xf32> to vector<8x4xf32>
    %cst_39 = arith.constant dense<0.000000e+00> : vector<8xf32>
    %188 = vector.multi_reduction <add>, %187, %cst_39 [1] : vector<8x4xf32> to vector<8xf32>
    %189 = vector.shape_cast %188 : vector<8xf32> to vector<8x1xf32>
    %190 = tpu.transpose %189, [1, 0] : vector<8x1xf32> -> vector<1x8xf32>
    %191 = vector.broadcast %186 : vector<8x1xf32> to vector<8x8xf32>
    %192 = vector.broadcast %190 : vector<1x8xf32> to vector<8x8xf32>
    %193 = arith.addf %191, %192 : vector<8x8xf32>
    %cst_40 = arith.constant 2.000000e+00 : f32
    %194 = vector.broadcast %cst_40 : f32 to vector<8x8xf32>
    %195 = arith.mulf %194, %183 : vector<8x8xf32>
    %196 = arith.subf %193, %195 : vector<8x8xf32>
    %197 = arith.subf %169, %196 : vector<8x8xf32>
    %198 = vector.extract_strided_slice %162 {offsets = [0, 0], sizes = [8, 8], strides = [1, 1]} : vector<8x32xf32> to vector<8x8xf32>
    %199 = arith.addf %197, %198 : vector<8x8xf32>
    %200 = vector.extract_strided_slice %163 {offsets = [0, 0], sizes = [1, 1], strides = [1, 1]} : vector<1x4xf32> to vector<1x1xf32>
    %201 = vector.broadcast %200 : vector<1x1xf32> to vector<8x8xf32>
    %202 = arith.addf %199, %201 : vector<8x8xf32>
    %203 = arith.addf %202, %19 : vector<8x8xf32>
    %cst_41 = arith.constant dense<0xFF800000> : vector<8xf32>
    %204 = vector.multi_reduction <maximumf>, %203, %cst_41 [1] : vector<8x8xf32> to vector<8xf32>
    %205 = vector.shape_cast %204 : vector<8xf32> to vector<8x1xf32>
    %206 = vector.broadcast %205 : vector<8x1xf32> to vector<8x8xf32>
    %207 = arith.subf %203, %206 : vector<8x8xf32>
    %208 = math.exp %207 : vector<8x8xf32>
    %cst_42 = arith.constant dense<0.000000e+00> : vector<8xf32>
    %209 = vector.multi_reduction <add>, %208, %cst_42 [1] : vector<8x8xf32> to vector<8xf32>
    %210 = vector.shape_cast %209 : vector<8xf32> to vector<8x1xf32>
    %211 = tpu.reciprocal %210 {approx = true} : vector<8x1xf32> -> vector<8x1xf32>
    %212 = vector.broadcast %211 : vector<8x1xf32> to vector<8x8xf32>
    %213 = arith.mulf %208, %212 : vector<8x8xf32>
    %214 = vector.extract_strided_slice %26 {offsets = [0, 0], sizes = [8, 8], strides = [1, 1]} : vector<8x32xf32> to vector<8x8xf32>
    %cst_43 = arith.constant dense<0.000000e+00> : vector<8x8xf32>
    %215 = tpu.matmul %213, %214, %cst_43 {dimension_numbers = #tpu.dot_dimension_numbers<[1], [0], [0], [1], [0, 0, 1, 1], [], []>} : vector<8x8xf32>, vector<8x8xf32>, vector<8x8xf32> -> vector<8x8xf32>
    %216 = vector.extract_strided_slice %118 {offsets = [0, 0], sizes = [8, 4], strides = [1, 1]} : vector<8x16xf32> to vector<8x4xf32>
    %cst_44 = arith.constant dense<0.000000e+00> : vector<8x4xf32>
    %217 = tpu.matmul %213, %216, %cst_44 {dimension_numbers = #tpu.dot_dimension_numbers<[1], [0], [0], [1], [0, 0, 1, 1], [], []>} : vector<8x8xf32>, vector<8x4xf32>, vector<8x4xf32> -> vector<8x4xf32>
    %218 = vector.extract_strided_slice %128 {offsets = [0, 0], sizes = [8, 4], strides = [1, 1]} : vector<8x16xf32> to vector<8x4xf32>
    %cst_45 = arith.constant dense<0.000000e+00> : vector<8x4xf32>
    %219 = tpu.matmul %213, %218, %cst_45 {dimension_numbers = #tpu.dot_dimension_numbers<[1], [0], [0], [1], [0, 0, 1, 1], [], []>} : vector<8x8xf32>, vector<8x4xf32>, vector<8x4xf32> -> vector<8x4xf32>
    %220 = vector.extract_strided_slice %138 {offsets = [0, 0], sizes = [8, 4], strides = [1, 1]} : vector<8x16xf32> to vector<8x4xf32>
    %cst_46 = arith.constant dense<0.000000e+00> : vector<8x4xf32>
    %221 = tpu.matmul %213, %220, %cst_46 {dimension_numbers = #tpu.dot_dimension_numbers<[1], [0], [0], [1], [0, 0, 1, 1], [], []>} : vector<8x8xf32>, vector<8x4xf32>, vector<8x4xf32> -> vector<8x4xf32>
    %cst_47 = arith.constant dense<0.000000e+00> : vector<8x128xf32>
    %222 = tpu.matmul %213, %164, %cst_47 {dimension_numbers = #tpu.dot_dimension_numbers<[1], [0], [0], [1], [0, 0, 1, 1], [], []>} : vector<8x8xf32>, vector<8x128xf32>, vector<8x128xf32> -> vector<8x128xf32>
    %223 = arith.mulf %222, %3 : vector<8x128xf32>
    %cst_48 = arith.constant dense<0.000000e+00> : vector<8x16xf32>
    %224 = tpu.matmul %223, %165, %cst_48 {dimension_numbers = #tpu.dot_dimension_numbers<[1], [0], [0], [1], [0, 0, 1, 1], [], []>} : vector<8x128xf32>, vector<128x16xf32>, vector<8x16xf32> -> vector<8x16xf32>
    %225 = vector.broadcast %45 : vector<8x1xf32> to vector<8x4xf32>
    %226 = arith.subf %217, %225 : vector<8x4xf32>
    %227 = vector.broadcast %46 : vector<8x1xf32> to vector<8x4xf32>
    %228 = arith.subf %219, %227 : vector<8x4xf32>
    %229 = vector.broadcast %47 : vector<8x1xf32> to vector<8x4xf32>
    %230 = arith.subf %221, %229 : vector<8x4xf32>
    %231 = vector.broadcast %36 : vector<8x1xf32> to vector<8x4xf32>
    %232 = arith.mulf %226, %231 : vector<8x4xf32>
    %233 = vector.broadcast %37 : vector<8x1xf32> to vector<8x4xf32>
    %234 = arith.mulf %228, %233 : vector<8x4xf32>
    %235 = arith.addf %232, %234 : vector<8x4xf32>
    %236 = vector.broadcast %38 : vector<8x1xf32> to vector<8x4xf32>
    %237 = arith.mulf %230, %236 : vector<8x4xf32>
    %238 = arith.addf %235, %237 : vector<8x4xf32>
    %239 = vector.broadcast %39 : vector<8x1xf32> to vector<8x4xf32>
    %240 = arith.mulf %226, %239 : vector<8x4xf32>
    %241 = vector.broadcast %40 : vector<8x1xf32> to vector<8x4xf32>
    %242 = arith.mulf %228, %241 : vector<8x4xf32>
    %243 = arith.addf %240, %242 : vector<8x4xf32>
    %244 = vector.broadcast %41 : vector<8x1xf32> to vector<8x4xf32>
    %245 = arith.mulf %230, %244 : vector<8x4xf32>
    %246 = arith.addf %243, %245 : vector<8x4xf32>
    %247 = vector.broadcast %42 : vector<8x1xf32> to vector<8x4xf32>
    %248 = arith.mulf %226, %247 : vector<8x4xf32>
    %249 = vector.broadcast %43 : vector<8x1xf32> to vector<8x4xf32>
    %250 = arith.mulf %228, %249 : vector<8x4xf32>
    %251 = arith.addf %248, %250 : vector<8x4xf32>
    %252 = vector.broadcast %44 : vector<8x1xf32> to vector<8x4xf32>
    %253 = arith.mulf %230, %252 : vector<8x4xf32>
    %254 = arith.addf %251, %253 : vector<8x4xf32>
    %255 = arith.mulf %238, %238 : vector<8x4xf32>
    %256 = arith.mulf %246, %246 : vector<8x4xf32>
    %257 = arith.addf %255, %256 : vector<8x4xf32>
    %258 = arith.mulf %254, %254 : vector<8x4xf32>
    %259 = arith.addf %257, %258 : vector<8x4xf32>
    %cst_49 = arith.constant 9.99999993E-9 : f32
    %260 = vector.broadcast %cst_49 : f32 to vector<8x4xf32>
    %261 = arith.addf %259, %260 : vector<8x4xf32>
    %262 = math.sqrt %261 : vector<8x4xf32>
    %c0_50 = arith.constant 0 : index
    %c0_51 = arith.constant 0 : index
    %263 = vector.load %arg19[%c0_50, %c0_51] : memref<8x160xf32, #tpu.memory_space<vmem>>, vector<8x8xf32>
    tpu.vector_store %arg19[%c0_50, %c0_51], %215 {strides = array<i32>} : memref<8x160xf32, #tpu.memory_space<vmem>>, vector<8x8xf32>,
    %c0_52 = arith.constant 0 : index
    %c32 = arith.constant 32 : index
    %264 = vector.load %arg19[%c0_52, %c32] : memref<8x160xf32, #tpu.memory_space<vmem>>, vector<8x4xf32>
    tpu.vector_store %arg19[%c0_52, %c32], %238 {strides = array<i32>} : memref<8x160xf32, #tpu.memory_space<vmem>>, vector<8x4xf32>,
    %c0_53 = arith.constant 0 : index
    %c48 = arith.constant 48 : index
    %265 = vector.load %arg19[%c0_53, %c48] : memref<8x160xf32, #tpu.memory_space<vmem>>, vector<8x4xf32>
    tpu.vector_store %arg19[%c0_53, %c48], %246 {strides = array<i32>} : memref<8x160xf32, #tpu.memory_space<vmem>>, vector<8x4xf32>,
    %c0_54 = arith.constant 0 : index
    %c64 = arith.constant 64 : index
    %266 = vector.load %arg19[%c0_54, %c64] : memref<8x160xf32, #tpu.memory_space<vmem>>, vector<8x4xf32>
    tpu.vector_store %arg19[%c0_54, %c64], %254 {strides = array<i32>} : memref<8x160xf32, #tpu.memory_space<vmem>>, vector<8x4xf32>,
    %c0_55 = arith.constant 0 : index
    %c80 = arith.constant 80 : index
    %267 = vector.load %arg19[%c0_55, %c80] : memref<8x160xf32, #tpu.memory_space<vmem>>, vector<8x4xf32>
    tpu.vector_store %arg19[%c0_55, %c80], %262 {strides = array<i32>} : memref<8x160xf32, #tpu.memory_space<vmem>>, vector<8x4xf32>,
    %c0_56 = arith.constant 0 : index
    %c96 = arith.constant 96 : index
    %268 = vector.load %arg19[%c0_56, %c96] : memref<8x160xf32, #tpu.memory_space<vmem>>, vector<8x16xf32>
    tpu.vector_store %arg19[%c0_56, %c96], %224 {strides = array<i32>} : memref<8x160xf32, #tpu.memory_space<vmem>>, vector<8x16xf32>,
    %269 = vector.extract_strided_slice %24 {offsets = [0, 8], sizes = [8, 8], strides = [1, 1]} : vector<8x32xf32> to vector<8x8xf32>
    %270 = vector.extract_strided_slice %25 {offsets = [0, 8], sizes = [8, 8], strides = [1, 1]} : vector<8x32xf32> to vector<8x8xf32>
    %271 = tpu.transpose %270, [1, 0] : vector<8x8xf32> -> vector<8x8xf32>
    %cst_57 = arith.constant dense<0.000000e+00> : vector<8x8xf32>
    %272 = tpu.matmul %269, %271, %cst_57 {dimension_numbers = #tpu.dot_dimension_numbers<[1], [0], [0], [1], [0, 0, 1, 1], [], []>} : vector<8x8xf32>, vector<8x8xf32>, vector<8x8xf32> -> vector<8x8xf32>
    %273 = vector.extract_strided_slice %140 {offsets = [0, 4], sizes = [8, 4], strides = [1, 1]} : vector<8x16xf32> to vector<8x4xf32>
    %274 = vector.extract_strided_slice %146 {offsets = [0, 4], sizes = [8, 4], strides = [1, 1]} : vector<8x16xf32> to vector<8x4xf32>
    %275 = tpu.transpose %274, [1, 0] : vector<8x4xf32> -> vector<4x8xf32>
    %cst_58 = arith.constant dense<0.000000e+00> : vector<8x8xf32>
    %276 = tpu.matmul %273, %275, %cst_58 {dimension_numbers = #tpu.dot_dimension_numbers<[1], [0], [0], [1], [0, 0, 1, 1], [], []>} : vector<8x4xf32>, vector<4x8xf32>, vector<8x8xf32> -> vector<8x8xf32>
    %277 = vector.extract_strided_slice %142 {offsets = [0, 4], sizes = [8, 4], strides = [1, 1]} : vector<8x16xf32> to vector<8x4xf32>
    %278 = vector.extract_strided_slice %148 {offsets = [0, 4], sizes = [8, 4], strides = [1, 1]} : vector<8x16xf32> to vector<8x4xf32>
    %279 = tpu.transpose %278, [1, 0] : vector<8x4xf32> -> vector<4x8xf32>
    %cst_59 = arith.constant dense<0.000000e+00> : vector<8x8xf32>
    %280 = tpu.matmul %277, %279, %cst_59 {dimension_numbers = #tpu.dot_dimension_numbers<[1], [0], [0], [1], [0, 0, 1, 1], [], []>} : vector<8x4xf32>, vector<4x8xf32>, vector<8x8xf32> -> vector<8x8xf32>
    %281 = arith.addf %276, %280 : vector<8x8xf32>
    %282 = vector.extract_strided_slice %144 {offsets = [0, 4], sizes = [8, 4], strides = [1, 1]} : vector<8x16xf32> to vector<8x4xf32>
    %283 = vector.extract_strided_slice %150 {offsets = [0, 4], sizes = [8, 4], strides = [1, 1]} : vector<8x16xf32> to vector<8x4xf32>
    %284 = tpu.transpose %283, [1, 0] : vector<8x4xf32> -> vector<4x8xf32>
    %cst_60 = arith.constant dense<0.000000e+00> : vector<8x8xf32>
    %285 = tpu.matmul %282, %284, %cst_60 {dimension_numbers = #tpu.dot_dimension_numbers<[1], [0], [0], [1], [0, 0, 1, 1], [], []>} : vector<8x4xf32>, vector<4x8xf32>, vector<8x8xf32> -> vector<8x8xf32>
    %286 = arith.addf %281, %285 : vector<8x8xf32>
    %287 = vector.extract_strided_slice %155 {offsets = [0, 4], sizes = [8, 4], strides = [1, 1]} : vector<8x16xf32> to vector<8x4xf32>
    %cst_61 = arith.constant dense<0.000000e+00> : vector<8xf32>
    %288 = vector.multi_reduction <add>, %287, %cst_61 [1] : vector<8x4xf32> to vector<8xf32>
    %289 = vector.shape_cast %288 : vector<8xf32> to vector<8x1xf32>
    %290 = vector.extract_strided_slice %160 {offsets = [0, 4], sizes = [8, 4], strides = [1, 1]} : vector<8x16xf32> to vector<8x4xf32>
    %cst_62 = arith.constant dense<0.000000e+00> : vector<8xf32>
    %291 = vector.multi_reduction <add>, %290, %cst_62 [1] : vector<8x4xf32> to vector<8xf32>
    %292 = vector.shape_cast %291 : vector<8xf32> to vector<8x1xf32>
    %293 = tpu.transpose %292, [1, 0] : vector<8x1xf32> -> vector<1x8xf32>
    %294 = vector.broadcast %289 : vector<8x1xf32> to vector<8x8xf32>
    %295 = vector.broadcast %293 : vector<1x8xf32> to vector<8x8xf32>
    %296 = arith.addf %294, %295 : vector<8x8xf32>
    %cst_63 = arith.constant 2.000000e+00 : f32
    %297 = vector.broadcast %cst_63 : f32 to vector<8x8xf32>
    %298 = arith.mulf %297, %286 : vector<8x8xf32>
    %299 = arith.subf %296, %298 : vector<8x8xf32>
    %300 = arith.subf %272, %299 : vector<8x8xf32>
    %301 = vector.extract_strided_slice %162 {offsets = [0, 8], sizes = [8, 8], strides = [1, 1]} : vector<8x32xf32> to vector<8x8xf32>
    %302 = arith.addf %300, %301 : vector<8x8xf32>
    %303 = vector.extract_strided_slice %163 {offsets = [0, 1], sizes = [1, 1], strides = [1, 1]} : vector<1x4xf32> to vector<1x1xf32>
    %304 = vector.broadcast %303 : vector<1x1xf32> to vector<8x8xf32>
    %305 = arith.addf %302, %304 : vector<8x8xf32>
    %306 = arith.addf %305, %19 : vector<8x8xf32>
    %cst_64 = arith.constant dense<0xFF800000> : vector<8xf32>
    %307 = vector.multi_reduction <maximumf>, %306, %cst_64 [1] : vector<8x8xf32> to vector<8xf32>
    %308 = vector.shape_cast %307 : vector<8xf32> to vector<8x1xf32>
    %309 = vector.broadcast %308 : vector<8x1xf32> to vector<8x8xf32>
    %310 = arith.subf %306, %309 : vector<8x8xf32>
    %311 = math.exp %310 : vector<8x8xf32>
    %cst_65 = arith.constant dense<0.000000e+00> : vector<8xf32>
    %312 = vector.multi_reduction <add>, %311, %cst_65 [1] : vector<8x8xf32> to vector<8xf32>
    %313 = vector.shape_cast %312 : vector<8xf32> to vector<8x1xf32>
    %314 = tpu.reciprocal %313 {approx = true} : vector<8x1xf32> -> vector<8x1xf32>
    %315 = vector.broadcast %314 : vector<8x1xf32> to vector<8x8xf32>
    %316 = arith.mulf %311, %315 : vector<8x8xf32>
    %317 = vector.extract_strided_slice %26 {offsets = [0, 8], sizes = [8, 8], strides = [1, 1]} : vector<8x32xf32> to vector<8x8xf32>
    %cst_66 = arith.constant dense<0.000000e+00> : vector<8x8xf32>
    %318 = tpu.matmul %316, %317, %cst_66 {dimension_numbers = #tpu.dot_dimension_numbers<[1], [0], [0], [1], [0, 0, 1, 1], [], []>} : vector<8x8xf32>, vector<8x8xf32>, vector<8x8xf32> -> vector<8x8xf32>
    %319 = vector.extract_strided_slice %118 {offsets = [0, 4], sizes = [8, 4], strides = [1, 1]} : vector<8x16xf32> to vector<8x4xf32>
    %cst_67 = arith.constant dense<0.000000e+00> : vector<8x4xf32>
    %320 = tpu.matmul %316, %319, %cst_67 {dimension_numbers = #tpu.dot_dimension_numbers<[1], [0], [0], [1], [0, 0, 1, 1], [], []>} : vector<8x8xf32>, vector<8x4xf32>, vector<8x4xf32> -> vector<8x4xf32>
    %321 = vector.extract_strided_slice %128 {offsets = [0, 4], sizes = [8, 4], strides = [1, 1]} : vector<8x16xf32> to vector<8x4xf32>
    %cst_68 = arith.constant dense<0.000000e+00> : vector<8x4xf32>
    %322 = tpu.matmul %316, %321, %cst_68 {dimension_numbers = #tpu.dot_dimension_numbers<[1], [0], [0], [1], [0, 0, 1, 1], [], []>} : vector<8x8xf32>, vector<8x4xf32>, vector<8x4xf32> -> vector<8x4xf32>
    %323 = vector.extract_strided_slice %138 {offsets = [0, 4], sizes = [8, 4], strides = [1, 1]} : vector<8x16xf32> to vector<8x4xf32>
    %cst_69 = arith.constant dense<0.000000e+00> : vector<8x4xf32>
    %324 = tpu.matmul %316, %323, %cst_69 {dimension_numbers = #tpu.dot_dimension_numbers<[1], [0], [0], [1], [0, 0, 1, 1], [], []>} : vector<8x8xf32>, vector<8x4xf32>, vector<8x4xf32> -> vector<8x4xf32>
    %cst_70 = arith.constant dense<0.000000e+00> : vector<8x128xf32>
    %325 = tpu.matmul %316, %164, %cst_70 {dimension_numbers = #tpu.dot_dimension_numbers<[1], [0], [0], [1], [0, 0, 1, 1], [], []>} : vector<8x8xf32>, vector<8x128xf32>, vector<8x128xf32> -> vector<8x128xf32>
    %326 = arith.mulf %325, %3 : vector<8x128xf32>
    %cst_71 = arith.constant dense<0.000000e+00> : vector<8x16xf32>
    %327 = tpu.matmul %326, %165, %cst_71 {dimension_numbers = #tpu.dot_dimension_numbers<[1], [0], [0], [1], [0, 0, 1, 1], [], []>} : vector<8x128xf32>, vector<128x16xf32>, vector<8x16xf32> -> vector<8x16xf32>
    %328 = vector.broadcast %45 : vector<8x1xf32> to vector<8x4xf32>
    %329 = arith.subf %320, %328 : vector<8x4xf32>
    %330 = vector.broadcast %46 : vector<8x1xf32> to vector<8x4xf32>
    %331 = arith.subf %322, %330 : vector<8x4xf32>
    %332 = vector.broadcast %47 : vector<8x1xf32> to vector<8x4xf32>
    %333 = arith.subf %324, %332 : vector<8x4xf32>
    %334 = vector.broadcast %36 : vector<8x1xf32> to vector<8x4xf32>
    %335 = arith.mulf %329, %334 : vector<8x4xf32>
    %336 = vector.broadcast %37 : vector<8x1xf32> to vector<8x4xf32>
    %337 = arith.mulf %331, %336 : vector<8x4xf32>
    %338 = arith.addf %335, %337 : vector<8x4xf32>
    %339 = vector.broadcast %38 : vector<8x1xf32> to vector<8x4xf32>
    %340 = arith.mulf %333, %339 : vector<8x4xf32>
    %341 = arith.addf %338, %340 : vector<8x4xf32>
    %342 = vector.broadcast %39 : vector<8x1xf32> to vector<8x4xf32>
    %343 = arith.mulf %329, %342 : vector<8x4xf32>
    %344 = vector.broadcast %40 : vector<8x1xf32> to vector<8x4xf32>
    %345 = arith.mulf %331, %344 : vector<8x4xf32>
    %346 = arith.addf %343, %345 : vector<8x4xf32>
    %347 = vector.broadcast %41 : vector<8x1xf32> to vector<8x4xf32>
    %348 = arith.mulf %333, %347 : vector<8x4xf32>
    %349 = arith.addf %346, %348 : vector<8x4xf32>
    %350 = vector.broadcast %42 : vector<8x1xf32> to vector<8x4xf32>
    %351 = arith.mulf %329, %350 : vector<8x4xf32>
    %352 = vector.broadcast %43 : vector<8x1xf32> to vector<8x4xf32>
    %353 = arith.mulf %331, %352 : vector<8x4xf32>
    %354 = arith.addf %351, %353 : vector<8x4xf32>
    %355 = vector.broadcast %44 : vector<8x1xf32> to vector<8x4xf32>
    %356 = arith.mulf %333, %355 : vector<8x4xf32>
    %357 = arith.addf %354, %356 : vector<8x4xf32>
    %358 = arith.mulf %341, %341 : vector<8x4xf32>
    %359 = arith.mulf %349, %349 : vector<8x4xf32>
    %360 = arith.addf %358, %359 : vector<8x4xf32>
    %361 = arith.mulf %357, %357 : vector<8x4xf32>
    %362 = arith.addf %360, %361 : vector<8x4xf32>
    %cst_72 = arith.constant 9.99999993E-9 : f32
    %363 = vector.broadcast %cst_72 : f32 to vector<8x4xf32>
    %364 = arith.addf %362, %363 : vector<8x4xf32>
    %365 = math.sqrt %364 : vector<8x4xf32>
    %c0_73 = arith.constant 0 : index
    %c8 = arith.constant 8 : index
    %366 = vector.load %arg19[%c0_73, %c8] : memref<8x160xf32, #tpu.memory_space<vmem>>, vector<8x8xf32>
    tpu.vector_store %arg19[%c0_73, %c8], %318 {strides = array<i32>} : memref<8x160xf32, #tpu.memory_space<vmem>>, vector<8x8xf32>,
    %c0_74 = arith.constant 0 : index
    %c36 = arith.constant 36 : index
    %367 = vector.load %arg19[%c0_74, %c36] : memref<8x160xf32, #tpu.memory_space<vmem>>, vector<8x4xf32>
    tpu.vector_store %arg19[%c0_74, %c36], %341 {strides = array<i32>} : memref<8x160xf32, #tpu.memory_space<vmem>>, vector<8x4xf32>,
    %c0_75 = arith.constant 0 : index
    %c52 = arith.constant 52 : index
    %368 = vector.load %arg19[%c0_75, %c52] : memref<8x160xf32, #tpu.memory_space<vmem>>, vector<8x4xf32>
    tpu.vector_store %arg19[%c0_75, %c52], %349 {strides = array<i32>} : memref<8x160xf32, #tpu.memory_space<vmem>>, vector<8x4xf32>,
    %c0_76 = arith.constant 0 : index
    %c68 = arith.constant 68 : index
    %369 = vector.load %arg19[%c0_76, %c68] : memref<8x160xf32, #tpu.memory_space<vmem>>, vector<8x4xf32>
    tpu.vector_store %arg19[%c0_76, %c68], %357 {strides = array<i32>} : memref<8x160xf32, #tpu.memory_space<vmem>>, vector<8x4xf32>,
    %c0_77 = arith.constant 0 : index
    %c84 = arith.constant 84 : index
    %370 = vector.load %arg19[%c0_77, %c84] : memref<8x160xf32, #tpu.memory_space<vmem>>, vector<8x4xf32>
    tpu.vector_store %arg19[%c0_77, %c84], %365 {strides = array<i32>} : memref<8x160xf32, #tpu.memory_space<vmem>>, vector<8x4xf32>,
    %c0_78 = arith.constant 0 : index
    %c112 = arith.constant 112 : index
    %371 = vector.load %arg19[%c0_78, %c112] : memref<8x160xf32, #tpu.memory_space<vmem>>, vector<8x16xf32>
    tpu.vector_store %arg19[%c0_78, %c112], %327 {strides = array<i32>} : memref<8x160xf32, #tpu.memory_space<vmem>>, vector<8x16xf32>,
    %372 = vector.extract_strided_slice %24 {offsets = [0, 16], sizes = [8, 8], strides = [1, 1]} : vector<8x32xf32> to vector<8x8xf32>
    %373 = vector.extract_strided_slice %25 {offsets = [0, 16], sizes = [8, 8], strides = [1, 1]} : vector<8x32xf32> to vector<8x8xf32>
    %374 = tpu.transpose %373, [1, 0] : vector<8x8xf32> -> vector<8x8xf32>
    %cst_79 = arith.constant dense<0.000000e+00> : vector<8x8xf32>
    %375 = tpu.matmul %372, %374, %cst_79 {dimension_numbers = #tpu.dot_dimension_numbers<[1], [0], [0], [1], [0, 0, 1, 1], [], []>} : vector<8x8xf32>, vector<8x8xf32>, vector<8x8xf32> -> vector<8x8xf32>
    %376 = vector.extract_strided_slice %140 {offsets = [0, 8], sizes = [8, 4], strides = [1, 1]} : vector<8x16xf32> to vector<8x4xf32>
    %377 = vector.extract_strided_slice %146 {offsets = [0, 8], sizes = [8, 4], strides = [1, 1]} : vector<8x16xf32> to vector<8x4xf32>
    %378 = tpu.transpose %377, [1, 0] : vector<8x4xf32> -> vector<4x8xf32>
    %cst_80 = arith.constant dense<0.000000e+00> : vector<8x8xf32>
    %379 = tpu.matmul %376, %378, %cst_80 {dimension_numbers = #tpu.dot_dimension_numbers<[1], [0], [0], [1], [0, 0, 1, 1], [], []>} : vector<8x4xf32>, vector<4x8xf32>, vector<8x8xf32> -> vector<8x8xf32>
    %380 = vector.extract_strided_slice %142 {offsets = [0, 8], sizes = [8, 4], strides = [1, 1]} : vector<8x16xf32> to vector<8x4xf32>
    %381 = vector.extract_strided_slice %148 {offsets = [0, 8], sizes = [8, 4], strides = [1, 1]} : vector<8x16xf32> to vector<8x4xf32>
    %382 = tpu.transpose %381, [1, 0] : vector<8x4xf32> -> vector<4x8xf32>
    %cst_81 = arith.constant dense<0.000000e+00> : vector<8x8xf32>
    %383 = tpu.matmul %380, %382, %cst_81 {dimension_numbers = #tpu.dot_dimension_numbers<[1], [0], [0], [1], [0, 0, 1, 1], [], []>} : vector<8x4xf32>, vector<4x8xf32>, vector<8x8xf32> -> vector<8x8xf32>
    %384 = arith.addf %379, %383 : vector<8x8xf32>
    %385 = vector.extract_strided_slice %144 {offsets = [0, 8], sizes = [8, 4], strides = [1, 1]} : vector<8x16xf32> to vector<8x4xf32>
    %386 = vector.extract_strided_slice %150 {offsets = [0, 8], sizes = [8, 4], strides = [1, 1]} : vector<8x16xf32> to vector<8x4xf32>
    %387 = tpu.transpose %386, [1, 0] : vector<8x4xf32> -> vector<4x8xf32>
    %cst_82 = arith.constant dense<0.000000e+00> : vector<8x8xf32>
    %388 = tpu.matmul %385, %387, %cst_82 {dimension_numbers = #tpu.dot_dimension_numbers<[1], [0], [0], [1], [0, 0, 1, 1], [], []>} : vector<8x4xf32>, vector<4x8xf32>, vector<8x8xf32> -> vector<8x8xf32>
    %389 = arith.addf %384, %388 : vector<8x8xf32>
    %390 = vector.extract_strided_slice %155 {offsets = [0, 8], sizes = [8, 4], strides = [1, 1]} : vector<8x16xf32> to vector<8x4xf32>
    %cst_83 = arith.constant dense<0.000000e+00> : vector<8xf32>
    %391 = vector.multi_reduction <add>, %390, %cst_83 [1] : vector<8x4xf32> to vector<8xf32>
    %392 = vector.shape_cast %391 : vector<8xf32> to vector<8x1xf32>
    %393 = vector.extract_strided_slice %160 {offsets = [0, 8], sizes = [8, 4], strides = [1, 1]} : vector<8x16xf32> to vector<8x4xf32>
    %cst_84 = arith.constant dense<0.000000e+00> : vector<8xf32>
    %394 = vector.multi_reduction <add>, %393, %cst_84 [1] : vector<8x4xf32> to vector<8xf32>
    %395 = vector.shape_cast %394 : vector<8xf32> to vector<8x1xf32>
    %396 = tpu.transpose %395, [1, 0] : vector<8x1xf32> -> vector<1x8xf32>
    %397 = vector.broadcast %392 : vector<8x1xf32> to vector<8x8xf32>
    %398 = vector.broadcast %396 : vector<1x8xf32> to vector<8x8xf32>
    %399 = arith.addf %397, %398 : vector<8x8xf32>
    %cst_85 = arith.constant 2.000000e+00 : f32
    %400 = vector.broadcast %cst_85 : f32 to vector<8x8xf32>
    %401 = arith.mulf %400, %389 : vector<8x8xf32>
    %402 = arith.subf %399, %401 : vector<8x8xf32>
    %403 = arith.subf %375, %402 : vector<8x8xf32>
    %404 = vector.extract_strided_slice %162 {offsets = [0, 16], sizes = [8, 8], strides = [1, 1]} : vector<8x32xf32> to vector<8x8xf32>
    %405 = arith.addf %403, %404 : vector<8x8xf32>
    %406 = vector.extract_strided_slice %163 {offsets = [0, 2], sizes = [1, 1], strides = [1, 1]} : vector<1x4xf32> to vector<1x1xf32>
    %407 = vector.broadcast %406 : vector<1x1xf32> to vector<8x8xf32>
    %408 = arith.addf %405, %407 : vector<8x8xf32>
    %409 = arith.addf %408, %19 : vector<8x8xf32>
    %cst_86 = arith.constant dense<0xFF800000> : vector<8xf32>
    %410 = vector.multi_reduction <maximumf>, %409, %cst_86 [1] : vector<8x8xf32> to vector<8xf32>
    %411 = vector.shape_cast %410 : vector<8xf32> to vector<8x1xf32>
    %412 = vector.broadcast %411 : vector<8x1xf32> to vector<8x8xf32>
    %413 = arith.subf %409, %412 : vector<8x8xf32>
    %414 = math.exp %413 : vector<8x8xf32>
    %cst_87 = arith.constant dense<0.000000e+00> : vector<8xf32>
    %415 = vector.multi_reduction <add>, %414, %cst_87 [1] : vector<8x8xf32> to vector<8xf32>
    %416 = vector.shape_cast %415 : vector<8xf32> to vector<8x1xf32>
    %417 = tpu.reciprocal %416 {approx = true} : vector<8x1xf32> -> vector<8x1xf32>
    %418 = vector.broadcast %417 : vector<8x1xf32> to vector<8x8xf32>
    %419 = arith.mulf %414, %418 : vector<8x8xf32>
    %420 = vector.extract_strided_slice %26 {offsets = [0, 16], sizes = [8, 8], strides = [1, 1]} : vector<8x32xf32> to vector<8x8xf32>
    %cst_88 = arith.constant dense<0.000000e+00> : vector<8x8xf32>
    %421 = tpu.matmul %419, %420, %cst_88 {dimension_numbers = #tpu.dot_dimension_numbers<[1], [0], [0], [1], [0, 0, 1, 1], [], []>} : vector<8x8xf32>, vector<8x8xf32>, vector<8x8xf32> -> vector<8x8xf32>
    %422 = vector.extract_strided_slice %118 {offsets = [0, 8], sizes = [8, 4], strides = [1, 1]} : vector<8x16xf32> to vector<8x4xf32>
    %cst_89 = arith.constant dense<0.000000e+00> : vector<8x4xf32>
    %423 = tpu.matmul %419, %422, %cst_89 {dimension_numbers = #tpu.dot_dimension_numbers<[1], [0], [0], [1], [0, 0, 1, 1], [], []>} : vector<8x8xf32>, vector<8x4xf32>, vector<8x4xf32> -> vector<8x4xf32>
    %424 = vector.extract_strided_slice %128 {offsets = [0, 8], sizes = [8, 4], strides = [1, 1]} : vector<8x16xf32> to vector<8x4xf32>
    %cst_90 = arith.constant dense<0.000000e+00> : vector<8x4xf32>
    %425 = tpu.matmul %419, %424, %cst_90 {dimension_numbers = #tpu.dot_dimension_numbers<[1], [0], [0], [1], [0, 0, 1, 1], [], []>} : vector<8x8xf32>, vector<8x4xf32>, vector<8x4xf32> -> vector<8x4xf32>
    %426 = vector.extract_strided_slice %138 {offsets = [0, 8], sizes = [8, 4], strides = [1, 1]} : vector<8x16xf32> to vector<8x4xf32>
    %cst_91 = arith.constant dense<0.000000e+00> : vector<8x4xf32>
    %427 = tpu.matmul %419, %426, %cst_91 {dimension_numbers = #tpu.dot_dimension_numbers<[1], [0], [0], [1], [0, 0, 1, 1], [], []>} : vector<8x8xf32>, vector<8x4xf32>, vector<8x4xf32> -> vector<8x4xf32>
    %cst_92 = arith.constant dense<0.000000e+00> : vector<8x128xf32>
    %428 = tpu.matmul %419, %164, %cst_92 {dimension_numbers = #tpu.dot_dimension_numbers<[1], [0], [0], [1], [0, 0, 1, 1], [], []>} : vector<8x8xf32>, vector<8x128xf32>, vector<8x128xf32> -> vector<8x128xf32>
    %429 = arith.mulf %428, %3 : vector<8x128xf32>
    %cst_93 = arith.constant dense<0.000000e+00> : vector<8x16xf32>
    %430 = tpu.matmul %429, %165, %cst_93 {dimension_numbers = #tpu.dot_dimension_numbers<[1], [0], [0], [1], [0, 0, 1, 1], [], []>} : vector<8x128xf32>, vector<128x16xf32>, vector<8x16xf32> -> vector<8x16xf32>
    %431 = vector.broadcast %45 : vector<8x1xf32> to vector<8x4xf32>
    %432 = arith.subf %423, %431 : vector<8x4xf32>
    %433 = vector.broadcast %46 : vector<8x1xf32> to vector<8x4xf32>
    %434 = arith.subf %425, %433 : vector<8x4xf32>
    %435 = vector.broadcast %47 : vector<8x1xf32> to vector<8x4xf32>
    %436 = arith.subf %427, %435 : vector<8x4xf32>
    %437 = vector.broadcast %36 : vector<8x1xf32> to vector<8x4xf32>
    %438 = arith.mulf %432, %437 : vector<8x4xf32>
    %439 = vector.broadcast %37 : vector<8x1xf32> to vector<8x4xf32>
    %440 = arith.mulf %434, %439 : vector<8x4xf32>
    %441 = arith.addf %438, %440 : vector<8x4xf32>
    %442 = vector.broadcast %38 : vector<8x1xf32> to vector<8x4xf32>
    %443 = arith.mulf %436, %442 : vector<8x4xf32>
    %444 = arith.addf %441, %443 : vector<8x4xf32>
    %445 = vector.broadcast %39 : vector<8x1xf32> to vector<8x4xf32>
    %446 = arith.mulf %432, %445 : vector<8x4xf32>
    %447 = vector.broadcast %40 : vector<8x1xf32> to vector<8x4xf32>
    %448 = arith.mulf %434, %447 : vector<8x4xf32>
    %449 = arith.addf %446, %448 : vector<8x4xf32>
    %450 = vector.broadcast %41 : vector<8x1xf32> to vector<8x4xf32>
    %451 = arith.mulf %436, %450 : vector<8x4xf32>
    %452 = arith.addf %449, %451 : vector<8x4xf32>
    %453 = vector.broadcast %42 : vector<8x1xf32> to vector<8x4xf32>
    %454 = arith.mulf %432, %453 : vector<8x4xf32>
    %455 = vector.broadcast %43 : vector<8x1xf32> to vector<8x4xf32>
    %456 = arith.mulf %434, %455 : vector<8x4xf32>
    %457 = arith.addf %454, %456 : vector<8x4xf32>
    %458 = vector.broadcast %44 : vector<8x1xf32> to vector<8x4xf32>
    %459 = arith.mulf %436, %458 : vector<8x4xf32>
    %460 = arith.addf %457, %459 : vector<8x4xf32>
    %461 = arith.mulf %444, %444 : vector<8x4xf32>
    %462 = arith.mulf %452, %452 : vector<8x4xf32>
    %463 = arith.addf %461, %462 : vector<8x4xf32>
    %464 = arith.mulf %460, %460 : vector<8x4xf32>
    %465 = arith.addf %463, %464 : vector<8x4xf32>
    %cst_94 = arith.constant 9.99999993E-9 : f32
    %466 = vector.broadcast %cst_94 : f32 to vector<8x4xf32>
    %467 = arith.addf %465, %466 : vector<8x4xf32>
    %468 = math.sqrt %467 : vector<8x4xf32>
    %c0_95 = arith.constant 0 : index
    %c16 = arith.constant 16 : index
    %469 = vector.load %arg19[%c0_95, %c16] : memref<8x160xf32, #tpu.memory_space<vmem>>, vector<8x8xf32>
    tpu.vector_store %arg19[%c0_95, %c16], %421 {strides = array<i32>} : memref<8x160xf32, #tpu.memory_space<vmem>>, vector<8x8xf32>,
    %c0_96 = arith.constant 0 : index
    %c40 = arith.constant 40 : index
    %470 = vector.load %arg19[%c0_96, %c40] : memref<8x160xf32, #tpu.memory_space<vmem>>, vector<8x4xf32>
    tpu.vector_store %arg19[%c0_96, %c40], %444 {strides = array<i32>} : memref<8x160xf32, #tpu.memory_space<vmem>>, vector<8x4xf32>,
    %c0_97 = arith.constant 0 : index
    %c56 = arith.constant 56 : index
    %471 = vector.load %arg19[%c0_97, %c56] : memref<8x160xf32, #tpu.memory_space<vmem>>, vector<8x4xf32>
    tpu.vector_store %arg19[%c0_97, %c56], %452 {strides = array<i32>} : memref<8x160xf32, #tpu.memory_space<vmem>>, vector<8x4xf32>,
    %c0_98 = arith.constant 0 : index
    %c72 = arith.constant 72 : index
    %472 = vector.load %arg19[%c0_98, %c72] : memref<8x160xf32, #tpu.memory_space<vmem>>, vector<8x4xf32>
    tpu.vector_store %arg19[%c0_98, %c72], %460 {strides = array<i32>} : memref<8x160xf32, #tpu.memory_space<vmem>>, vector<8x4xf32>,
    %c0_99 = arith.constant 0 : index
    %c88 = arith.constant 88 : index
    %473 = vector.load %arg19[%c0_99, %c88] : memref<8x160xf32, #tpu.memory_space<vmem>>, vector<8x4xf32>
    tpu.vector_store %arg19[%c0_99, %c88], %468 {strides = array<i32>} : memref<8x160xf32, #tpu.memory_space<vmem>>, vector<8x4xf32>,
    %c0_100 = arith.constant 0 : index
    %c128 = arith.constant 128 : index
    %474 = vector.load %arg19[%c0_100, %c128] : memref<8x160xf32, #tpu.memory_space<vmem>>, vector<8x16xf32>
    tpu.vector_store %arg19[%c0_100, %c128], %430 {strides = array<i32>} : memref<8x160xf32, #tpu.memory_space<vmem>>, vector<8x16xf32>,
    %475 = vector.extract_strided_slice %24 {offsets = [0, 24], sizes = [8, 8], strides = [1, 1]} : vector<8x32xf32> to vector<8x8xf32>
    %476 = vector.extract_strided_slice %25 {offsets = [0, 24], sizes = [8, 8], strides = [1, 1]} : vector<8x32xf32> to vector<8x8xf32>
    %477 = tpu.transpose %476, [1, 0] : vector<8x8xf32> -> vector<8x8xf32>
    %cst_101 = arith.constant dense<0.000000e+00> : vector<8x8xf32>
    %478 = tpu.matmul %475, %477, %cst_101 {dimension_numbers = #tpu.dot_dimension_numbers<[1], [0], [0], [1], [0, 0, 1, 1], [], []>} : vector<8x8xf32>, vector<8x8xf32>, vector<8x8xf32> -> vector<8x8xf32>
    %479 = vector.extract_strided_slice %140 {offsets = [0, 12], sizes = [8, 4], strides = [1, 1]} : vector<8x16xf32> to vector<8x4xf32>
    %480 = vector.extract_strided_slice %146 {offsets = [0, 12], sizes = [8, 4], strides = [1, 1]} : vector<8x16xf32> to vector<8x4xf32>
    %481 = tpu.transpose %480, [1, 0] : vector<8x4xf32> -> vector<4x8xf32>
    %cst_102 = arith.constant dense<0.000000e+00> : vector<8x8xf32>
    %482 = tpu.matmul %479, %481, %cst_102 {dimension_numbers = #tpu.dot_dimension_numbers<[1], [0], [0], [1], [0, 0, 1, 1], [], []>} : vector<8x4xf32>, vector<4x8xf32>, vector<8x8xf32> -> vector<8x8xf32>
    %483 = vector.extract_strided_slice %142 {offsets = [0, 12], sizes = [8, 4], strides = [1, 1]} : vector<8x16xf32> to vector<8x4xf32>
    %484 = vector.extract_strided_slice %148 {offsets = [0, 12], sizes = [8, 4], strides = [1, 1]} : vector<8x16xf32> to vector<8x4xf32>
    %485 = tpu.transpose %484, [1, 0] : vector<8x4xf32> -> vector<4x8xf32>
    %cst_103 = arith.constant dense<0.000000e+00> : vector<8x8xf32>
    %486 = tpu.matmul %483, %485, %cst_103 {dimension_numbers = #tpu.dot_dimension_numbers<[1], [0], [0], [1], [0, 0, 1, 1], [], []>} : vector<8x4xf32>, vector<4x8xf32>, vector<8x8xf32> -> vector<8x8xf32>
    %487 = arith.addf %482, %486 : vector<8x8xf32>
    %488 = vector.extract_strided_slice %144 {offsets = [0, 12], sizes = [8, 4], strides = [1, 1]} : vector<8x16xf32> to vector<8x4xf32>
    %489 = vector.extract_strided_slice %150 {offsets = [0, 12], sizes = [8, 4], strides = [1, 1]} : vector<8x16xf32> to vector<8x4xf32>
    %490 = tpu.transpose %489, [1, 0] : vector<8x4xf32> -> vector<4x8xf32>
    %cst_104 = arith.constant dense<0.000000e+00> : vector<8x8xf32>
    %491 = tpu.matmul %488, %490, %cst_104 {dimension_numbers = #tpu.dot_dimension_numbers<[1], [0], [0], [1], [0, 0, 1, 1], [], []>} : vector<8x4xf32>, vector<4x8xf32>, vector<8x8xf32> -> vector<8x8xf32>
    %492 = arith.addf %487, %491 : vector<8x8xf32>
    %493 = vector.extract_strided_slice %155 {offsets = [0, 12], sizes = [8, 4], strides = [1, 1]} : vector<8x16xf32> to vector<8x4xf32>
    %cst_105 = arith.constant dense<0.000000e+00> : vector<8xf32>
    %494 = vector.multi_reduction <add>, %493, %cst_105 [1] : vector<8x4xf32> to vector<8xf32>
    %495 = vector.shape_cast %494 : vector<8xf32> to vector<8x1xf32>
    %496 = vector.extract_strided_slice %160 {offsets = [0, 12], sizes = [8, 4], strides = [1, 1]} : vector<8x16xf32> to vector<8x4xf32>
    %cst_106 = arith.constant dense<0.000000e+00> : vector<8xf32>
    %497 = vector.multi_reduction <add>, %496, %cst_106 [1] : vector<8x4xf32> to vector<8xf32>
    %498 = vector.shape_cast %497 : vector<8xf32> to vector<8x1xf32>
    %499 = tpu.transpose %498, [1, 0] : vector<8x1xf32> -> vector<1x8xf32>
    %500 = vector.broadcast %495 : vector<8x1xf32> to vector<8x8xf32>
    %501 = vector.broadcast %499 : vector<1x8xf32> to vector<8x8xf32>
    %502 = arith.addf %500, %501 : vector<8x8xf32>
    %cst_107 = arith.constant 2.000000e+00 : f32
    %503 = vector.broadcast %cst_107 : f32 to vector<8x8xf32>
    %504 = arith.mulf %503, %492 : vector<8x8xf32>
    %505 = arith.subf %502, %504 : vector<8x8xf32>
    %506 = arith.subf %478, %505 : vector<8x8xf32>
    %507 = vector.extract_strided_slice %162 {offsets = [0, 24], sizes = [8, 8], strides = [1, 1]} : vector<8x32xf32> to vector<8x8xf32>
    %508 = arith.addf %506, %507 : vector<8x8xf32>
    %509 = vector.extract_strided_slice %163 {offsets = [0, 3], sizes = [1, 1], strides = [1, 1]} : vector<1x4xf32> to vector<1x1xf32>
    %510 = vector.broadcast %509 : vector<1x1xf32> to vector<8x8xf32>
    %511 = arith.addf %508, %510 : vector<8x8xf32>
    %512 = arith.addf %511, %19 : vector<8x8xf32>
    %cst_108 = arith.constant dense<0xFF800000> : vector<8xf32>
    %513 = vector.multi_reduction <maximumf>, %512, %cst_108 [1] : vector<8x8xf32> to vector<8xf32>
    %514 = vector.shape_cast %513 : vector<8xf32> to vector<8x1xf32>
    %515 = vector.broadcast %514 : vector<8x1xf32> to vector<8x8xf32>
    %516 = arith.subf %512, %515 : vector<8x8xf32>
    %517 = math.exp %516 : vector<8x8xf32>
    %cst_109 = arith.constant dense<0.000000e+00> : vector<8xf32>
    %518 = vector.multi_reduction <add>, %517, %cst_109 [1] : vector<8x8xf32> to vector<8xf32>
    %519 = vector.shape_cast %518 : vector<8xf32> to vector<8x1xf32>
    %520 = tpu.reciprocal %519 {approx = true} : vector<8x1xf32> -> vector<8x1xf32>
    %521 = vector.broadcast %520 : vector<8x1xf32> to vector<8x8xf32>
    %522 = arith.mulf %517, %521 : vector<8x8xf32>
    %523 = vector.extract_strided_slice %26 {offsets = [0, 24], sizes = [8, 8], strides = [1, 1]} : vector<8x32xf32> to vector<8x8xf32>
    %cst_110 = arith.constant dense<0.000000e+00> : vector<8x8xf32>
    %524 = tpu.matmul %522, %523, %cst_110 {dimension_numbers = #tpu.dot_dimension_numbers<[1], [0], [0], [1], [0, 0, 1, 1], [], []>} : vector<8x8xf32>, vector<8x8xf32>, vector<8x8xf32> -> vector<8x8xf32>
    %525 = vector.extract_strided_slice %118 {offsets = [0, 12], sizes = [8, 4], strides = [1, 1]} : vector<8x16xf32> to vector<8x4xf32>
    %cst_111 = arith.constant dense<0.000000e+00> : vector<8x4xf32>
    %526 = tpu.matmul %522, %525, %cst_111 {dimension_numbers = #tpu.dot_dimension_numbers<[1], [0], [0], [1], [0, 0, 1, 1], [], []>} : vector<8x8xf32>, vector<8x4xf32>, vector<8x4xf32> -> vector<8x4xf32>
    %527 = vector.extract_strided_slice %128 {offsets = [0, 12], sizes = [8, 4], strides = [1, 1]} : vector<8x16xf32> to vector<8x4xf32>
    %cst_112 = arith.constant dense<0.000000e+00> : vector<8x4xf32>
    %528 = tpu.matmul %522, %527, %cst_112 {dimension_numbers = #tpu.dot_dimension_numbers<[1], [0], [0], [1], [0, 0, 1, 1], [], []>} : vector<8x8xf32>, vector<8x4xf32>, vector<8x4xf32> -> vector<8x4xf32>
    %529 = vector.extract_strided_slice %138 {offsets = [0, 12], sizes = [8, 4], strides = [1, 1]} : vector<8x16xf32> to vector<8x4xf32>
    %cst_113 = arith.constant dense<0.000000e+00> : vector<8x4xf32>
    %530 = tpu.matmul %522, %529, %cst_113 {dimension_numbers = #tpu.dot_dimension_numbers<[1], [0], [0], [1], [0, 0, 1, 1], [], []>} : vector<8x8xf32>, vector<8x4xf32>, vector<8x4xf32> -> vector<8x4xf32>
    %cst_114 = arith.constant dense<0.000000e+00> : vector<8x128xf32>
    %531 = tpu.matmul %522, %164, %cst_114 {dimension_numbers = #tpu.dot_dimension_numbers<[1], [0], [0], [1], [0, 0, 1, 1], [], []>} : vector<8x8xf32>, vector<8x128xf32>, vector<8x128xf32> -> vector<8x128xf32>
    %532 = arith.mulf %531, %3 : vector<8x128xf32>
    %cst_115 = arith.constant dense<0.000000e+00> : vector<8x16xf32>
    %533 = tpu.matmul %532, %165, %cst_115 {dimension_numbers = #tpu.dot_dimension_numbers<[1], [0], [0], [1], [0, 0, 1, 1], [], []>} : vector<8x128xf32>, vector<128x16xf32>, vector<8x16xf32> -> vector<8x16xf32>
    %534 = vector.broadcast %45 : vector<8x1xf32> to vector<8x4xf32>
    %535 = arith.subf %526, %534 : vector<8x4xf32>
    %536 = vector.broadcast %46 : vector<8x1xf32> to vector<8x4xf32>
    %537 = arith.subf %528, %536 : vector<8x4xf32>
    %538 = vector.broadcast %47 : vector<8x1xf32> to vector<8x4xf32>
    %539 = arith.subf %530, %538 : vector<8x4xf32>
    %540 = vector.broadcast %36 : vector<8x1xf32> to vector<8x4xf32>
    %541 = arith.mulf %535, %540 : vector<8x4xf32>
    %542 = vector.broadcast %37 : vector<8x1xf32> to vector<8x4xf32>
    %543 = arith.mulf %537, %542 : vector<8x4xf32>
    %544 = arith.addf %541, %543 : vector<8x4xf32>
    %545 = vector.broadcast %38 : vector<8x1xf32> to vector<8x4xf32>
    %546 = arith.mulf %539, %545 : vector<8x4xf32>
    %547 = arith.addf %544, %546 : vector<8x4xf32>
    %548 = vector.broadcast %39 : vector<8x1xf32> to vector<8x4xf32>
    %549 = arith.mulf %535, %548 : vector<8x4xf32>
    %550 = vector.broadcast %40 : vector<8x1xf32> to vector<8x4xf32>
    %551 = arith.mulf %537, %550 : vector<8x4xf32>
    %552 = arith.addf %549, %551 : vector<8x4xf32>
    %553 = vector.broadcast %41 : vector<8x1xf32> to vector<8x4xf32>
    %554 = arith.mulf %539, %553 : vector<8x4xf32>
    %555 = arith.addf %552, %554 : vector<8x4xf32>
    %556 = vector.broadcast %42 : vector<8x1xf32> to vector<8x4xf32>
    %557 = arith.mulf %535, %556 : vector<8x4xf32>
    %558 = vector.broadcast %43 : vector<8x1xf32> to vector<8x4xf32>
    %559 = arith.mulf %537, %558 : vector<8x4xf32>
    %560 = arith.addf %557, %559 : vector<8x4xf32>
    %561 = vector.broadcast %44 : vector<8x1xf32> to vector<8x4xf32>
    %562 = arith.mulf %539, %561 : vector<8x4xf32>
    %563 = arith.addf %560, %562 : vector<8x4xf32>
    %564 = arith.mulf %547, %547 : vector<8x4xf32>
    %565 = arith.mulf %555, %555 : vector<8x4xf32>
    %566 = arith.addf %564, %565 : vector<8x4xf32>
    %567 = arith.mulf %563, %563 : vector<8x4xf32>
    %568 = arith.addf %566, %567 : vector<8x4xf32>
    %cst_116 = arith.constant 9.99999993E-9 : f32
    %569 = vector.broadcast %cst_116 : f32 to vector<8x4xf32>
    %570 = arith.addf %568, %569 : vector<8x4xf32>
    %571 = math.sqrt %570 : vector<8x4xf32>
    %c0_117 = arith.constant 0 : index
    %c24 = arith.constant 24 : index
    %572 = vector.load %arg19[%c0_117, %c24] : memref<8x160xf32, #tpu.memory_space<vmem>>, vector<8x8xf32>
    tpu.vector_store %arg19[%c0_117, %c24], %524 {strides = array<i32>} : memref<8x160xf32, #tpu.memory_space<vmem>>, vector<8x8xf32>,
    %c0_118 = arith.constant 0 : index
    %c44 = arith.constant 44 : index
    %573 = vector.load %arg19[%c0_118, %c44] : memref<8x160xf32, #tpu.memory_space<vmem>>, vector<8x4xf32>
    tpu.vector_store %arg19[%c0_118, %c44], %547 {strides = array<i32>} : memref<8x160xf32, #tpu.memory_space<vmem>>, vector<8x4xf32>,
    %c0_119 = arith.constant 0 : index
    %c60 = arith.constant 60 : index
    %574 = vector.load %arg19[%c0_119, %c60] : memref<8x160xf32, #tpu.memory_space<vmem>>, vector<8x4xf32>
    tpu.vector_store %arg19[%c0_119, %c60], %555 {strides = array<i32>} : memref<8x160xf32, #tpu.memory_space<vmem>>, vector<8x4xf32>,
    %c0_120 = arith.constant 0 : index
    %c76 = arith.constant 76 : index
    %575 = vector.load %arg19[%c0_120, %c76] : memref<8x160xf32, #tpu.memory_space<vmem>>, vector<8x4xf32>
    tpu.vector_store %arg19[%c0_120, %c76], %563 {strides = array<i32>} : memref<8x160xf32, #tpu.memory_space<vmem>>, vector<8x4xf32>,
    %c0_121 = arith.constant 0 : index
    %c92 = arith.constant 92 : index
    %576 = vector.load %arg19[%c0_121, %c92] : memref<8x160xf32, #tpu.memory_space<vmem>>, vector<8x4xf32>
    tpu.vector_store %arg19[%c0_121, %c92], %571 {strides = array<i32>} : memref<8x160xf32, #tpu.memory_space<vmem>>, vector<8x4xf32>,
    %c0_122 = arith.constant 0 : index
    %c144 = arith.constant 144 : index
    %577 = vector.load %arg19[%c0_122, %c144] : memref<8x160xf32, #tpu.memory_space<vmem>>, vector<8x16xf32>
    tpu.vector_store %arg19[%c0_122, %c144], %533 {strides = array<i32>} : memref<8x160xf32, #tpu.memory_space<vmem>>, vector<8x16xf32>,
    %c0_123 = arith.constant 0 : index
    %c0_124 = arith.constant 0 : index
    %578 = vector.load %arg19[%c0_123, %c0_124] : memref<8x160xf32, #tpu.memory_space<vmem>>, vector<8x160xf32>
    %c0_125 = arith.constant 0 : index
    %c0_126 = arith.constant 0 : index
    %579 = vector.load %arg14[%c0_125, %c0_126] : memref<8x32xf32, #tpu.memory_space<vmem>>, vector<8x32xf32>
    %c0_127 = arith.constant 0 : index
    %c0_128 = arith.constant 0 : index
    %580 = vector.load %arg13[%c0_127, %c0_128] : memref<160x32xf32, #tpu.memory_space<vmem>>, vector<160x32xf32>
    %cst_129 = arith.constant dense<0.000000e+00> : vector<8x32xf32>
    %581 = tpu.matmul %578, %580, %cst_129 {dimension_numbers = #tpu.dot_dimension_numbers<[1], [0], [0], [1], [0, 0, 1, 1], [], []>} : vector<8x160xf32>, vector<160x32xf32>, vector<8x32xf32> -> vector<8x32xf32>
    %582 = vector.extract_strided_slice %579 {offsets = [0, 0], sizes = [1, 32], strides = [1, 1]} : vector<8x32xf32> to vector<1x32xf32>
    %583 = vector.broadcast %582 : vector<1x32xf32> to vector<8x32xf32>
    %584 = arith.addf %581, %583 : vector<8x32xf32>
    %585 = arith.addf %584, %1 : vector<8x32xf32>
    %586 = vector.extract_strided_slice %579 {offsets = [1, 0], sizes = [1, 32], strides = [1, 1]} : vector<8x32xf32> to vector<1x32xf32>
    %587 = vector.extract_strided_slice %579 {offsets = [2, 0], sizes = [1, 32], strides = [1, 1]} : vector<8x32xf32> to vector<1x32xf32>
    %cst_130 = arith.constant dense<0.000000e+00> : vector<8xf32>
    %588 = vector.multi_reduction <add>, %585, %cst_130 [1] : vector<8x32xf32> to vector<8xf32>
    %589 = vector.shape_cast %588 : vector<8xf32> to vector<8x1xf32>
    %cst_131 = arith.constant 3.200000e+01 : f32
    %590 = vector.broadcast %cst_131 : f32 to vector<8x1xf32>
    %591 = arith.divf %589, %590 : vector<8x1xf32>
    %592 = vector.broadcast %591 : vector<8x1xf32> to vector<8x32xf32>
    %593 = arith.subf %585, %592 : vector<8x32xf32>
    %594 = arith.mulf %593, %593 : vector<8x32xf32>
    %cst_132 = arith.constant dense<0.000000e+00> : vector<8xf32>
    %595 = vector.multi_reduction <add>, %594, %cst_132 [1] : vector<8x32xf32> to vector<8xf32>
    %596 = vector.shape_cast %595 : vector<8xf32> to vector<8x1xf32>
    %cst_133 = arith.constant 3.200000e+01 : f32
    %597 = vector.broadcast %cst_133 : f32 to vector<8x1xf32>
    %598 = arith.divf %596, %597 : vector<8x1xf32>
    %599 = vector.broadcast %591 : vector<8x1xf32> to vector<8x32xf32>
    %600 = arith.subf %585, %599 : vector<8x32xf32>
    %cst_134 = arith.constant 9.99999974E-6 : f32
    %601 = vector.broadcast %cst_134 : f32 to vector<8x1xf32>
    %602 = arith.addf %598, %601 : vector<8x1xf32>
    %603 = math.rsqrt %602 : vector<8x1xf32>
    %604 = vector.broadcast %603 : vector<8x1xf32> to vector<8x32xf32>
    %605 = arith.mulf %600, %604 : vector<8x32xf32>
    %606 = vector.broadcast %586 : vector<1x32xf32> to vector<8x32xf32>
    %607 = arith.mulf %605, %606 : vector<8x32xf32>
    %608 = vector.broadcast %587 : vector<1x32xf32> to vector<8x32xf32>
    %609 = arith.addf %607, %608 : vector<8x32xf32>
    %c0_135 = arith.constant 0 : index
    %c0_136 = arith.constant 0 : index
    %610 = vector.load %arg15[%c0_135, %c0_136] : memref<32x32xf32, #tpu.memory_space<vmem>>, vector<32x32xf32>
    %cst_137 = arith.constant dense<0.000000e+00> : vector<8x32xf32>
    %611 = tpu.matmul %609, %610, %cst_137 {dimension_numbers = #tpu.dot_dimension_numbers<[1], [0], [0], [1], [0, 0, 1, 1], [], []>} : vector<8x32xf32>, vector<32x32xf32>, vector<8x32xf32> -> vector<8x32xf32>
    %612 = vector.extract_strided_slice %579 {offsets = [3, 0], sizes = [1, 32], strides = [1, 1]} : vector<8x32xf32> to vector<1x32xf32>
    %613 = vector.broadcast %612 : vector<1x32xf32> to vector<8x32xf32>
    %614 = arith.addf %611, %613 : vector<8x32xf32>
    %cst_138 = arith.constant 0.000000e+00 : f32
    %615 = vector.broadcast %cst_138 : f32 to vector<8x32xf32>
    %616 = arith.maximumf %614, %615 : vector<8x32xf32>
    %c0_139 = arith.constant 0 : index
    %c0_140 = arith.constant 0 : index
    %617 = vector.load %arg16[%c0_139, %c0_140] : memref<32x32xf32, #tpu.memory_space<vmem>>, vector<32x32xf32>
    %cst_141 = arith.constant dense<0.000000e+00> : vector<8x32xf32>
    %618 = tpu.matmul %616, %617, %cst_141 {dimension_numbers = #tpu.dot_dimension_numbers<[1], [0], [0], [1], [0, 0, 1, 1], [], []>} : vector<8x32xf32>, vector<32x32xf32>, vector<8x32xf32> -> vector<8x32xf32>
    %619 = vector.extract_strided_slice %579 {offsets = [4, 0], sizes = [1, 32], strides = [1, 1]} : vector<8x32xf32> to vector<1x32xf32>
    %620 = vector.broadcast %619 : vector<1x32xf32> to vector<8x32xf32>
    %621 = arith.addf %618, %620 : vector<8x32xf32>
    %cst_142 = arith.constant 0.000000e+00 : f32
    %622 = vector.broadcast %cst_142 : f32 to vector<8x32xf32>
    %623 = arith.maximumf %621, %622 : vector<8x32xf32>
    %c0_143 = arith.constant 0 : index
    %c0_144 = arith.constant 0 : index
    %624 = vector.load %arg17[%c0_143, %c0_144] : memref<32x32xf32, #tpu.memory_space<vmem>>, vector<32x32xf32>
    %cst_145 = arith.constant dense<0.000000e+00> : vector<8x32xf32>
    %625 = tpu.matmul %623, %624, %cst_145 {dimension_numbers = #tpu.dot_dimension_numbers<[1], [0], [0], [1], [0, 0, 1, 1], [], []>} : vector<8x32xf32>, vector<32x32xf32>, vector<8x32xf32> -> vector<8x32xf32>
    %626 = vector.extract_strided_slice %579 {offsets = [5, 0], sizes = [1, 32], strides = [1, 1]} : vector<8x32xf32> to vector<1x32xf32>
    %627 = vector.broadcast %626 : vector<1x32xf32> to vector<8x32xf32>
    %628 = arith.addf %625, %627 : vector<8x32xf32>
    %629 = arith.addf %628, %609 : vector<8x32xf32>
    %630 = vector.extract_strided_slice %579 {offsets = [6, 0], sizes = [1, 32], strides = [1, 1]} : vector<8x32xf32> to vector<1x32xf32>
    %631 = vector.extract_strided_slice %579 {offsets = [7, 0], sizes = [1, 32], strides = [1, 1]} : vector<8x32xf32> to vector<1x32xf32>
    %cst_146 = arith.constant dense<0.000000e+00> : vector<8xf32>
    %632 = vector.multi_reduction <add>, %629, %cst_146 [1] : vector<8x32xf32> to vector<8xf32>
    %633 = vector.shape_cast %632 : vector<8xf32> to vector<8x1xf32>
    %cst_147 = arith.constant 3.200000e+01 : f32
    %634 = vector.broadcast %cst_147 : f32 to vector<8x1xf32>
    %635 = arith.divf %633, %634 : vector<8x1xf32>
    %636 = vector.broadcast %635 : vector<8x1xf32> to vector<8x32xf32>
    %637 = arith.subf %629, %636 : vector<8x32xf32>
    %638 = arith.mulf %637, %637 : vector<8x32xf32>
    %cst_148 = arith.constant dense<0.000000e+00> : vector<8xf32>
    %639 = vector.multi_reduction <add>, %638, %cst_148 [1] : vector<8x32xf32> to vector<8xf32>
    %640 = vector.shape_cast %639 : vector<8xf32> to vector<8x1xf32>
    %cst_149 = arith.constant 3.200000e+01 : f32
    %641 = vector.broadcast %cst_149 : f32 to vector<8x1xf32>
    %642 = arith.divf %640, %641 : vector<8x1xf32>
    %643 = vector.broadcast %635 : vector<8x1xf32> to vector<8x32xf32>
    %644 = arith.subf %629, %643 : vector<8x32xf32>
    %cst_150 = arith.constant 9.99999974E-6 : f32
    %645 = vector.broadcast %cst_150 : f32 to vector<8x1xf32>
    %646 = arith.addf %642, %645 : vector<8x1xf32>
    %647 = math.rsqrt %646 : vector<8x1xf32>
    %648 = vector.broadcast %647 : vector<8x1xf32> to vector<8x32xf32>
    %649 = arith.mulf %644, %648 : vector<8x32xf32>
    %650 = vector.broadcast %630 : vector<1x32xf32> to vector<8x32xf32>
    %651 = arith.mulf %649, %650 : vector<8x32xf32>
    %652 = vector.broadcast %631 : vector<1x32xf32> to vector<8x32xf32>
    %653 = arith.addf %651, %652 : vector<8x32xf32>
    %c0_151 = arith.constant 0 : index
    %c0_152 = arith.constant 0 : index
    %c0_153 = arith.constant 0 : index
    %654 = vector.load %arg18[%c0_151, %c0_152, %c0_153] : memref<1x8x32xf32, #tpu.memory_space<vmem>>, vector<1x8x32xf32>
    %655 = vector.shape_cast %654 : vector<1x8x32xf32> to vector<8x32xf32>
    %656 = vector.shape_cast %653 : vector<8x32xf32> to vector<1x8x32xf32>
    tpu.vector_store %arg18[%c0_151, %c0_152, %c0_153], %656 {strides = array<i32>} : memref<1x8x32xf32, #tpu.memory_space<vmem>>, vector<1x8x32xf32>,
    return
  }
  func.func @transform_0(%arg0: i32) -> (i32, i32, i32) {
    %c0_i32 = arith.constant 0 : i32
    %c0_i32_0 = arith.constant 0 : i32
    %c0_i32_1 = arith.constant 0 : i32
    return %arg0, %c0_i32, %c0_i32_0 : i32, i32, i32
  }
  func.func @transform_1(%arg0: i32) -> (i32, i32, i32) {
    %c0_i32 = arith.constant 0 : i32
    %c0_i32_0 = arith.constant 0 : i32
    %c0_i32_1 = arith.constant 0 : i32
    return %arg0, %c0_i32, %c0_i32_0 : i32, i32, i32
  }
  func.func @transform_2(%arg0: i32) -> (i32, i32, i32) {
    %c0_i32 = arith.constant 0 : i32
    %c0_i32_0 = arith.constant 0 : i32
    %c0_i32_1 = arith.constant 0 : i32
    return %arg0, %c0_i32, %c0_i32_0 : i32, i32, i32
  }
  func.func @transform_3(%arg0: i32) -> (i32, i32, i32) {
    %c0_i32 = arith.constant 0 : i32
    %c0_i32_0 = arith.constant 0 : i32
    %c0_i32_1 = arith.constant 0 : i32
    return %arg0, %c0_i32, %c0_i32_0 : i32, i32, i32
  }
  func.func @transform_4(%arg0: i32) -> (i32, i32, i32) {
    %c0_i32 = arith.constant 0 : i32
    %c0_i32_0 = arith.constant 0 : i32
    %c0_i32_1 = arith.constant 0 : i32
    return %arg0, %c0_i32, %c0_i32_0 : i32, i32, i32
  }
  func.func @transform_5(%arg0: i32) -> (i32, i32, i32) {
    %c0_i32 = arith.constant 0 : i32
    %c0_i32_0 = arith.constant 0 : i32
    %c0_i32_1 = arith.constant 0 : i32
    return %arg0, %c0_i32, %c0_i32_0 : i32, i32, i32
  }
  func.func @transform_6(%arg0: i32) -> (i32, i32) {
    %c0_i32 = arith.constant 0 : i32
    %c0_i32_0 = arith.constant 0 : i32
    %c0_i32_1 = arith.constant 0 : i32
    return %c0_i32, %c0_i32_0 : i32, i32
  }
  func.func @transform_7(%arg0: i32) -> (i32, i32) {
    %c0_i32 = arith.constant 0 : i32
    %c0_i32_0 = arith.constant 0 : i32
    %c0_i32_1 = arith.constant 0 : i32
    return %c0_i32, %c0_i32_0 : i32, i32
  }
  func.func @transform_8(%arg0: i32) -> (i32, i32) {
    %c0_i32 = arith.constant 0 : i32
    %c0_i32_0 = arith.constant 0 : i32
    %c0_i32_1 = arith.constant 0 : i32
    return %c0_i32, %c0_i32_0 : i32, i32
  }
  func.func @transform_9(%arg0: i32) -> (i32, i32) {
    %c0_i32 = arith.constant 0 : i32
    %c0_i32_0 = arith.constant 0 : i32
    %c0_i32_1 = arith.constant 0 : i32
    return %c0_i32, %c0_i32_0 : i32, i32
  }
  func.func @transform_10(%arg0: i32) -> (i32, i32) {
    %c0_i32 = arith.constant 0 : i32
    %c0_i32_0 = arith.constant 0 : i32
    %c0_i32_1 = arith.constant 0 : i32
    return %c0_i32, %c0_i32_0 : i32, i32
  }
  func.func @transform_11(%arg0: i32) -> (i32, i32) {
    %c0_i32 = arith.constant 0 : i32
    %c0_i32_0 = arith.constant 0 : i32
    %c0_i32_1 = arith.constant 0 : i32
    return %c0_i32, %c0_i32_0 : i32, i32
  }
  func.func @transform_12(%arg0: i32) -> (i32, i32) {
    %c0_i32 = arith.constant 0 : i32
    %c0_i32_0 = arith.constant 0 : i32
    %c0_i32_1 = arith.constant 0 : i32
    return %c0_i32, %c0_i32_0 : i32, i32
  }
  func.func @transform_13(%arg0: i32) -> (i32, i32) {
    %c0_i32 = arith.constant 0 : i32
    %c0_i32_0 = arith.constant 0 : i32
    %c0_i32_1 = arith.constant 0 : i32
    return %c0_i32, %c0_i32_0 : i32, i32
  }
  func.func @transform_14(%arg0: i32) -> (i32, i32) {
    %c0_i32 = arith.constant 0 : i32
    %c0_i32_0 = arith.constant 0 : i32
    %c0_i32_1 = arith.constant 0 : i32
    return %c0_i32, %c0_i32_0 : i32, i32
  }
  func.func @transform_15(%arg0: i32) -> (i32, i32) {
    %c0_i32 = arith.constant 0 : i32
    %c0_i32_0 = arith.constant 0 : i32
    %c0_i32_1 = arith.constant 0 : i32
    return %c0_i32, %c0_i32_0 : i32, i32
  }
  func.func @transform_16(%arg0: i32) -> (i32, i32) {
    %c0_i32 = arith.constant 0 : i32
    %c0_i32_0 = arith.constant 0 : i32
    %c0_i32_1 = arith.constant 0 : i32
    return %c0_i32, %c0_i32_0 : i32, i32
  }
  func.func @transform_17(%arg0: i32) -> (i32, i32, i32) {
    %c0_i32 = arith.constant 0 : i32
    %c0_i32_0 = arith.constant 0 : i32
    %c0_i32_1 = arith.constant 0 : i32
    return %arg0, %c0_i32, %c0_i32_0 : i32, i32, i32
  }
}

</mosaic_0001>

<bundles_post_ra>
// kernel: ipa_transformer_forward.2
= control target key start
LH: loop header
LB: loop body
LE: loop exit
PB: predicated region body
PF: predicated region fallthrough
CT: control target
= control target key end

     0   :  { %s6107_s24 = smov 0   ;;  %s7124_s0 = inlined_call_operand.vmem [shape: f32[2,8,32], index: 0, kind: input, shape index: {}, may-alias: {0,17}]   ;;  %s7125_s1 = inlined_call_operand.vmem [shape: f32[2,8,128], index: 1, kind: input, shape index: {}]   ;;  %s7126_s2 = inlined_call_operand.vmem [shape: f32[2,8,1], index: 2, kind: input, shape index: {}]   ;;  %s7127_s3 = inlined_call_operand.vmem [shape: f32[2,1,8], index: 3, kind: input, shape index: {}]   ;;  %s7128_s4 = inlined_call_operand.vmem [shape: f32[2,8,9], index: 4, kind: input, shape index: {}]   ;;  %s7129_s5 = inlined_call_operand.vmem [shape: f32[2,8,3], index: 5, kind: input, shape index: {}]   ;;  %s7130_s6 = inlined_call_operand.vmem [shape: f32[32,240], index: 6, kind: input, shape index: {}]   ;;  %s7131_s7 = inlined_call_operand.vmem [shape: f32[1,16], index: 7, kind: input, shape index: {}]   ;;  %s7132_s8 = inlined_call_operand.vmem [shape: f32[128,32], index: 8, kind: input, shape index: {}]   ;;  %s7133_s9 = inlined_call_operand.vmem [shape: f32[1,4], index: 9, kind: input, shape index: {}]   ;;  %s7134_s10 = inlined_call_operand.vmem [shape: f32[8,128], index: 10, kind: input, shape index: {}]   ;;  %s7135_s11 = inlined_call_operand.vmem [shape: f32[128,16], index: 11, kind: input, shape index: {}]   ;;  %s7136_s12 = inlined_call_operand.vmem [shape: f32[160,32], index: 12, kind: input, shape index: {}]   ;;  %s7137_s13 = inlined_call_operand.vmem [shape: f32[8,32], index: 13, kind: input, shape index: {}]   ;;  %s7138_s14 = inlined_call_operand.vmem [shape: f32[32,32], index: 14, kind: input, shape index: {}]   ;;  %s7139_s15 = inlined_call_operand.vmem [shape: f32[32,32], index: 15, kind: input, shape index: {}]   ;;  %s7140_s16 = inlined_call_operand.vmem [shape: f32[32,32], index: 16, kind: input, shape index: {}]   ;;  %s7141_s17 = inlined_call_operand.vmem [shape: f32[2,8,32], index: 17, kind: output, shape index: {}, may-alias: {0,17}]  }
   0x1   :  { %7156 = sst [smem:[#allocation3_spill]] %s7124_s0 }
   0x2   :  { %7157 = sst [smem:[#allocation4_spill]] %s7125_s1 }
   0x3 LB: > { %s5049_s25 = sadd.s32 4294967295, %s5975_s24   ;;  %p5053_p0 = scmp.ge.s32.totalorder %s5975_s24, 1  ;;  %s5975_s24 = sphi %s6107_s24, %s27_s24  }
   0x4   : > { %p530_p1 = scmp.lt.s32.totalorder %s5975_s24, 3 }
   0x6   : > { %p531_p2 = pnand %p5053_p0, %p530_p1 }
   0x7   : > { %v647_v0 = vld [vmem:[%s7130_s6 + $0x8] sm:$0xff] (!%p531_p2)  ;;  %v649_v1 = vld [vmem:[%s7130_s6 + $0x18] sm:$0xff] (!%p531_p2)  ;;  %v646_v2 = vld [vmem:[%s7130_s6] sm:$0xff] (!%p531_p2)  ;;  %p599_p3 = scmp.lt.s32.totalorder (!%p531_p2), %s5049_s25, 1  ;;  %v7149_v7 = vmov (!%p531_p2), 0.0   ;;  %v7151_v12 = vmov (!%p531_p2), 3  }
   0x8   : > { %534 = sbr.rel (%p531_p2) target bundleno = 4868 (0x1304), region = 88  ;;  %v5682_v3 = vpack.c.bf16 (!%p531_p2), %v649_v1, %v647_v0  ;;  %v648_v4 = vld [vmem:[%s7130_s6 + $0x10] sm:$0xff] (!%p531_p2)  ;;  %v651_v5 = vld [vmem:[%s7130_s6 + $0x28] sm:$0xff] (!%p531_p2)  ;;  %v653_v6 = vld [vmem:[%s7130_s6 + $0x38] sm:$0xff] (!%p531_p2)  ;;  %722 = vmatprep.mubr.f32.mxu0 (!%p531_p2), %v7149_v7  ;;  %5924 = vset.pattern.permute.xlu1 (!%p531_p2), %v7151_v12  ;;  %v5979_v13 = vmov (!%p531_p2), 4   ;;  %s7158_s18 = sld [smem:[#allocation3_spill]] (!%p531_p2) }
   0x9   : > { %v5684_v8 = vpack.c.bf16 (!%p531_p2), %v648_v4, %v646_v2  ;;  %v5686_v9 = vpack.c.bf16 (!%p531_p2), %v653_v6, %v651_v5  ;;  %v650_v10 = vld [vmem:[%s7130_s6 + $0x20] sm:$0xff] (!%p531_p2)  ;;  %v652_v11 = vld [vmem:[%s7130_s6 + $0x30] sm:$0xff] (!%p531_p2)  ;;  %5922 = vset.pattern.permute.xlu0 (!%p531_p2), %v5979_v13  ;;  %vm654_vm0 = vcmask (!%p531_p2), 261120   ;;  %v5980_v17 = vmov (!%p531_p2), 6   ;;  %s7142_s0 = smov (!%p531_p2), 16   ;;  %s5988_s30 = smov (!%p531_p2), 112  }
   0xa   : > { %5683 = vmatprep.subr.bf16.mxu0 (!%p531_p2), %v5682_v3  ;;  %v5688_v14 = vpack.c.bf16 (!%p531_p2), %v652_v11, %v650_v10  ;;  %v5981_v18 = vmov (!%p531_p2), 7   ;;  %v5982_v19 = vmov (!%p531_p2), 5   ;;  %v5983_v20 = vmov (!%p531_p2), 8   ;;  %v5062_v25 = vld [vmem:[%s7131_s7] ss:$0 sm:$0xff] (!%p531_p2)  ;;  %s5991_s1 = smov (!%p531_p2), 32  }
   0xb   : > { %5685 = vmatpush1.bf16.msra.mxu0 (!%p531_p2), %v5684_v8  ;;  %v5984_v21 = vmov (!%p531_p2), 1   ;;  %v5985_v22 = vmov (!%p531_p2), 0   ;;  %v5986_v24 = vmov (!%p531_p2), 2   ;;  %vm5990_vm1 = vmmov (!%p531_p2), 0   ;;  %s5997_s28 = smov (!%p531_p2), 28   ;;  %s7144_s20 = smov (!%p531_p2), 88  }
   0xc   : > { %5687 = vmatprep.subr.bf16.mxu0 (!%p531_p2), %v5686_v9  ;;  %5326 = vmatprep.mubr.msk.f32.mxu1 (!%p531_p2), %vm5990_vm1, %v7149_v7  ;;  %vm984_vm2 = vcmask (!%p531_p2), 64512   ;;  %vm1066_vm3 = vcmask (!%p531_p2), 31744   ;;  %vm1854_vm7 = vcmask (!%p531_p2), 294144   ;;  %vm1860_vm8 = vcmask (!%p531_p2), 425344  }
   0xd   : > { %vm1866_vm9 = vcmask (!%p531_p2), 556544   ;;  %vm1872_vm12 = vcmask (!%p531_p2), 687744   ;;  %vm1878_vm13 = vcmask (!%p531_p2), 917248   ;;  %vm2738_vm14 = vcmask (!%p531_p2), 130112  }
   0xe   : > { %vm2744_vm15 = vcmask (!%p531_p2), 326944  }
   0xf   : > { %s7171_s25 = smov (!%p599_p3, %s5049_s25), 1  ;;  %5689 = vmatpush1.bf16.msra.mxu0 %v5688_v14 }
  0x10   : > { %s6144_s29 = sshll.u32 %s7171_s25, 3  ;;  %5329 = vmatprep.subr.mxu0 %v7149_v7  ;;  %s613_s23 = scalar_lea.vmem %s7127_s3, %s7171_s25 }
  0x11   : > { %s6150_s19 = scalar_lea.vmem %s7158_s18, %s6144_s29  ;;  %s617_s21 = scalar_lea.vmem %s7128_s4, %s6144_s29 }
  0x12   : > { %v628_v15 = vld [vmem:[%s617_s21] sm:$0xff]  ;;  %s621_s26 = scalar_lea.vmem %s7129_s5, %s6144_s29  ;;  %s7145_s18 = smov 96  }
  0x13   : > { %v626_v16 = vld [vmem:[%s6150_s19] sm:$0xff]  ;;  %738 = vperm.xlu1 %5924, %v628_v15   ;;  %769 = vperm.xlu0 %5922, %v628_v15   ;;  %s610_s27 = scalar_lea.vmem %s7126_s2, %s6144_s29  ;;  %s7146_s25 = smov 64  }
  0x14   : > { %5061 = vmatmul.mubr.msk.f32.vlgmr.msra.gmra.mrb[0].mxu0 %vm654_vm0, %v626_v16  ;;  %v629_v23 = vld [vmem:[%s621_s26] sm:$0xff]  ;;  %s5995_s26 = smov 120   ;;  %s7154_s21 = smov 24  }
  0x15   : > { %5331 = vmatprep.mubr.msk.f32.mxu0 %vm5990_vm1, %v7149_v7 }
  0x17   : > { %5925 = vset.pattern.permute.xlu1 %v5980_v17  ;;  %5923 = vset.pattern.permute.xlu0 %v5981_v18 }
  0x18   : > { %748 = vperm.xlu1 %5925, %v628_v15   ;;  %779 = vperm.xlu0 %5923, %v628_v15  }
  0x1c   : > { %5926 = vset.pattern.permute.xlu1 %v5982_v19  ;;  %5927 = vset.pattern.permute.xlu0 %v5983_v20 }
  0x1d   : > { %799 = vperm.xlu1 %5926, %v628_v15   ;;  %809 = vperm.xlu0 %5927, %v628_v15  }
  0x21   : > { %5928 = vset.pattern.permute.xlu1 %v5984_v21  ;;  %5929 = vset.pattern.permute.xlu0 %v5985_v22 }
  0x22   : > { %764 = vperm.xlu1 %5928, %v628_v15   ;;  %733 = vperm.xlu0 %5929, %v628_v15  }
  0x26   : > { %789 = vperm.xlu1 %5928, %v629_v23   ;;  %5932 = vset.pattern.permute.xlu0 %v5986_v24 }
  0x27   : > { %861 = vrot.lane.b32.xlu0 %v5062_v25, %s7142_s0  ;;  %s7159_s0 = sld [smem:[#allocation4_spill]] }
  0x2a   : > { %5930 = vset.pattern.permute.xlu1 %v5985_v22 }
  0x2b   : > { %759 = vperm.xlu1 %5930, %v629_v23  }
  0x2d   : > { %s6372_s22 = scalar_lea.vmem %s7159_s0, %s6144_s29  ;;  %s6008_s0 = smov 40  }
  0x2f   : > { %5931 = vset.pattern.permute.xlu1 %v5986_v24 }
  0x30   : > { %794 = vperm.xlu1 %5931, %v628_v15  }
  0x34   : > { %5934 = vset.pattern.permute.xlu1 %v5985_v22 }
  0x92   : > { %v6170_v26 = vpop.permute.xlu0 %769  ;;  %v6178_v30 = vpop.permute.xlu1 %738 }
  0x97   : > { %v6184_v32 = vpop.permute.xlu0 %779  ;;  %v6191_v35 = vpop.permute.xlu1 %748 }
  0x9c   : > { %v6200_v38 = vpop.permute.xlu1 %799  ;;  %v6213_v41 = vpop.permute.xlu0 %809 }
  0xa1   : > { %v6220_v43 = vpop.permute.xlu1 %764  ;;  %v6224_v45 = vpop.permute.xlu0 %733 }
  0xa5   : > { %v6222_v44 = vpop.permute.xlu1 %789  ;;  %v862_v47 = vpop.permute.xlu0 %861 }
  0xaa   : > { %v6226_v46 = vpop.permute.xlu1 %759 }
  0xaf   : > { %v6228_v48 = vpop.permute.xlu1 %794 }
  0xe7   : > { %v6172_v27 = vpop.f32.mrb[0].mxu0 }
  0xe8   : > { %v6174_v28 = vpop.f32.mrb[1].mxu0  ;;  %v772_v29 = vmul.f32 %v6170_v26, %v6172_v27  ;;  %v741_v37 = vmul.f32 %v6178_v30, %v6172_v27  ;;  %v802_v39 = vmul.f32 %v6200_v38, %v6172_v27  ;;  %v767_v51 = vmul.f32 %v6220_v43, %v6172_v27 }
  0xe9   : > { %v833_v31 = vmul.f32 %v6170_v26, %v6174_v28  ;;  %v824_v33 = vmul.f32 %v6178_v30, %v6174_v28  ;;  %v782_v34 = vmul.f32 %v6184_v32, %v6174_v28  ;;  %v751_v36 = vmul.f32 %v6191_v35, %v6174_v28 }
  0xea   : > { %774 = vrot.lane.b32.xlu0 %v772_v29, %s5988_s30  ;;  %v842_v40 = vmul.f32 %v6200_v38, %v6174_v28  ;;  %v812_v42 = vmul.f32 %v6213_v41, %v6174_v28  ;;  %v832_v52 = vmul.f32 %v6220_v43, %v6174_v28  ;;  %v823_v56 = vmul.f32 %v6224_v45, %v6174_v28 }
  0xeb   : > { %835 = vrot.lane.b32.xlu1 %v833_v31, %s5988_s30  ;;  %v736_v5 = vmul.f32 %v6224_v45, %v6172_v27  ;;  %v841_v15 = vmul.f32 %v6228_v48, %v6174_v28  ;;  %v797_v28 = vmul.f32 %v6228_v48, %v6172_v27 }
  0xee   : > { %826 = vrot.lane.b32.xlu0 %v824_v33, %s5988_s30 }
  0xef   : > { %784 = vrot.lane.b32.xlu1 %v782_v34, %s7145_s18 }
  0xf2   : > { %753 = vrot.lane.b32.xlu0 %v751_v36, %s7145_s18 }
  0xf3   : > { %855 = vrot.lane.b32.xlu1 %v5062_v25, %s7145_s18  ;;  %v6275_v25 = vmul.f32 0.20412415, %v6172_v27 }
  0xf6   : > { %819 = vperm.xlu0 %5932, %v629_v23  }
  0xf7   : > { %743 = vrot.lane.b32.xlu1 %v741_v37, %s5988_s30 }
  0xfa   : > { %804 = vrot.lane.b32.xlu0 %v802_v39, %s5988_s30  ;;  %v877_v39 = vld [vmem:[%s7132_s8] sm:$0xff] }
  0xfb   : > { %844 = vrot.lane.b32.xlu1 %v842_v40, %s5988_s30  ;;  %5933 = vset.pattern.permute.xlu0 %v5985_v22  ;;  %v878_v40 = vld [vmem:[%s7132_s8 + $0x8] sm:$0xff] }
  0xff   : > { %814 = vrot.lane.b32.xlu1 %v812_v42, %s7145_s18  ;;  %v879_v42 = vld [vmem:[%s7132_s8 + $0x10] sm:$0xff] }
 0x103   : > { %982 = vrot.lane.b32.xlu1 %v6172_v27, %s7145_s18  ;;  %s7155_s18 = smov 72  }
 0x15c   : > { %v775_v49 = vpop.permute.xlu0 %774 }
 0x15d   : > { %v836_v50 = vpop.permute.xlu1 %835  ;;  %v777_v53 = vadd.f32 %v775_v49, %v767_v51  ;;  %v5691_v49 = vpack.c.bf16 %v878_v40, %v877_v39 }
 0x15e   : > { %v838_v54 = vadd.f32 %v836_v50, %v832_v52  ;;  %v880_v50 = vld [vmem:[%s7132_s8 + $0x18] sm:$0xff] }
 0x160   : > { %v827_v55 = vpop.permute.xlu0 %826 }
 0x161   : > { %v785_v57 = vpop.permute.xlu1 %784  ;;  %v829_v60 = vadd.f32 %v827_v55, %v823_v56  ;;  %v881_v56 = vld [vmem:[%s7132_s8 + $0x20] sm:$0xff] }
 0x162   : > { %v787_v58 = vadd.f32 %v785_v57, %v777_v53  ;;  %v839_v59 = vadd.f32 %v838_v54, %v785_v57  ;;  %v5694_v53 = vpack.c.bf16 %v880_v50, %v879_v42  ;;  %v882_v57 = vld [vmem:[%s7132_s8 + $0x28] sm:$0xff] }
 0x164   : > { %v792_v61 = vadd.f32 %v6222_v44, %v787_v58  ;;  %v6238_v62 = vadd.f32 %v839_v59, %v6222_v44  ;;  %v754_v63 = vpop.permute.xlu0 %753 }
 0x165   : > { %v830_v0 = vadd.f32 %v829_v60, %v754_v63  ;;  %v856_v1 = vpop.permute.xlu1 %855  ;;  %v5697_v60 = vpack.c.bf16 %v882_v57, %v881_v56 }
 0x166   : > { %v6240_v2 = vmul.f32 %v856_v1, %v792_v61  ;;  %v6243_v3 = vmul.f32 %v862_v47, %v6238_v62 }
 0x167   : > { %v6246_v4 = vadd.f32 %v830_v0, %v6226_v46  ;;  %v883_v0 = vld [vmem:[%s7132_s8 + $0x30] sm:$0xff] }
 0x168   : > { %1061 = vrot.lane.b32.xlu1 %v6240_v2, %s5991_s1  ;;  %1064 = vrot.lane.b32.xlu0 %v6243_v3, %s5988_s30  ;;  %v873_v31 = vmul.f32 %v6243_v3, %v6243_v3  ;;  %v868_v59 = vmul.f32 %v6240_v2, %v6240_v2 }
 0x169   : > { %v744_v6 = vpop.permute.xlu1 %743  ;;  %v6255_v8 = vmul.f32 %v862_v47, %v6246_v4 }
 0x16a   : > { %v746_v9 = vadd.f32 %v744_v6, %v736_v5 }
 0x16b   : > { %v872_v23 = vmul.f32 %v6255_v8, %v6255_v8 }
 0x16c   : > { %v756_v10 = vadd.f32 %v754_v63, %v746_v9  ;;  %1145 = vrot.lane.b32.xlu0 %v6255_v8, %s5988_s30  ;;  %v885_v9 = vld [vmem:[%s7132_s8 + $0x40] sm:$0xff] }
 0x16d   : > { %v845_v11 = vpop.permute.xlu1 %844  ;;  %v874_v36 = vadd.f32 %v873_v31, %v872_v23  ;;  %v891_v23 = vld [vmem:[%s7132_s8 + $0x70] sm:$0xff] }
 0x16e   : > { %v762_v13 = vadd.f32 %v6226_v46, %v756_v10  ;;  %v847_v17 = vadd.f32 %v845_v11, %v841_v15  ;;  %v886_v10 = vld [vmem:[%s7132_s8 + $0x48] sm:$0xff]  ;;  %v888_v15 = vld [vmem:[%s7132_s8 + $0x58] sm:$0xff] }
 0x16f   : > { %v5703_v11 = vpack.c.bf16 %v886_v10, %v885_v9 }
 0x170   : > { %v6260_v14 = vmul.f32 %v856_v1, %v762_v13  ;;  %v887_v13 = vld [vmem:[%s7132_s8 + $0x50] sm:$0xff] }
 0x171   : > { %v815_v16 = vpop.permute.xlu1 %814 }
 0x172   : > { %1142 = vrot.lane.b32.xlu1 %v6260_v14, %s5991_s1  ;;  %v848_v18 = vadd.f32 %v847_v17, %v815_v16  ;;  %v867_v55 = vmul.f32 %v6260_v14, %v6260_v14  ;;  %v889_v17 = vld [vmem:[%s7132_s8 + $0x60] sm:$0xff] }
 0x174   : > { %v869_v61 = vadd.f32 %v868_v59, %v867_v55  ;;  %v630_v55 = vld [vmem:[%s610_s27] sm:$0xff]  ;;  %s5996_s27 = smov 108  }
 0x175   : > { %v983_v19 = vpop.permute.xlu1 %982  ;;  %v6266_v20 = vpop.permute.xlu0 %819 }
 0x176   : > { %v6269_v22 = vadd.f32 %v848_v18, %v6266_v20  ;;  %5330 = vmatpush3.xpose.msk.msra.mxu0 %vm984_vm2, %v983_v19  ;;  %v890_v18 = vld [vmem:[%s7132_s8 + $0x68] sm:$0xff] }
 0x177   : > { %5334 = vmatprep.subr.mxu0 %v7149_v7  ;;  %v5709_v19 = vpack.c.bf16 %v890_v18, %v889_v17 }
 0x178   : > { %v6281_v29 = vmul.f32 %v862_v47, %v6269_v22  ;;  %v7147_v47 = vmov 0.0|0.0  }
 0x179   : > { %5332 = vmatmul.mubr.msk.f32.vlgmr.msra.gmra.mrb[2].mxu0 %vm984_vm2, %v6275_v25  ;;  %v805_v33 = vpop.permute.xlu0 %804  ;;  %5690 = vmatprep.subr.bf16.mxu1 %v7147_v47 }
 0x17a   : > { %v807_v34 = vadd.f32 %v805_v33, %v797_v28  ;;  %1225 = vrot.lane.b32.xlu0 %v6281_v29, %s5988_s30  ;;  %v875_v37 = vmul.f32 %v6281_v29, %v6281_v29  ;;  %5336 = vmatprep.mubr.msk.f32.mxu0 %vm5990_vm1, %v7149_v7  ;;  %v892_v28 = vld [vmem:[%s7132_s8 + $0x78] sm:$0xff]  ;;  %v6375_v33 = vld [vmem:[%s6372_s22] sm:$0xff] }
 0x17b   : > { %5692 = vmatpush3.bf16.msra.mxu1 %v5691_v49  ;;  %v5712_v31 = vpack.c.bf16 %v892_v28, %v891_v23 }
 0x17c   : > { %v817_v51 = vadd.f32 %v815_v16, %v807_v34  ;;  %v6306_v52 = vadd.f32 %v875_v37, %v874_v36  ;;  %5693 = vmatprep.subr.bf16.mxu1 %v7147_v47  ;;  %v5706_v16 = vpack.c.bf16 %v888_v15, %v887_v13  ;;  %v5060_v13 = vld [vmem:[%s613_s23] ss:$0 sm:$0xff]  ;;  %s5999_s23 = smov 104  }
 0x17e   : > { %v822_v54 = vadd.f32 %v6266_v20, %v817_v51  ;;  %1310 = vrot.lane.b32.xlu0 %v6306_v52, %s5988_s30 }
 0x17f   : > { %5695 = vmatpush3.bf16.msra.mxu1 %v5694_v53 }
 0x180   : > { %v6320_v58 = vmul.f32 %v856_v1, %v822_v54  ;;  %5696 = vmatprep.subr.bf16.mxu1 %v7147_v47  ;;  %v884_v1 = vld [vmem:[%s7132_s8 + $0x38] sm:$0xff]  ;;  %v6405_v54 = vld [vmem:[%s7133_s9] ss:$0 sm:$0xff] }
 0x181   : > { %v5700_v6 = vpack.c.bf16 %v884_v1, %v883_v0  ;;  %v1348_v1 = vlaneseq }
 0x182   : > { %1222 = vrot.lane.b32.xlu1 %v6320_v58, %s5991_s1  ;;  %v870_v63 = vmul.f32 %v6320_v58, %v6320_v58 }
 0x183   : > { %5698 = vmatpush3.bf16.msra.mxu1 %v5697_v60  ;;  %v6411_v9 = vshrl.u32 %v1348_v1, 7 }
 0x184   : > { %v6335_v5 = vadd.f32 %v870_v63, %v869_v61  ;;  %5699 = vmatprep.subr.bf16.mxu1 %v7147_v47 }
 0x186   : > { %1303 = vrot.lane.b32.xlu1 %v6335_v5, %s5991_s1 }
 0x187   : > { %5701 = vmatpush3.bf16.msra.mxu1 %v5700_v6 }
 0x188   : > { %5702 = vmatprep.subr.bf16.mxu1 %v7147_v47 }
 0x18b   : > { %5704 = vmatpush3.bf16.msra.mxu1 %v5703_v11  ;;  %v6414_v11 = vsub.s32 0, %v6411_v9 }
 0x18c   : > { %5705 = vmatprep.subr.bf16.mxu1 %v7147_v47 }
 0x18f   : > { %5707 = vmatpush3.bf16.msra.mxu1 %v5706_v16 }
 0x190   : > { %5708 = vmatprep.subr.bf16.mxu1 %v7147_v47 }
 0x193   : > { %5710 = vmatpush3.bf16.msra.mxu1 %v5709_v19 }
 0x194   : > { %5711 = vmatprep.subr.bf16.mxu1 %v7147_v47 }
 0x197   : > { %5713 = vmatpush3.bf16.msra.mxu1 %v5712_v31 }
 0x198   : > { %5364 = vmatprep.subr.mxu1 %v7149_v7 }
 0x19a   : > { %5327 = vmatmul.mubr.f32.vlgmr.msra.gmra.mrb[0].mxu1 %v6375_v33 }
 0x19b   : > { %5366 = vmatprep.mubr.msk.f32.mxu1 %vm5990_vm1, %v7149_v7 }
 0x1da   : > { %v1065_v34 = vpop.permute.xlu0 %1064  ;;  %v1062_v36 = vpop.permute.xlu1 %1061 }
 0x1db   : > { %5335 = vmatpush3.xpose.msk.msra.mxu0 %vm1066_vm3, %v1065_v34  ;;  %v5993_v34 = vmov -1e+09  }
 0x1dc   : > { %5339 = vmatprep.subr.mxu0 %v7149_v7 }
 0x1de   : > { %5337 = vmatmul.mubr.msk.f32.vlgmr.msra.gmra.mrb[4].mxu0 %vm1066_vm3, %v1062_v36  ;;  %v1146_v37 = vpop.permute.xlu0 %1145 }
 0x1df   : > { %5340 = vmatpush3.xpose.msk.msra.mxu0 %vm1066_vm3, %v1146_v37  ;;  %5341 = vmatprep.mubr.msk.f32.mxu0 %vm5990_vm1, %v7149_v7 }
 0x1e0   : > { %5344 = vmatprep.subr.mxu0 %v7149_v7 }
 0x1e4   : > { %v1143_v39 = vpop.permute.xlu1 %1142 }
 0x1e6   : > { %5342 = vmatmul.mubr.msk.f32.vlgmr.msra.gmra.mrb[4].mxu0 %vm1066_vm3, %v1143_v39 }
 0x1e7   : > { %5346 = vmatprep.mubr.msk.f32.mxu0 %vm5990_vm1, %v7149_v7 }
 0x1ec   : > { %v1226_v40 = vpop.permute.xlu0 %1225 }
 0x1ed   : > { %5345 = vmatpush3.xpose.msk.msra.mxu0 %vm1066_vm3, %v1226_v40 }
 0x1ee   : > { %5349 = vmatprep.subr.mxu0 %v7149_v7 }
 0x1f0   : > { %v1311_v42 = vpop.permute.xlu0 %1310 }
 0x1f1   : > { %v1313_v49 = vsel %vm1066_vm3, %v1311_v42, 0.0 }
 0x1f2   : > { %1314 = vadd.xlane.f32.xlu0 %v1313_v49 }
 0x1f4   : > { %v1223_v50 = vpop.permute.xlu1 %1222 }
 0x1f5   : > { %5347 = vmatmul.mubr.msk.f32.vlgmr.msra.gmra.mrb[4].mxu0 %vm1066_vm3, %v1223_v50 }
 0x1f6   : > { %5351 = vmatprep.mubr.msk.f32.mxu0 %vm5990_vm1, %v7149_v7 }
 0x1f8   : > { %v1304_v51 = vpop.permute.xlu1 %1303 }
 0x1f9   : > { %v1306_v53 = vsel %vm1066_vm3, %v1304_v51, 0.0 }
 0x1fa   : > { %1307 = vadd.xlane.f32.xlu1 %v1306_v53 }
 0x208   : > { %634 = vperm.xlu0 %5933, %v630_v55  }
 0x20b   : > { %1363 = vperm.xlu1 %5934, %v6405_v54  }
 0x20c   : > { %5935 = vset.pattern.permute.xlu0 %v5984_v21 }
 0x24c   : > { %v1056_v56 = vpop.f32.mrb[2].mxu0 }
 0x24d   : > { %v5333_v57 = vpop.f32.mrb[3].mxu0 }
 0x26d   : > { %v6409_v60 = vpop.f32.mrb[0].mxu1 }
 0x26e   : > { %v5328_v61 = vpop.f32.mrb[1].mxu1 }
 0x27f   : > { %v1315_v59 = vpop.xlane.xlu0 %1314 }
 0x280   : > { %1316 = vxpose.xlu1.b32.start.end [1/1] (short) (narrow) %v1315_v59, 8 }
 0x287   : > { %v1308_v6 = vpop.xlane.xlu1 %1307  ;;  %v635_v15 = vpop.permute.xlu0 %634 }
 0x288   : > { %v643_v19 = vmul.f32 %v5060_v13, %v635_v15 }
 0x28a   : > { %vm644_vm4 = vcmp.gt.f32.partialorder %v643_v19, 0.5 }
 0x28b   : > { %v1364_v10 = vpop.permute.xlu1 %1363  ;;  %v6422_v36 = vsel %vm644_vm4, 0.0, %v5993_v34  ;;  %vm2756_vm4 = vcmask 589344  }
 0x2c8   : > { %v1297_v63 = vpop.f32.mrb[4].mxu0 }
 0x2c9   : > { %v5348_v0 = vpop.f32.mrb[5].mxu0  ;;  %v1353_v17 = vmul.f32 2.0, %v1297_v63 }
 0x300   : > { %v1332_v21 = vpop.trf.xlu1 }
 0x301   : > { %v1351_v16 = vrot.slane %v1332_v21, %v6414_v11 }
 0x303   : > { %v1352_v18 = vadd.f32 %v1351_v16, %v1308_v6 }
 0x305   : > { %v1354_v23 = vsub.f32 %v1352_v18, %v1353_v17 }
 0x307   : > { %v1355_v28 = vsub.f32 %v1056_v56, %v1354_v23 }
 0x309   : > { %v1356_v31 = vadd.f32 %v1355_v28, %v6409_v60 }
 0x30b   : > { %v1366_v37 = vadd.f32 %v1364_v10, %v1356_v31 }
 0x30d   : > { %v1367_v39 = vadd.f32 %v1366_v37, %v6422_v36 }
 0x30f   : > { %v1368_v40 = vsel %vm984_vm2, %v1367_v39, -inf }
 0x310   : > { %1369 = vmax.xlane.f32.xlu0 %v1368_v40  ;;  %v966_v40 = vld [vmem:[%s7135_s11 + $0x8] sm:$0xff] }
 0x326   : > { %1379 = vrot.lane.b32.xlu0 %v6172_v27, %s7146_s25 }
 0x32a   : > { %1456 = vrot.lane.b32.xlu0 %v6246_v4, %s7146_s25 }
 0x32e   : > { %1530 = vrot.lane.b32.xlu0 %v6238_v62, %s7146_s25 }
 0x332   : > { %1880 = vrot.lane.b32.xlu0 %v6275_v25, %s5995_s26 }
 0x336   : > { %1960 = vrot.lane.b32.xlu0 %v6243_v3, %s5996_s27 }
 0x33a   : > { %1958 = vrot.lane.b32.xlu0 %v6240_v2, %s5997_s28 }
 0x33e   : > { %2038 = vrot.lane.b32.xlu0 %v6255_v8, %s5996_s27 }
 0x342   : > { %2116 = vrot.lane.b32.xlu0 %v6281_v29, %s5996_s27 }
 0x346   : > { %2199 = vrot.lane.b32.xlu0 %v6306_v52, %s5996_s27  ;;  %s6004_s27 = smov 20  }
 0x39d   : > { %v1370_v42 = vpop.xlane.xlu0 %1369 }
 0x39e   : > { %v1371_v49 = vsub.f32 %v1367_v39, %v1370_v42  ;;  %v965_v39 = vld [vmem:[%s7135_s11] sm:$0xff] }
 0x39f   : > { %v6517_v42 = vpack.c.bf16 %v966_v40, %v965_v39 }
 0x3a0   : > { %v1372_v50 = vmul.f32 1.442695, %v1371_v49 }
 0x3a1   : > { %v1380_v51 = vpop.permute.xlu0 %1379 }
 0x3a2   : > { %5939 = vpow2.f32 %v1372_v50  ;;  %5350 = vmatpush3.msra.mxu0 %v1380_v51  ;;  %v967_v50 = vld [vmem:[%s7135_s11 + $0x10] sm:$0xff]  ;;  %v968_v51 = vld [vmem:[%s7135_s11 + $0x18] sm:$0xff] }
 0x3a3   : > { %5354 = vmatprep.subr.mxu0 %v7149_v7 }
 0x3a5   : > { %v1457_v53 = vpop.permute.xlu0 %1456 }
 0x3a9   : > { %v1531_v55 = vpop.permute.xlu0 %1530 }
 0x3ac   : > { %v5940_v56 = vpop.eup %5939 }
 0x3ad   : > { %v1881_v57 = vpop.permute.xlu0 %1880  ;;  %v1374_v59 = vsel %vm984_vm2, %v5940_v56, 0.0 }
 0x3ae   : > { %1375 = vadd.xlane.f32.xlu1 %v1374_v59 }
 0x3b1   : > { %v1961_v61 = vpop.permute.xlu0 %1960 }
 0x3b5   : > { %v1959_v63 = vpop.permute.xlu0 %1958 }
 0x3b9   : > { %v2039_v0 = vpop.permute.xlu0 %2038 }
 0x3bd   : > { %v2117_v1 = vpop.permute.xlu0 %2116 }
 0x3bf   : > { %1882 = vrot.lane.b32.xlu1 %v6172_v27, %s7144_s20  ;;  %s6000_s20 = smov 56  }
 0x3c1   : > { %v2200_v6 = vpop.permute.xlu0 %2199 }
 0x3c2   : > { %v2202_v10 = vsel %vm1066_vm3, %v2200_v6, 0.0  ;;  %v972_v6 = vld [vmem:[%s7135_s11 + $0x38] sm:$0xff] }
 0x3c3   : > { %2036 = vrot.lane.b32.xlu1 %v6260_v14, %s5997_s28  ;;  %2203 = vadd.xlane.f32.xlu0 %v2202_v10 }
 0x3c7   : > { %2114 = vrot.lane.b32.xlu1 %v6320_v58, %s5997_s28 }
 0x3cb   : > { %2193 = vrot.lane.b32.xlu1 %v6335_v5, %s5997_s28  ;;  %s6005_s28 = smov 80  }
 0x3d9   : > { %2251 = vperm.xlu0 %5935, %v6405_v54  }
 0x3dd   : > { %5936 = vset.pattern.permute.xlu0 %v5986_v24  ;;  %v6461_v24 = vld [vmem:[%s7134_s10] sm:$0xff] }
 0x43b   : > { %v1376_v21 = vpop.xlane.xlu1 %1375 }
 0x43c   : > { %5941 = vrcp.f32 %v1376_v21 }
 0x43f   : > { %v1883_v13 = vpop.permute.xlu1 %1882 }
 0x443   : > { %v2037_v15 = vpop.permute.xlu1 %2036 }
 0x446   : > { %v5942_v16 = vpop.eup %5941 }
 0x447   : > { %v2115_v17 = vpop.permute.xlu1 %2114  ;;  %v1378_v18 = vmul.f32 %v5942_v16, %v5940_v56  ;;  %v969_v56 = vld [vmem:[%s7135_s11 + $0x20] sm:$0xff] }
 0x449   : > { %5352 = vmatmul.mubr.msk.f32.vlgmr.msra.gmra.mrb[6].mxu0 %vm984_vm2, %v1378_v18 }
 0x44a   : > { %5355 = vmatpush3.msra.mxu0 %v1457_v53  ;;  %5356 = vmatprep.mubr.msk.f32.mxu0 %vm5990_vm1, %v7149_v7  ;;  %v6528_v53 = vpack.c.bf16 %v968_v51, %v967_v50 }
 0x44b   : > { %v2194_v19 = vpop.permute.xlu1 %2193  ;;  %5359 = vmatprep.subr.mxu0 %v7149_v7 }
 0x44c   : > { %v2196_v23 = vsel %vm1066_vm3, %v2194_v19, 0.0 }
 0x44d   : > { %2197 = vadd.xlane.f32.xlu1 %v2196_v23  ;;  %5357 = vmatmul.mubr.msk.f32.vlgmr.msra.gmra.mrb[8].mxu0 %vm984_vm2, %v1378_v18 }
 0x44e   : > { %5360 = vmatpush3.msra.mxu0 %v1531_v55  ;;  %5361 = vmatprep.mubr.msk.f32.mxu0 %vm5990_vm1, %v7149_v7 }
 0x44f   : > { %5369 = vmatprep.subr.mxu0 %v7149_v7 }
 0x450   : > { %v2204_v28 = vpop.xlane.xlu0 %2203 }
 0x451   : > { %5362 = vmatmul.mubr.msk.f32.vlgmr.msra.gmra.mrb[10].mxu0 %vm984_vm2, %v1378_v18 }
 0x452   : > { %5370 = vmatpush3.msra.mxu0 %v6461_v24  ;;  %5371 = vmatprep.mubr.msk.f32.mxu0 %vm5990_vm1, %v7149_v7 }
 0x453   : > { %5409 = vmatprep.subr.mxu0 %v7149_v7 }
 0x455   : > { %5372 = vmatmul.mubr.msk.f32.vlgmr.msra.gmra.mrb[12].mxu0 %vm984_vm2, %v1378_v18 }
 0x456   : > { %5411 = vmatprep.mubr.msk.f32.mxu0 %vm5990_vm1, %v7149_v7 }
 0x459   : > { %5410 = vmatpush3.xpose.msk.msra.mxu0 %vm984_vm2, %v1883_v13 }
 0x45a   : > { %5414 = vmatprep.subr.mxu0 %v7149_v7 }
 0x45c   : > { %5412 = vmatmul.mubr.msk.f32.vlgmr.msra.gmra.mrb[14].mxu0 %vm984_vm2, %v1881_v57  ;;  %v970_v57 = vld [vmem:[%s7135_s11 + $0x28] sm:$0xff] }
 0x45d   : > { %5415 = vmatpush3.xpose.msk.msra.mxu0 %vm1066_vm3, %v1961_v61  ;;  %5416 = vmatprep.mubr.msk.f32.mxu0 %vm5990_vm1, %v7149_v7 }
 0x45e   : > { %2246 = vrot.lane.b32.xlu1 %v6409_v60, %s5995_s26  ;;  %5419 = vmatprep.subr.mxu0 %v7149_v7  ;;  %s7153_s26 = smov 60  }
 0x460   : > { %5417 = vmatmul.mubr.msk.f32.vlgmr.msra.gmra.mrb[16].mxu0 %vm1066_vm3, %v1959_v63  ;;  %v6543_v63 = vpack.c.bf16 %v970_v57, %v969_v56 }
 0x461   : > { %5420 = vmatpush3.xpose.msk.msra.mxu0 %vm1066_vm3, %v2039_v0  ;;  %5421 = vmatprep.mubr.msk.f32.mxu0 %vm5990_vm1, %v7149_v7 }
 0x462   : > { %5424 = vmatprep.subr.mxu0 %v7149_v7 }
 0x468   : > { %5422 = vmatmul.mubr.msk.f32.vlgmr.msra.gmra.mrb[16].mxu0 %vm1066_vm3, %v2037_v15 }
 0x469   : > { %5425 = vmatpush3.xpose.msk.msra.mxu0 %vm1066_vm3, %v2117_v1  ;;  %5426 = vmatprep.mubr.msk.f32.mxu0 %vm5990_vm1, %v7149_v7  ;;  %v971_v1 = vld [vmem:[%s7135_s11 + $0x30] sm:$0xff] }
 0x46a   : > { %5429 = vmatprep.subr.mxu0 %v7149_v7  ;;  %v6556_v15 = vpack.c.bf16 %v972_v6, %v971_v1  ;;  %v976_v1 = vld [vmem:[%s7135_s11 + $0x58] sm:$0xff] }
 0x470   : > { %5427 = vmatmul.mubr.msk.f32.vlgmr.msra.gmra.mrb[16].mxu0 %vm1066_vm3, %v2115_v17  ;;  %v973_v17 = vld [vmem:[%s7135_s11 + $0x40] sm:$0xff] }
 0x471   : > { %5431 = vmatprep.mubr.msk.f32.mxu0 %vm5990_vm1, %v7149_v7 }
 0x487   : > { %2205 = vxpose.xlu1.b32.start.end [1/1] (short) (narrow) %v2204_v28, 8 }
 0x4a5   : > { %1604 = vrot.lane.b32.xlu1 %v6269_v22, %s7146_s25  ;;  %s6003_s25 = smov 100  }
 0x4a9   : > { %2770 = vrot.lane.b32.xlu1 %v6275_v25, %s5988_s30 }
 0x4ad   : > { %2850 = vrot.lane.b32.xlu1 %v6243_v3, %s5999_s23 }
 0x4b1   : > { %2928 = vrot.lane.b32.xlu1 %v6255_v8, %s5999_s23 }
 0x4b5   : > { %3006 = vrot.lane.b32.xlu1 %v6281_v29, %s5999_s23 }
 0x4b9   : > { %3089 = vrot.lane.b32.xlu1 %v6306_v52, %s5999_s23 }
 0x4da   : > { %v6505_v31 = vpop.xlane.xlu1 %2197 }
 0x4de   : > { %v6507_v34 = vpop.permute.xlu1 %2246 }
 0x507   : > { %v6509_v37 = vpop.trf.xlu1 }
 0x517   : > { %v1605_v49 = vpop.permute.xlu1 %1604 }
 0x518   : > { %5365 = vmatpush3.msra.mxu1 %v1605_v49 }
 0x519   : > { %5367 = vmatmul.mubr.msk.f32.vlgmr.msra.gmra.mrb[2].mxu1 %vm984_vm2, %v1378_v18  ;;  %5714 = vmatprep.subr.bf16.mxu1 %v7147_v47  ;;  %v974_v18 = vld [vmem:[%s7135_s11 + $0x48] sm:$0xff] }
 0x51a   : > { %5716 = vmatpush3.bf16.msra.mxu1 %v6517_v42  ;;  %5406 = vmatprep.mubr.msk.f32.mxu1 %vm5990_vm1, %v7149_v7  ;;  %v6571_v49 = vpack.c.bf16 %v974_v18, %v973_v17 }
 0x51b   : > { %v6532_v55 = vpop.permute.xlu1 %2770  ;;  %5717 = vmatprep.subr.bf16.mxu1 %v7147_v47 }
 0x51c   : > { %v1451_v59 = vpop.f32.mrb[6].mxu0 }
 0x51d   : > { %1849 = vst.msk [vmem:[#allocation2] sm:$0xff] %vm984_vm2, %v1451_v59  ;;  %v5353_v61 = vpop.f32.mrb[7].mxu0 }
 0x51e   : > { %5719 = vmatpush3.bf16.msra.mxu1 %v6528_v53  ;;  %v975_v61 = vld [vmem:[%s7135_s11 + $0x50] sm:$0xff] }
 0x51f   : > { %v6545_v0 = vpop.permute.xlu1 %2850  ;;  %5720 = vmatprep.subr.bf16.mxu1 %v7147_v47  ;;  %v6593_v18 = vpack.c.bf16 %v976_v1, %v975_v61 }
 0x520   : > { %v1525_v10 = vpop.f32.mrb[8].mxu0 }
 0x521   : > { %v5358_v21 = vpop.f32.mrb[9].mxu0  ;;  %v1818_v13 = vsub.f32 %v1525_v10, %v6226_v46 }
 0x522   : > { %5722 = vmatpush3.bf16.msra.mxu1 %v6543_v63 }
 0x523   : > { %v6558_v16 = vpop.permute.xlu1 %2928  ;;  %5723 = vmatprep.subr.bf16.mxu1 %v7147_v47  ;;  %v1821_v39 = vmul.f32 %v1818_v13, %v6224_v45  ;;  %v1826_v40 = vmul.f32 %v1818_v13, %v6178_v30  ;;  %v1831_v50 = vmul.f32 %v1818_v13, %v6191_v35 }
 0x524   : > { %v1599_v19 = vpop.f32.mrb[10].mxu0 }
 0x525   : > { %v1819_v23 = vsub.f32 %v1599_v19, %v6222_v44  ;;  %v5363_v28 = vpop.f32.mrb[11].mxu0 }
 0x526   : > { %5725 = vmatpush3.bf16.msra.mxu1 %v6556_v15  ;;  %v978_v28 = vld [vmem:[%s7135_s11 + $0x68] sm:$0xff] }
 0x527   : > { %v1822_v51 = vmul.f32 %v1819_v23, %v6220_v43  ;;  %v1827_v56 = vmul.f32 %v1819_v23, %v6170_v26  ;;  %v1832_v57 = vmul.f32 %v1819_v23, %v6184_v32  ;;  %v6577_v59 = vpop.permute.xlu1 %3006  ;;  %5726 = vmatprep.subr.bf16.mxu1 %v7147_v47  ;;  %v977_v23 = vld [vmem:[%s7135_s11 + $0x60] sm:$0xff] }
 0x528   : > { %v1743_v6 = vpop.f32.mrb[12].mxu0 }
 0x529   : > { %v6586_v10 = vadd.f32 %v1822_v51, %v1821_v39  ;;  %v6588_v21 = vadd.f32 %v1827_v56, %v1826_v40  ;;  %v6590_v13 = vadd.f32 %v1832_v57, %v1831_v50  ;;  %v5373_v17 = vpop.f32.mrb[13].mxu0  ;;  %v6604_v40 = vpack.c.bf16 %v978_v28, %v977_v23  ;;  %v979_v51 = vld [vmem:[%s7135_s11 + $0x70] sm:$0xff]  ;;  %v980_v56 = vld [vmem:[%s7135_s11 + $0x78] sm:$0xff] }
 0x52a   : > { %5728 = vmatpush3.bf16.msra.mxu1 %v6571_v49  ;;  %v6614_v61 = vpack.c.bf16 %v980_v56, %v979_v51  ;;  %v1747_v1 = vmul.f32 %v1743_v6, %v6375_v33  ;;  %v2240_v17 = vrot.slane %v6509_v37, %v6414_v11  ;;  %v2252_v56 = vpop.permute.xlu0 %2251 }
 0x52b   : > { %v3090_v19 = vpop.permute.xlu1 %3089  ;;  %5729 = vmatprep.subr.bf16.mxu1 %v7147_v47 }
 0x52c   : > { %v3092_v39 = vsel %vm1066_vm3, %v3090_v19, 0.0  ;;  %v2241_v23 = vadd.f32 %v2240_v17, %v6505_v31  ;;  %v7160_v31 = vmov 3  }
 0x52d   : > { %3093 = vadd.xlane.f32.xlu1 %v3092_v39 }
 0x52e   : > { %5731 = vmatpush3.bf16.msra.mxu1 %v6593_v18 }
 0x52f   : > { %v1954_v50 = vpop.f32.mrb[14].mxu0  ;;  %5732 = vmatprep.subr.bf16.mxu1 %v7147_v47 }
 0x530   : > { %v5413_v57 = vpop.f32.mrb[15].mxu0 }
 0x532   : > { %5734 = vmatpush3.bf16.msra.mxu1 %v6604_v40 }
 0x533   : > { %5735 = vmatprep.subr.bf16.mxu1 %v7147_v47 }
 0x536   : > { %5737 = vmatpush3.bf16.msra.mxu1 %v6614_v61 }
 0x537   : > { %5449 = vmatprep.subr.mxu1 %v7149_v7 }
 0x539   : > { %5407 = vmatmul.mubr.f32.vlgmr.msra.gmra.mrb[4].mxu1 %v1747_v1 }
 0x53a   : > { %5450 = vmatpush3.msra.mxu1 %v6461_v24  ;;  %5451 = vmatprep.mubr.msk.f32.mxu1 %vm5990_vm1, %v7149_v7 }
 0x53b   : > { %5489 = vmatprep.subr.mxu1 %v7149_v7 }
 0x53e   : > { %3135 = vrot.lane.b32.xlu1 %v6409_v60, %s5988_s30 }
 0x543   : > { %v2188_v19 = vpop.f32.mrb[16].mxu0 }
 0x544   : > { %v2242_v6 = vmul.f32 2.0, %v2188_v19  ;;  %v5428_v28 = vpop.f32.mrb[17].mxu0 }
 0x546   : > { %v2243_v39 = vsub.f32 %v2241_v23, %v2242_v6 }
 0x548   : > { %v2244_v51 = vsub.f32 %v1954_v50, %v2243_v39 }
 0x54a   : > { %v2249_v57 = vadd.f32 %v6507_v34, %v2244_v51 }
 0x54c   : > { %v2254_v1 = vadd.f32 %v2252_v56, %v2249_v57 }
 0x54e   : > { %v2255_v47 = vadd.f32 %v2254_v1, %v6422_v36 }
 0x550   : > { %v2256_v7 = vsel %vm984_vm2, %v2255_v47, -inf }
 0x551   : > { %2257 = vmax.xlane.f32.xlu0 %v2256_v7 }
 0x5ba   : > { %v3094_v12 = vpop.xlane.xlu1 %3093 }
 0x5bb   : > { %3095 = vxpose.xlu1.b32.start.end [1/1] (short) (narrow) %v3094_v12, 8 }
 0x5d9   : > { %2267 = vrot.lane.b32.xlu1 %v6172_v27, %s6000_s20 }
 0x5da   : > { %5937 = vset.pattern.permute.xlu1 %v7160_v31 }
 0x5dd   : > { %2416 = vrot.lane.b32.xlu1 %v6238_v62, %s7153_s26 }
 0x5de   : > { %v2258_v37 = vpop.xlane.xlu0 %2257 }
 0x5df   : > { %v2259_v34 = vsub.f32 %v2255_v47, %v2258_v37 }
 0x5e1   : > { %v2260_v50 = vmul.f32 1.442695, %v2259_v34  ;;  %2489 = vrot.lane.b32.xlu1 %v6269_v22, %s7153_s26 }
 0x5e3   : > { %5943 = vpow2.f32 %v2260_v50 }
 0x5e5   : > { %3657 = vrot.lane.b32.xlu1 %v6172_v27, %s7155_s18  ;;  %s6011_s18 = smov 36  }
 0x5e9   : > { %3655 = vrot.lane.b32.xlu1 %v6275_v25, %s5999_s23 }
 0x5ec   : > { %v1673_v7 = vpop.f32.mrb[2].mxu1 }
 0x5ed   : > { %v5944_v12 = vpop.eup %5943  ;;  %v1820_v17 = vsub.f32 %v1673_v7, %v6266_v20  ;;  %v5368_v19 = vpop.f32.mrb[3].mxu1  ;;  %3735 = vrot.lane.b32.xlu1 %v6243_v3, %s6003_s25 }
 0x5ee   : > { %v2262_v47 = vsel %vm984_vm2, %v5944_v12, 0.0 }
 0x5ef   : > { %v1824_v23 = vmul.f32 %v1820_v17, %v6228_v48  ;;  %v1829_v6 = vmul.f32 %v1820_v17, %v6200_v38  ;;  %v1834_v28 = vmul.f32 %v1820_v17, %v6213_v41  ;;  %2263 = vadd.xlane.f32.xlu0 %v2262_v47 }
 0x5f1   : > { %v6651_v25 = vadd.f32 %v1824_v23, %v6586_v10  ;;  %v6654_v39 = vadd.f32 %v1829_v6, %v6588_v21  ;;  %v6657_v51 = vadd.f32 %v1834_v28, %v6590_v13  ;;  %3733 = vrot.lane.b32.xlu1 %v6240_v2, %s6004_s27  ;;  %v7161_v13 = vmov 0.0  }
 0x5f5   : > { %3813 = vrot.lane.b32.xlu1 %v6255_v8, %s6003_s25 }
 0x5f9   : > { %3811 = vrot.lane.b32.xlu1 %v6260_v14, %s6004_s27 }
 0x5fd   : > { %3891 = vrot.lane.b32.xlu1 %v6281_v29, %s6003_s25  ;;  %v3136_v29 = vpop.permute.xlu1 %3135 }
 0x601   : > { %3889 = vrot.lane.b32.xlu1 %v6320_v58, %s6004_s27 }
 0x605   : > { %2772 = vrot.lane.b32.xlu0 %v6172_v27, %s6005_s28  ;;  %3968 = vrot.lane.b32.xlu1 %v6335_v5, %s6004_s27  ;;  %s7163_s27 = smov 64  }
 0x609   : > { %2848 = vrot.lane.b32.xlu0 %v6240_v2, %s7154_s21 }
 0x60c   : > { %v6671_v3 = vpop.f32.mrb[4].mxu1 }
 0x60d   : > { %2926 = vrot.lane.b32.xlu0 %v6260_v14, %s7154_s21  ;;  %v5408_v8 = vpop.f32.mrb[5].mxu1 }
 0x611   : > { %3004 = vrot.lane.b32.xlu0 %v6320_v58, %s7154_s21 }
 0x615   : > { %3083 = vrot.lane.b32.xlu0 %v6335_v5, %s7154_s21  ;;  %s6010_s21 = smov 8  }
 0x63b   : > { %v3111_v10 = vpop.trf.xlu1 }
 0x64b   : > { %v2268_v21 = vpop.permute.xlu1 %2267 }
 0x64c   : > { %5430 = vmatpush3.msra.mxu0 %v2268_v21 }
 0x64d   : > { %5434 = vmatprep.subr.mxu0 %v7161_v13 }
 0x67c   : > { %v2264_v56 = vpop.xlane.xlu0 %2263 }
 0x67d   : > { %5945 = vrcp.f32 %v2264_v56 }
 0x680   : > { %v2773_v2 = vpop.permute.xlu0 %2772 }
 0x684   : > { %v2849_v57 = vpop.permute.xlu0 %2848 }
 0x687   : > { %v5946_v1 = vpop.eup %5945 }
 0x688   : > { %v6680_v37 = vmul.f32 %v5946_v1, %v5944_v12  ;;  %v2927_v14 = vpop.permute.xlu0 %2926  ;;  %v3130_v12 = vrot.slane %v3111_v10, %v6414_v11 }
 0x68a   : > { %5432 = vmatmul.mubr.msk.f32.vlgmr.msra.gmra.mrb[18].mxu0 %vm984_vm2, %v6680_v37  ;;  %5452 = vmatmul.mubr.msk.f32.vlgmr.msra.gmra.mrb[6].mxu1 %vm984_vm2, %v6680_v37 }
 0x68b   : > { %5490 = vmatpush3.xpose.msk.msra.mxu1 %vm984_vm2, %v2773_v2  ;;  %5491 = vmatprep.mubr.msk.f32.mxu1 %vm5990_vm1, %v7161_v13 }
 0x68c   : > { %v3005_v58 = vpop.permute.xlu0 %3004  ;;  %5494 = vmatprep.subr.mxu1 %v7161_v13  ;;  %5436 = vmatprep.mubr.msk.f32.mxu0 %vm5990_vm1, %v7161_v13 }
 0x68e   : > { %5492 = vmatmul.mubr.msk.f32.vlgmr.msra.gmra.mrb[8].mxu1 %vm984_vm2, %v6532_v55 }
 0x68f   : > { %5495 = vmatpush3.xpose.msk.msra.mxu1 %vm1066_vm3, %v6545_v0  ;;  %5496 = vmatprep.mubr.msk.f32.mxu1 %vm5990_vm1, %v7161_v13 }
 0x690   : > { %v3084_v5 = vpop.permute.xlu0 %3083  ;;  %5499 = vmatprep.subr.mxu1 %v7161_v13 }
 0x691   : > { %v3086_v34 = vsel %vm1066_vm3, %v3084_v5, 0.0 }
 0x692   : > { %5497 = vmatmul.mubr.msk.f32.vlgmr.msra.gmra.mrb[10].mxu1 %vm1066_vm3, %v2849_v57  ;;  %3087 = vadd.xlane.f32.xlu0 %v3086_v34  ;;  %v7162_v34 = vmov 0.0|0.0  }
 0x693   : > { %5500 = vmatpush3.xpose.msk.msra.mxu1 %vm1066_vm3, %v6558_v16  ;;  %5501 = vmatprep.mubr.msk.f32.mxu1 %vm5990_vm1, %v7161_v13 }
 0x694   : > { %5504 = vmatprep.subr.mxu1 %v7161_v13 }
 0x69a   : > { %5502 = vmatmul.mubr.msk.f32.vlgmr.msra.gmra.mrb[10].mxu1 %vm1066_vm3, %v2927_v14 }
 0x69b   : > { %5505 = vmatpush3.xpose.msk.msra.mxu1 %vm1066_vm3, %v6577_v59  ;;  %5506 = vmatprep.mubr.msk.f32.mxu1 %vm5990_vm1, %v7161_v13 }
 0x69c   : > { %5509 = vmatprep.subr.mxu1 %v7161_v13 }
 0x6a2   : > { %5507 = vmatmul.mubr.msk.f32.vlgmr.msra.gmra.mrb[10].mxu1 %vm1066_vm3, %v3005_v58  ;;  %v2417_v58 = vpop.permute.xlu1 %2416 }
 0x6a3   : > { %5511 = vmatprep.mubr.msk.f32.mxu1 %vm5990_vm1, %v7161_v13 }
 0x6a8   : > { %3140 = vperm.xlu0 %5936, %v6405_v54  }
 0x6ac   : > { %5938 = vset.pattern.permute.xlu0 %v7160_v31 }
 0x71f   : > { %v3088_v17 = vpop.xlane.xlu0 %3087 }
 0x720   : > { %v3131_v47 = vadd.f32 %v3130_v12, %v3088_v17 }
 0x727   : > { %v3141_v21 = vpop.permute.xlu0 %3140 }
 0x75d   : > { %v6717_v55 = vpop.f32.mrb[18].mxu0  ;;  %v6719_v0 = vpop.f32.mrb[6].mxu1 }
 0x75e   : > { %v5433_v16 = vpop.f32.mrb[19].mxu0  ;;  %v5453_v59 = vpop.f32.mrb[7].mxu1 }
 0x761   : > { %v2844_v50 = vpop.f32.mrb[8].mxu1 }
 0x762   : > { %v5493_v7 = vpop.f32.mrb[9].mxu1 }
 0x775   : > { %v3078_v19 = vpop.f32.mrb[10].mxu1 }
 0x776   : > { %v3132_v23 = vmul.f32 2.0, %v3078_v19  ;;  %v5508_v6 = vpop.f32.mrb[11].mxu1  ;;  %v2632_v19 = vmul.f32 %v6719_v0, %v6375_v33 }
 0x778   : > { %v3133_v28 = vsub.f32 %v3131_v47, %v3132_v23 }
 0x77a   : > { %v3134_v8 = vsub.f32 %v2844_v50, %v3133_v28 }
 0x77c   : > { %v3138_v56 = vadd.f32 %v3136_v29, %v3134_v8  ;;  %v2490_v29 = vpop.permute.xlu1 %2489 }
 0x77e   : > { %v3143_v31 = vadd.f32 %v3141_v21, %v3138_v56 }
 0x780   : > { %v3144_v2 = vadd.f32 %v3143_v31, %v6422_v36  ;;  %v3658_v50 = vpop.permute.xlu1 %3657 }
 0x782   : > { %v3145_v57 = vsel %vm984_vm2, %v3144_v2, -inf }
 0x783   : > { %3146 = vmax.xlane.f32.xlu0 %v3145_v57 }
 0x784   : > { %v3656_v7 = vpop.permute.xlu1 %3655 }
 0x799   : > { %2343 = vrot.lane.b32.xlu0 %v6246_v4, %s7153_s26  ;;  %s7164_s26 = smov 96  }
 0x810   : > { %v3147_v1 = vpop.xlane.xlu0 %3146 }
 0x811   : > { %v3148_v10 = vsub.f32 %v3144_v2, %v3147_v1 }
 0x813   : > { %v3149_v14 = vmul.f32 1.442695, %v3148_v10 }
 0x814   : > { %v2344_v5 = vpop.permute.xlu0 %2343 }
 0x815   : > { %5947 = vpow2.f32 %v3149_v14  ;;  %5435 = vmatpush3.msra.mxu0 %v2344_v5 }
 0x816   : > { %5437 = vmatmul.mubr.msk.f32.vlgmr.msra.gmra.mrb[20].mxu0 %vm984_vm2, %v6680_v37  ;;  %5439 = vmatprep.subr.mxu0 %v7161_v13 }
 0x817   : > { %5440 = vmatpush3.msra.mxu0 %v2417_v58  ;;  %5441 = vmatprep.mubr.msk.f32.mxu0 %vm5990_vm1, %v7161_v13 }
 0x818   : > { %5444 = vmatprep.subr.mxu0 %v7161_v13 }
 0x81a   : > { %5442 = vmatmul.mubr.msk.f32.vlgmr.msra.gmra.mrb[22].mxu0 %vm984_vm2, %v6680_v37 }
 0x81b   : > { %5445 = vmatpush3.msra.mxu0 %v2490_v29  ;;  %5446 = vmatprep.mubr.msk.f32.mxu0 %vm5990_vm1, %v7161_v13 }
 0x81c   : > { %5738 = vmatprep.subr.bf16.mxu0 %v7162_v34 }
 0x81e   : > { %5447 = vmatmul.mubr.msk.f32.vlgmr.msra.gmra.mrb[24].mxu0 %vm984_vm2, %v6680_v37  ;;  %v3736_v37 = vpop.permute.xlu1 %3735 }
 0x81f   : > { %v5948_v16 = vpop.eup %5947  ;;  %5740 = vmatpush3.bf16.msra.mxu0 %v6517_v42  ;;  %5486 = vmatprep.mubr.msk.f32.mxu0 %vm5990_vm1, %v7161_v13 }
 0x820   : > { %v3151_v59 = vsel %vm984_vm2, %v5948_v16, 0.0  ;;  %5741 = vmatprep.subr.bf16.mxu0 %v7162_v34 }
 0x821   : > { %3152 = vadd.xlane.f32.xlu0 %v3151_v59 }
 0x822   : > { %v3734_v12 = vpop.permute.xlu1 %3733 }
 0x823   : > { %5743 = vmatpush3.bf16.msra.mxu0 %v6528_v53 }
 0x824   : > { %5744 = vmatprep.subr.bf16.mxu0 %v7162_v34 }
 0x826   : > { %v3814_v17 = vpop.permute.xlu1 %3813 }
 0x827   : > { %5746 = vmatpush3.bf16.msra.mxu0 %v6543_v63 }
 0x828   : > { %5747 = vmatprep.subr.bf16.mxu0 %v7162_v34 }
 0x82a   : > { %v3812_v47 = vpop.permute.xlu1 %3811 }
 0x82b   : > { %5749 = vmatpush3.bf16.msra.mxu0 %v6556_v15 }
 0x82c   : > { %5750 = vmatprep.subr.bf16.mxu0 %v7162_v34 }
 0x82f   : > { %5752 = vmatpush3.bf16.msra.mxu0 %v6571_v49 }
 0x830   : > { %5753 = vmatprep.subr.bf16.mxu0 %v7162_v34 }
 0x833   : > { %5755 = vmatpush3.bf16.msra.mxu0 %v6593_v18 }
 0x834   : > { %5756 = vmatprep.subr.bf16.mxu0 %v7162_v34 }
 0x837   : > { %5758 = vmatpush3.bf16.msra.mxu0 %v6604_v40  ;;  %3974 = vrot.lane.b32.xlu0 %v6306_v52, %s6003_s25  ;;  %v3892_v52 = vpop.permute.xlu1 %3891  ;;  %s6009_s25 = smov 52  }
 0x838   : > { %5759 = vmatprep.subr.bf16.mxu0 %v7162_v34 }
 0x83b   : > { %5761 = vmatpush3.bf16.msra.mxu0 %v6614_v61  ;;  %v3890_v23 = vpop.permute.xlu1 %3889 }
 0x83c   : > { %5529 = vmatprep.subr.mxu0 %v7161_v13 }
 0x83e   : > { %5487 = vmatmul.mubr.f32.vlgmr.msra.gmra.mrb[26].mxu0 %v2632_v19 }
 0x83f   : > { %5530 = vmatpush3.msra.mxu0 %v6461_v24  ;;  %5531 = vmatprep.mubr.msk.f32.mxu0 %vm5990_vm1, %v7161_v13  ;;  %v3969_v6 = vpop.permute.xlu1 %3968 }
 0x840   : > { %5569 = vmatprep.subr.mxu0 %v7161_v13  ;;  %v3971_v28 = vsel %vm1066_vm3, %v3969_v6, 0.0 }
 0x856   : > { %3972 = vadd.xlane.f32.xlu0 %v3971_v28 }
 0x86c   : > { %4020 = vrot.lane.b32.xlu0 %v6409_v60, %s5999_s23  ;;  %s6007_s23 = smov 48  }
 0x8ae   : > { %v3153_v33 = vpop.xlane.xlu0 %3152 }
 0x8af   : > { %5949 = vrcp.f32 %v3153_v33 }
 0x8b2   : > { %v3975_v0 = vpop.permute.xlu0 %3974 }
 0x8b3   : > { %v3977_v8 = vsel %vm1066_vm3, %v3975_v0, 0.0 }
 0x8b4   : > { %3978 = vadd.xlane.f32.xlu1 %v3977_v8 }
 0x8b9   : > { %v5950_v21 = vpop.eup %5949 }
 0x8ba   : > { %v6770_v56 = vmul.f32 %v5950_v21, %v5948_v16 }
 0x8bc   : > { %5532 = vmatmul.mubr.msk.f32.vlgmr.msra.gmra.mrb[28].mxu0 %vm984_vm2, %v6770_v56 }
 0x8bd   : > { %5570 = vmatpush3.xpose.msk.msra.mxu0 %vm984_vm2, %v3658_v50  ;;  %5571 = vmatprep.mubr.msk.f32.mxu0 %vm5990_vm1, %v7161_v13 }
 0x8be   : > { %5574 = vmatprep.subr.mxu0 %v7161_v13 }
 0x8c0   : > { %5572 = vmatmul.mubr.msk.f32.vlgmr.msra.gmra.mrb[30].mxu0 %vm984_vm2, %v3656_v7 }
 0x8c1   : > { %5575 = vmatpush3.xpose.msk.msra.mxu0 %vm1066_vm3, %v3736_v37  ;;  %5576 = vmatprep.mubr.msk.f32.mxu0 %vm5990_vm1, %v7161_v13 }
 0x8c2   : > { %5579 = vmatprep.subr.mxu0 %v7161_v13 }
 0x8c4   : > { %5577 = vmatmul.mubr.msk.f32.vlgmr.msra.gmra.mrb[32].mxu0 %vm1066_vm3, %v3734_v12 }
 0x8c5   : > { %5580 = vmatpush3.xpose.msk.msra.mxu0 %vm1066_vm3, %v3814_v17  ;;  %5581 = vmatprep.mubr.msk.f32.mxu0 %vm5990_vm1, %v7161_v13 }
 0x8c6   : > { %5584 = vmatprep.subr.mxu0 %v7161_v13  ;;  %4025 = vperm.xlu1 %5937, %v6405_v54  }
 0x8cc   : > { %5582 = vmatmul.mubr.msk.f32.vlgmr.msra.gmra.mrb[32].mxu0 %vm1066_vm3, %v3812_v47 }
 0x8cd   : > { %5585 = vmatpush3.xpose.msk.msra.mxu0 %vm1066_vm3, %v3892_v52  ;;  %5586 = vmatprep.mubr.msk.f32.mxu0 %vm5990_vm1, %v7161_v13 }
 0x8ce   : > { %5589 = vmatprep.subr.mxu0 %v7161_v13 }
 0x8d4   : > { %5587 = vmatmul.mubr.msk.f32.vlgmr.msra.gmra.mrb[32].mxu0 %vm1066_vm3, %v3890_v23  ;;  %vm2750_vm3 = vcmask 458144  }
 0x8d5   : > { %5591 = vmatprep.mubr.msk.f32.mxu0 %vm5990_vm1, %v7161_v13 }
 0x8e9   : > { %v2412_v60 = vpop.f32.mrb[20].mxu0 }
 0x8ea   : > { %v5438_v31 = vpop.f32.mrb[21].mxu0  ;;  %v2703_v2 = vsub.f32 %v2412_v60, %v6226_v46 }
 0x8ec   : > { %v2706_v10 = vmul.f32 %v2703_v2, %v6224_v45  ;;  %v2711_v14 = vmul.f32 %v2703_v2, %v6178_v30  ;;  %v2716_v58 = vmul.f32 %v2703_v2, %v6191_v35 }
 0x8ed   : > { %v2485_v57 = vpop.f32.mrb[22].mxu0 }
 0x8ee   : > { %v2704_v54 = vsub.f32 %v2485_v57, %v6222_v44  ;;  %v5443_v1 = vpop.f32.mrb[23].mxu0 }
 0x8f0   : > { %v2707_v5 = vmul.f32 %v2704_v54, %v6220_v43  ;;  %v2712_v29 = vmul.f32 %v2704_v54, %v6170_v26  ;;  %v2717_v16 = vmul.f32 %v2704_v54, %v6184_v32 }
 0x8f1   : > { %v2558_v59 = vpop.f32.mrb[24].mxu0 }
 0x8f2   : > { %v2708_v50 = vadd.f32 %v2707_v5, %v2706_v10  ;;  %v2713_v7 = vadd.f32 %v2712_v29, %v2711_v14  ;;  %v2718_v37 = vadd.f32 %v2717_v16, %v2716_v58  ;;  %v2705_v12 = vsub.f32 %v2558_v59, %v6266_v20  ;;  %v5448_v17 = vpop.f32.mrb[25].mxu0 }
 0x8f4   : > { %v2709_v19 = vmul.f32 %v2705_v12, %v6228_v48  ;;  %v2714_v47 = vmul.f32 %v2705_v12, %v6200_v38  ;;  %v2719_v52 = vmul.f32 %v2705_v12, %v6213_v41 }
 0x8f6   : > { %v2710_v23 = vadd.f32 %v2709_v19, %v2708_v50  ;;  %v2715_v6 = vadd.f32 %v2714_v47, %v2713_v7  ;;  %v2720_v28 = vadd.f32 %v2719_v52, %v2718_v37  ;;  %v3973_v37 = vpop.xlane.xlu0 %3972 }
 0x8f8   : > { %v2721_v33 = vmul.f32 %v2710_v23, %v2710_v23  ;;  %v2722_v0 = vmul.f32 %v2715_v6, %v2715_v6  ;;  %v2724_v21 = vmul.f32 %v2720_v28, %v2720_v28 }
 0x8fa   : > { %v2723_v8 = vadd.f32 %v2722_v0, %v2721_v33  ;;  %v4021_v52 = vpop.permute.xlu0 %4020 }
 0x8fc   : > { %v2725_v60 = vadd.f32 %v2724_v21, %v2723_v8 }
 0x8fe   : > { %v2726_v54 = vadd.f32 1e-08, %v2725_v60 }
 0x900   : > { %5951 = vrsqrt.f32 %v2726_v54  ;;  %vm2729_vm5 = vcmp.eq.f32.partialorder %v2726_v54, inf  ;;  %v2732_v29 = vand.u32 2147483648, %v2726_v54  ;;  %vm2731_vm6 = vcmp.eq.f32.partialorder %v2726_v54, 0.0 }
 0x911   : > { %v6809_v31 = vpop.f32.mrb[26].mxu0 }
 0x912   : > { %v5488_v2 = vpop.f32.mrb[27].mxu0 }
 0x941   : > { %v3979_v57 = vpop.xlane.xlu1 %3978 }
 0x942   : > { %3980 = vxpose.xlu1.b32.start.end [1/1] (short) (narrow) %v3979_v57, 8 }
 0x945   : > { %v4026_v59 = vpop.permute.xlu1 %4025 }
 0x960   : > { %3156 = vrot.lane.b32.xlu1 %v6172_v27, %s6007_s23 }
 0x964   : > { %3378 = vrot.lane.b32.xlu1 %v6269_v22, %s6000_s20 }
 0x968   : > { %4041 = vrot.lane.b32.xlu1 %v6172_v27, %s6008_s0  ;;  %v5952_v27 = vpop.eup %5951 }
 0x969   : > { %v2728_v10 = vmul.f32 %v5952_v27, %v2726_v54 }
 0x96b   : > { %v2730_v5 = vsel %vm2729_vm5, %v2726_v54, %v2728_v10  ;;  %vm2762_vm5 = vcmask 720544  }
 0x96c   : > { %4117 = vrot.lane.b32.xlu1 %v6246_v4, %s6009_s25 }
 0x970   : > { %4190 = vrot.lane.b32.xlu1 %v6238_v62, %s6009_s25 }
 0x974   : > { %4263 = vrot.lane.b32.xlu1 %v6269_v22, %s6009_s25 }
 0x978   : > { %1851 = vrot.lane.b32.xlu1 %v6651_v25, %s5991_s1  ;;  %s6012_s1 = smov 68  }
 0x97c   : > { %1857 = vrot.lane.b32.xlu1 %v6654_v39, %s6007_s23  ;;  %s6015_s23 = smov 76  }
 0x980   : > { %1863 = vrot.lane.b32.xlu1 %v6657_v51, %s7163_s27 }
 0x984   : > { %1875 = vrot.lane.b32.xlu1 %v6671_v3, %s7164_s26  ;;  %v2733_v3 = vsel %vm2731_vm6, %v2732_v29, %v2730_v5  ;;  %s6013_s26 = smov 84   ;;  %vm2768_vm6 = vcmask 1048448  }
 0x988   : > { %2735 = vrot.lane.b32.xlu1 %v6717_v55, %s6010_s21  ;;  %s6014_s21 = smov 44  }
 0x98c   : > { %2741 = vrot.lane.b32.xlu1 %v2710_v23, %s6011_s18  ;;  %s7165_s18 = smov 16  }
 0x98f   : > { %v6827_v22 = vpop.f32.mrb[28].mxu0 }
 0x990   : > { %v5533_v1 = vpop.f32.mrb[29].mxu0  ;;  %2747 = vrot.lane.b32.xlu1 %v2715_v6, %s6009_s25 }
 0x993   : > { %v3729_v14 = vpop.f32.mrb[30].mxu0 }
 0x994   : > { %v5573_v58 = vpop.f32.mrb[31].mxu0  ;;  %2753 = vrot.lane.b32.xlu1 %v2720_v28, %s6012_s1 }
 0x998   : > { %2759 = vrot.lane.b32.xlu1 %v2733_v3, %s6013_s26 }
 0x9a7   : > { %v3963_v55 = vpop.f32.mrb[32].mxu0 }
 0x9a8   : > { %v5588_v16 = vpop.f32.mrb[33].mxu0  ;;  %v4017_v12 = vmul.f32 2.0, %v3963_v55 }
 0x9c2   : > { %v3996_v50 = vpop.trf.xlu1 }
 0x9c3   : > { %v4015_v7 = vrot.slane %v3996_v50, %v6414_v11 }
 0x9c5   : > { %v4016_v17 = vadd.f32 %v4015_v7, %v3973_v37  ;;  %v6892_v37 = vld [vmem:[%s6372_s22] sm:$0xff]  ;;  %s7167_s22 = smov 88  }
 0x9c7   : > { %v4018_v19 = vsub.f32 %v4016_v17, %v4017_v12  ;;  %v3521_v12 = vmul.f32 %v6892_v37, %v6827_v22 }
 0x9c9   : > { %v4019_v47 = vsub.f32 %v3729_v14, %v4018_v19  ;;  %v1836_v14 = vmul.f32 %v6651_v25, %v6651_v25 }
 0x9cb   : > { %v4023_v23 = vadd.f32 %v4021_v52, %v4019_v47 }
 0x9cd   : > { %v4028_v6 = vadd.f32 %v4026_v59, %v4023_v23 }
 0x9cf   : > { %v4029_v28 = vadd.f32 %v4028_v6, %v6422_v36 }
 0x9d1   : > { %v4030_v33 = vsel %vm984_vm2, %v4029_v28, -inf }
 0x9d2   : > { %v3157_v0 = vpop.permute.xlu1 %3156  ;;  %4031 = vmax.xlane.f32.xlu0 %v4030_v33 }
 0x9d3   : > { %5510 = vmatpush3.msra.mxu1 %v3157_v0 }
 0x9d4   : > { %5512 = vmatmul.mubr.msk.f32.vlgmr.msra.gmra.mrb[12].mxu1 %vm984_vm2, %v6770_v56  ;;  %5514 = vmatprep.subr.mxu1 %v7161_v13 }
 0x9d5   : > { %5516 = vmatprep.mubr.msk.f32.mxu1 %vm5990_vm1, %v7161_v13 }
 0x9d6   : > { %v3379_v8 = vpop.permute.xlu1 %3378 }
 0x9da   : > { %v4042_v21 = vpop.permute.xlu1 %4041 }
 0x9db   : > { %5590 = vmatpush3.msra.mxu0 %v4042_v21 }
 0x9dc   : > { %5594 = vmatprep.subr.mxu0 %v7161_v13 }
 0x9de   : > { %v6838_v60 = vpop.permute.xlu1 %4117 }
 0x9e2   : > { %v6840_v36 = vpop.permute.xlu1 %4190 }
 0x9e6   : > { %v6842_v2 = vpop.permute.xlu1 %4263 }
 0x9e8   : > { %3232 = vrot.lane.b32.xlu0 %v6246_v4, %s6000_s20  ;;  %v1837_v4 = vmul.f32 %v6654_v39, %v6654_v39 }
 0x9ea   : > { %v1852_v57 = vpop.permute.xlu1 %1851  ;;  %v1838_v29 = vadd.f32 %v1837_v4, %v1836_v14 }
 0x9eb   : > { %1855 = vst.msk [vmem:[#allocation2] sm:$0xff] %vm1854_vm7, %v1852_v57  ;;  %vm3627_vm7 = vcmask 195712  }
 0x9ec   : > { %3305 = vrot.lane.b32.xlu0 %v6238_v62, %s6000_s20  ;;  %v1839_v62 = vmul.f32 %v6657_v51, %v6657_v51 }
 0x9ee   : > { %v1858_v54 = vpop.permute.xlu1 %1857  ;;  %v1840_v3 = vadd.f32 %v1839_v62, %v1838_v29 }
 0x9ef   : > { %1861 = vst.msk [vmem:[#allocation2] sm:$0xff] %vm1860_vm8, %v1858_v54 }
 0x9f0   : > { %v1841_v39 = vadd.f32 1e-08, %v1840_v3 }
 0x9f2   : > { %v1864_v27 = vpop.permute.xlu1 %1863  ;;  %vm1844_vm10 = vcmp.eq.f32.partialorder %v1841_v39, inf  ;;  %v1847_v50 = vand.u32 2147483648, %v1841_v39  ;;  %vm1846_vm11 = vcmp.eq.f32.partialorder %v1841_v39, 0.0 }
 0x9f3   : > { %1867 = vst.msk [vmem:[#allocation2] sm:$0xff] %vm1866_vm9, %v1864_v27  ;;  %vm3653_vm9 = vcmask 130048  }
 0xa5f   : > { %v4032_v1 = vpop.xlane.xlu0 %4031 }
 0xa60   : > { %v4033_v10 = vsub.f32 %v4029_v28, %v4032_v1 }
 0xa62   : > { %v4034_v58 = vmul.f32 1.442695, %v4033_v10 }
 0xa63   : > { %v3233_v5 = vpop.permute.xlu0 %3232 }
 0xa64   : > { %5953 = vpow2.f32 %v4034_v58  ;;  %5515 = vmatpush3.msra.mxu1 %v3233_v5 }
 0xa65   : > { %5517 = vmatmul.mubr.msk.f32.vlgmr.msra.gmra.mrb[14].mxu1 %vm984_vm2, %v6770_v56  ;;  %5519 = vmatprep.subr.mxu1 %v7161_v13  ;;  %5955 = vrsqrt.f32 %v1841_v39 }
 0xa66   : > { %5521 = vmatprep.mubr.msk.f32.mxu1 %vm5990_vm1, %v7161_v13 }
 0xa67   : > { %v3306_v25 = vpop.permute.xlu0 %3305 }
 0xa68   : > { %5520 = vmatpush3.msra.mxu1 %v3306_v25 }
 0xa69   : > { %5522 = vmatmul.mubr.msk.f32.vlgmr.msra.gmra.mrb[16].mxu1 %vm984_vm2, %v6770_v56  ;;  %5524 = vmatprep.subr.mxu1 %v7161_v13 }
 0xa6a   : > { %5525 = vmatpush3.msra.mxu1 %v3379_v8  ;;  %5526 = vmatprep.mubr.msk.f32.mxu1 %vm5990_vm1, %v7161_v13 }
 0xa6b   : > { %5762 = vmatprep.subr.bf16.mxu1 %v7162_v34 }
 0xa6d   : > { %5527 = vmatmul.mubr.msk.f32.vlgmr.msra.gmra.mrb[18].mxu1 %vm984_vm2, %v6770_v56 }
 0xa6e   : > { %v6867_v55 = vpop.eup %5953  ;;  %5764 = vmatpush3.bf16.msra.mxu1 %v6517_v42  ;;  %5566 = vmatprep.mubr.msk.f32.mxu1 %vm5990_vm1, %v7161_v13 }
 0xa6f   : > { %v4036_v51 = vsel %vm984_vm2, %v6867_v55, 0.0  ;;  %5765 = vmatprep.subr.bf16.mxu1 %v7162_v34  ;;  %v5956_v56 = vpop.eup %5955 }
 0xa70   : > { %4037 = vadd.xlane.f32.xlu0 %v4036_v51  ;;  %v1843_v16 = vmul.f32 %v5956_v56, %v1841_v39 }
 0xa72   : > { %5767 = vmatpush3.bf16.msra.mxu1 %v6528_v53  ;;  %v1845_v59 = vsel %vm1844_vm10, %v1841_v39, %v1843_v16  ;;  %vm3633_vm10 = vcmask 359744  }
 0xa73   : > { %5768 = vmatprep.subr.bf16.mxu1 %v7162_v34  ;;  %v1848_v7 = vsel %vm1846_vm11, %v1847_v50, %v1845_v59  ;;  %vm3639_vm11 = vcmask 490944  }
 0xa76   : > { %5770 = vmatpush3.bf16.msra.mxu1 %v6543_v63 }
 0xa77   : > { %5771 = vmatprep.subr.bf16.mxu1 %v7162_v34 }
 0xa7a   : > { %5773 = vmatpush3.bf16.msra.mxu1 %v6556_v15 }
 0xa7b   : > { %5774 = vmatprep.subr.bf16.mxu1 %v7162_v34 }
 0xa7e   : > { %5776 = vmatpush3.bf16.msra.mxu1 %v6571_v49 }
 0xa7f   : > { %5777 = vmatprep.subr.bf16.mxu1 %v7162_v34 }
 0xa82   : > { %5779 = vmatpush3.bf16.msra.mxu1 %v6593_v18 }
 0xa83   : > { %5780 = vmatprep.subr.bf16.mxu1 %v7162_v34 }
 0xa86   : > { %5782 = vmatpush3.bf16.msra.mxu1 %v6604_v40  ;;  %1869 = vrot.lane.b32.xlu0 %v1848_v7, %s6005_s28  ;;  %s7169_s28 = smov 60  }
 0xa87   : > { %5783 = vmatprep.subr.bf16.mxu1 %v7162_v34 }
 0xa8a   : > { %5785 = vmatpush3.bf16.msra.mxu1 %v6614_v61  ;;  %2765 = vrot.lane.b32.xlu0 %v6809_v31, %s5988_s30  ;;  %v1876_v31 = vpop.permute.xlu1 %1875  ;;  %s7166_s30 = smov 72  }
 0xa8b   : > { %5609 = vmatprep.subr.mxu1 %v7161_v13 }
 0xa8d   : > { %5567 = vmatmul.mubr.f32.vlgmr.msra.gmra.mrb[20].mxu1 %v3521_v12 }
 0xa8e   : > { %5610 = vmatpush3.msra.mxu1 %v6461_v24  ;;  %5611 = vmatprep.mubr.msk.f32.mxu1 %vm5990_vm1, %v7161_v13  ;;  %v2736_v47 = vpop.permute.xlu1 %2735 }
 0xa8f   : > { %5810 = vmatprep.subr.bf16.mxu1 %v7162_v34 }
 0xa92   : > { %v2742_v52 = vpop.permute.xlu1 %2741 }
 0xa96   : > { %v2748_v23 = vpop.permute.xlu1 %2747 }
 0xa9a   : > { %v2754_v22 = vpop.permute.xlu1 %2753 }
 0xa9e   : > { %v2760_v28 = vpop.permute.xlu1 %2759 }
 0xaa7   : > { %v3228_v17 = vpop.f32.mrb[12].mxu1 }
 0xaa8   : > { %3624 = vrot.lane.b32.xlu1 %v3228_v17, %s7165_s18  ;;  %v5513_v19 = vpop.f32.mrb[13].mxu1 }
 0xafd   : > { %v4038_v6 = vpop.xlane.xlu0 %4037 }
 0xafe   : > { %5957 = vrcp.f32 %v4038_v6 }
 0xb01   : > { %v1870_v24 = vpop.permute.xlu0 %1869 }
 0xb02   : > { %1873 = vst.msk [vmem:[#allocation2] sm:$0xff] %vm1872_vm12, %v1870_v24  ;;  %vm3645_vm12 = vcmask 622144  }
 0xb03   : > { %1879 = vst.msk [vmem:[#allocation2] sm:$0xff] %vm1878_vm13, %v1876_v31  ;;  %vm3651_vm13 = vcmask 753344  }
 0xb04   : > { %2739 = vst.msk [vmem:[#allocation2] sm:$0xff] %vm2738_vm14, %v2736_v47 }
 0xb05   : > { %2745 = vst.msk [vmem:[#allocation2] sm:$0xff] %vm2744_vm15, %v2742_v52  ;;  %v2766_v0 = vpop.permute.xlu0 %2765 }
 0xb06   : > { %2751 = vst.msk [vmem:[#allocation2] sm:$0xff] %vm2750_vm3, %v2748_v23  ;;  %vm4512_vm3 = vcmask 261312  }
 0xb07   : > { %2757 = vst.msk [vmem:[#allocation2] sm:$0xff] %vm2756_vm4, %v2754_v22  ;;  %vm4518_vm4 = vcmask 392544  }
 0xb08   : > { %v5958_v33 = vpop.eup %5957  ;;  %2763 = vst.msk [vmem:[#allocation2] sm:$0xff] %vm2762_vm5, %v2760_v28  ;;  %vm4524_vm5 = vcmask 523744  }
 0xb09   : > { %v4040_v8 = vmul.f32 %v5958_v33, %v6867_v55  ;;  %2769 = vst.msk [vmem:[#allocation2] sm:$0xff] %vm2768_vm6, %v2766_v0  ;;  %vm4530_vm6 = vcmask 654944  }
 0xb0b   : > { %5592 = vmatmul.mubr.msk.f32.vlgmr.msra.gmra.mrb[34].mxu0 %vm984_vm2, %v4040_v8  ;;  %5612 = vmatmul.mubr.msk.f32.vlgmr.msra.gmra.mrb[22].mxu1 %vm984_vm2, %v4040_v8 }
 0xb0c   : > { %5595 = vmatpush3.msra.mxu0 %v6838_v60  ;;  %5596 = vmatprep.mubr.msk.f32.mxu0 %vm5990_vm1, %v7161_v13 }
 0xb0d   : > { %5599 = vmatprep.subr.mxu0 %v7161_v13 }
 0xb0f   : > { %5597 = vmatmul.mubr.msk.f32.vlgmr.msra.gmra.mrb[36].mxu0 %vm984_vm2, %v4040_v8 }
 0xb10   : > { %5600 = vmatpush3.msra.mxu0 %v6840_v36  ;;  %5601 = vmatprep.mubr.msk.f32.mxu0 %vm5990_vm1, %v7161_v13 }
 0xb11   : > { %5604 = vmatprep.subr.mxu0 %v7161_v13 }
 0xb13   : > { %5602 = vmatmul.mubr.msk.f32.vlgmr.msra.gmra.mrb[38].mxu0 %vm984_vm2, %v4040_v8 }
 0xb14   : > { %5605 = vmatpush3.msra.mxu0 %v6842_v2  ;;  %5606 = vmatprep.mubr.msk.f32.mxu0 %vm5990_vm1, %v7161_v13 }
 0xb15   : > { %5786 = vmatprep.subr.bf16.mxu0 %v7162_v34 }
 0xb17   : > { %5607 = vmatmul.mubr.msk.f32.vlgmr.msra.gmra.mrb[40].mxu0 %vm984_vm2, %v4040_v8 }
 0xb18   : > { %5788 = vmatpush3.bf16.msra.mxu0 %v6517_v42  ;;  %5646 = vmatprep.mubr.msk.f32.mxu0 %vm5990_vm1, %v7161_v13 }
 0xb19   : > { %5789 = vmatprep.subr.bf16.mxu0 %v7162_v34 }
 0xb1a   : > { %v3625_v21 = vpop.permute.xlu1 %3624 }
 0xb1b   : > { %3628 = vst.msk [vmem:[#allocation2] sm:$0xff] %vm3627_vm7, %v3625_v21  ;;  %vm4536_vm7 = vcmask 786144  }
 0xb1c   : > { %5791 = vmatpush3.bf16.msra.mxu0 %v6528_v53 }
 0xb1d   : > { %5792 = vmatprep.subr.bf16.mxu0 %v7162_v34 }
 0xb20   : > { %5794 = vmatpush3.bf16.msra.mxu0 %v6543_v63 }
 0xb21   : > { %5795 = vmatprep.subr.bf16.mxu0 %v7162_v34 }
 0xb24   : > { %5797 = vmatpush3.bf16.msra.mxu0 %v6556_v15 }
 0xb25   : > { %5798 = vmatprep.subr.bf16.mxu0 %v7162_v34 }
 0xb28   : > { %5800 = vmatpush3.bf16.msra.mxu0 %v6571_v49 }
 0xb29   : > { %5801 = vmatprep.subr.bf16.mxu0 %v7162_v34 }
 0xb2c   : > { %5803 = vmatpush3.bf16.msra.mxu0 %v6593_v18 }
 0xb2d   : > { %5804 = vmatprep.subr.bf16.mxu0 %v7162_v34 }
 0xb30   : > { %5806 = vmatpush3.bf16.msra.mxu0 %v6604_v40 }
 0xb31   : > { %5807 = vmatprep.subr.bf16.mxu0 %v7162_v34 }
 0xb34   : > { %5809 = vmatpush3.bf16.msra.mxu0 %v6614_v61 }
 0xb35   : > { %5840 = vmatprep.subr.bf16.mxu0 %v7162_v34 }
 0xb38   : > { %v3301_v42 = vpop.f32.mrb[14].mxu1 }
 0xb39   : > { %v5518_v53 = vpop.f32.mrb[15].mxu1  ;;  %v3592_v63 = vsub.f32 %v3301_v42, %v6226_v46 }
 0xb3b   : > { %v3595_v18 = vmul.f32 %v3592_v63, %v6224_v45  ;;  %v3600_v36 = vmul.f32 %v3592_v63, %v6178_v30  ;;  %v3605_v40 = vmul.f32 %v3592_v63, %v6191_v35 }
 0xb3c   : > { %v3374_v15 = vpop.f32.mrb[16].mxu1 }
 0xb3d   : > { %v3593_v49 = vsub.f32 %v3374_v15, %v6222_v44  ;;  %v5523_v60 = vpop.f32.mrb[17].mxu1 }
 0xb3f   : > { %v3596_v2 = vmul.f32 %v3593_v49, %v6220_v43  ;;  %v3601_v61 = vmul.f32 %v3593_v49, %v6170_v26  ;;  %v3606_v57 = vmul.f32 %v3593_v49, %v6184_v32 }
 0xb40   : > { %v3447_v54 = vpop.f32.mrb[18].mxu1 }
 0xb41   : > { %v3597_v27 = vadd.f32 %v3596_v2, %v3595_v18  ;;  %v3602_v1 = vadd.f32 %v3601_v61, %v3600_v36  ;;  %v3607_v10 = vadd.f32 %v3606_v57, %v3605_v40  ;;  %v3594_v14 = vsub.f32 %v3447_v54, %v6266_v20  ;;  %v5528_v4 = vpop.f32.mrb[19].mxu1 }
 0xb43   : > { %v3598_v58 = vmul.f32 %v3594_v14, %v6228_v48  ;;  %v3603_v5 = vmul.f32 %v3594_v14, %v6200_v38  ;;  %v3608_v29 = vmul.f32 %v3594_v14, %v6213_v41 }
 0xb45   : > { %v3599_v62 = vadd.f32 %v3598_v58, %v3597_v27  ;;  %v3604_v25 = vadd.f32 %v3603_v5, %v3602_v1  ;;  %v3609_v3 = vadd.f32 %v3608_v29, %v3607_v10 }
 0xb47   : > { %v3610_v39 = vmul.f32 %v3599_v62, %v3599_v62  ;;  %v3611_v55 = vmul.f32 %v3604_v25, %v3604_v25  ;;  %3636 = vrot.lane.b32.xlu1 %v3604_v25, %s6000_s20  ;;  %3630 = vrot.lane.b32.xlu0 %v3599_v62, %s6008_s0  ;;  %v3613_v56 = vmul.f32 %v3609_v3, %v3609_v3  ;;  %s7168_s20 = smov 24   ;;  %s6016_s0 = smov 92   ;;  %v4547_v62 = vld [vmem:[%s7136_s12] sm:$0xff]  ;;  %v4548_v25 = vld [vmem:[%s7136_s12 + $0x8] sm:$0xff] }
 0xb49   : > { %v3612_v51 = vadd.f32 %v3611_v55, %v3610_v39  ;;  %v5811_v39 = vpack.c.bf16 %v4548_v25, %v4547_v62  ;;  %v4550_v55 = vld [vmem:[%s7136_s12 + $0x18] sm:$0xff]  ;;  %v4661_v25 = vsub.s32 1, %v6411_v9 }
 0xb4b   : > { %v3614_v16 = vadd.f32 %v3613_v56, %v3612_v51  ;;  %3642 = vrot.lane.b32.xlu0 %v3609_v3, %s7166_s30  ;;  %v4549_v3 = vld [vmem:[%s7136_s12 + $0x10] sm:$0xff]  ;;  %5812 = vmatpush1.bf16.msra.mxu1 %v5811_v39  ;;  %v4551_v56 = vld [vmem:[%s7136_s12 + $0x20] sm:$0xff] }
 0xb4c   : > { %v5814_v51 = vpack.c.bf16 %v4550_v55, %v4549_v3  ;;  %5813 = vmatprep.subr.bf16.mxu1 %v7162_v34  ;;  %v4666_v3 = vsub.s32 2, %v6411_v9 }
 0xb4d   : > { %v3615_v59 = vadd.f32 1e-08, %v3614_v16  ;;  %v4552_v16 = vld [vmem:[%s7136_s12 + $0x28] sm:$0xff] }
 0xb4f   : > { %5959 = vrsqrt.f32 %v3615_v59  ;;  %vm3618_vm2 = vcmp.eq.f32.partialorder %v3615_v59, inf  ;;  %v3621_v12 = vand.u32 2147483648, %v3615_v59  ;;  %vm3620_vm8 = vcmp.eq.f32.partialorder %v3615_v59, 0.0  ;;  %5815 = vmatpush1.bf16.msra.mxu1 %v5814_v51 }
 0xb50   : > { %5816 = vmatprep.subr.bf16.mxu1 %v7162_v34 }
 0xb59   : > { %v5960_v50 = vpop.eup %5959 }
 0xb5a   : > { %v3617_v7 = vmul.f32 %v5960_v50, %v3615_v59  ;;  %v4553_v50 = vld [vmem:[%s7136_s12 + $0x30] sm:$0xff] }
 0xb5c   : > { %v3619_v17 = vsel %vm3618_vm2, %v3615_v59, %v3617_v7  ;;  %v5817_v59 = vpack.c.bf16 %v4552_v16, %v4551_v56  ;;  %v4554_v7 = vld [vmem:[%s7136_s12 + $0x38] sm:$0xff]  ;;  %vm4542_vm2 = vcmask 261248   ;;  %v4751_v16 = vld [vmem:[%s7139_s15] sm:$0xff] }
 0xb5d   : > { %v3622_v19 = vsel %vm3620_vm8, %v3621_v12, %v3619_v17  ;;  %v5820_v12 = vpack.c.bf16 %v4554_v7, %v4553_v50  ;;  %v4555_v17 = vld [vmem:[%s7136_s12 + $0x40] sm:$0xff] }
 0xb5e   : > { %3648 = vrot.lane.b32.xlu1 %v3622_v19, %s7167_s22  ;;  %5818 = vmatpush1.bf16.msra.mxu1 %v5817_v59  ;;  %v4556_v19 = vld [vmem:[%s7136_s12 + $0x48] sm:$0xff] }
 0xb5f   : > { %5819 = vmatprep.subr.bf16.mxu1 %v7162_v34  ;;  %v4752_v59 = vld [vmem:[%s7139_s15 + $0x8] sm:$0xff] }
 0xb60   : > { %v3588_v31 = vpop.f32.mrb[20].mxu1  ;;  %v5847_v7 = vpack.c.bf16 %v4752_v59, %v4751_v16 }
 0xb61   : > { %3654 = vst.msk [vmem:[#allocation2 + $0x8] sm:$0xff] %vm3653_vm9, %v3588_v31  ;;  %v5568_v47 = vpop.f32.mrb[21].mxu1  ;;  %v5823_v31 = vpack.c.bf16 %v4556_v19, %v4555_v17  ;;  %v4753_v17 = vld [vmem:[%s7139_s15 + $0x10] sm:$0xff]  ;;  %v4754_v19 = vld [vmem:[%s7139_s15 + $0x18] sm:$0xff] }
 0xb62   : > { %5821 = vmatpush1.bf16.msra.mxu1 %v5820_v12  ;;  %v4557_v47 = vld [vmem:[%s7136_s12 + $0x50] sm:$0xff] }
 0xb63   : > { %5822 = vmatprep.subr.bf16.mxu1 %v7162_v34 }
 0xb66   : > { %5824 = vmatpush1.bf16.msra.mxu1 %v5823_v31  ;;  %v5850_v31 = vpack.c.bf16 %v4754_v19, %v4753_v17 }
 0xb67   : > { %5825 = vmatprep.subr.bf16.mxu1 %v7162_v34 }
 0xbb9   : > { %v3637_v52 = vpop.permute.xlu1 %3636  ;;  %v3631_v23 = vpop.permute.xlu0 %3630 }
 0xbba   : > { %3634 = vst.msk [vmem:[#allocation2] sm:$0xff] %vm3633_vm10, %v3631_v23 }
 0xbbb   : > { %3640 = vst.msk [vmem:[#allocation2] sm:$0xff] %vm3639_vm11, %v3637_v52  ;;  %v4558_v52 = vld [vmem:[%s7136_s12 + $0x58] sm:$0xff] }
 0xbbc   : > { %v5826_v23 = vpack.c.bf16 %v4558_v52, %v4557_v47  ;;  %v4833_v47 = vld [vmem:[%s7140_s16] sm:$0xff] }
 0xbbd   : > { %v3643_v6 = vpop.permute.xlu0 %3642 }
 0xbbe   : > { %3646 = vst.msk [vmem:[#allocation2] sm:$0xff] %vm3645_vm12, %v3643_v6  ;;  %v4559_v6 = vld [vmem:[%s7136_s12 + $0x60] sm:$0xff]  ;;  %5827 = vmatpush1.bf16.msra.mxu1 %v5826_v23  ;;  %v4675_v23 = vsub.s32 3, %v6411_v9 }
 0xbbf   : > { %5828 = vmatprep.subr.bf16.mxu1 %v7162_v34 }
 0xbd0   : > { %v3649_v22 = vpop.permute.xlu1 %3648 }
 0xbd1   : > { %3652 = vst.msk [vmem:[#allocation2] sm:$0xff] %vm3651_vm13, %v3649_v22  ;;  %v4560_v22 = vld [vmem:[%s7136_s12 + $0x68] sm:$0xff] }
 0xbde   : > { %v4113_v24 = vpop.f32.mrb[34].mxu0  ;;  %v4402_v28 = vpop.f32.mrb[22].mxu1 }
 0xbdf   : > { %v4406_v33 = vmul.f32 %v6892_v37, %v4402_v28  ;;  %v5613_v0 = vpop.f32.mrb[23].mxu1  ;;  %4509 = vrot.lane.b32.xlu0 %v4113_v24, %s7168_s20  ;;  %v5593_v8 = vpop.f32.mrb[35].mxu0  ;;  %v5829_v24 = vpack.c.bf16 %v4560_v22, %v4559_v6  ;;  %v4561_v28 = vld [vmem:[%s7136_s12 + $0x70] sm:$0xff] }
 0xbe1   : > { %5647 = vmatmul.mubr.f32.vlgmr.msra.gmra.mrb[42].mxu0 %v4406_v33  ;;  %v4562_v33 = vld [vmem:[%s7136_s12 + $0x78] sm:$0xff]  ;;  %5830 = vmatpush1.bf16.msra.mxu1 %v5829_v24 }
 0xbe2   : > { %v4186_v21 = vpop.f32.mrb[36].mxu0  ;;  %5657 = vmatprep.mubr.msk.f32.mxu0 %vm5990_vm1, %v7161_v13  ;;  %v5832_v0 = vpack.c.bf16 %v4562_v33, %v4561_v28  ;;  %5831 = vmatprep.subr.bf16.mxu1 %v7162_v34 }
 0xbe3   : > { %v5598_v42 = vpop.f32.mrb[37].mxu0  ;;  %v4477_v53 = vsub.f32 %v4186_v21, %v6226_v46 }
 0xbe5   : > { %v4480_v60 = vmul.f32 %v4477_v53, %v6224_v45  ;;  %v4485_v37 = vmul.f32 %v4477_v53, %v6178_v30  ;;  %v4490_v18 = vmul.f32 %v4477_v53, %v6191_v35  ;;  %5833 = vmatpush1.bf16.msra.mxu1 %v5832_v0  ;;  %v4835_v0 = vld [vmem:[%s7140_s16 + $0x10] sm:$0xff] }
 0xbe6   : > { %v4259_v63 = vpop.f32.mrb[38].mxu0  ;;  %5834 = vmatprep.subr.bf16.mxu1 %v7162_v34 }
 0xbe7   : > { %v4478_v15 = vsub.f32 %v4259_v63, %v6222_v44  ;;  %v5603_v49 = vpop.f32.mrb[39].mxu0 }
 0xbe8   : > { %v4564_v49 = vld [vmem:[%s7136_s12 + $0x88] sm:$0xff] }
 0xbe9   : > { %v4481_v36 = vmul.f32 %v4478_v15, %v6220_v43  ;;  %v4486_v40 = vmul.f32 %v4478_v15, %v6170_v26  ;;  %v4491_v2 = vmul.f32 %v4478_v15, %v6184_v32  ;;  %v4563_v15 = vld [vmem:[%s7136_s12 + $0x80] sm:$0xff] }
 0xbea   : > { %v4332_v61 = vpop.f32.mrb[40].mxu0 }
 0xbeb   : > { %v4482_v57 = vadd.f32 %v4481_v36, %v4480_v60  ;;  %v4487_v54 = vadd.f32 %v4486_v40, %v4485_v37  ;;  %v4492_v46 = vadd.f32 %v4491_v2, %v4490_v18  ;;  %v4479_v27 = vsub.f32 %v4332_v61, %v6266_v20  ;;  %v5608_v44 = vpop.f32.mrb[41].mxu0  ;;  %v4565_v60 = vld [vmem:[%s7136_s12 + $0x90] sm:$0xff]  ;;  %v4566_v18 = vld [vmem:[%s7136_s12 + $0x98] sm:$0xff] }
 0xbec   : > { %v5835_v37 = vpack.c.bf16 %v4564_v49, %v4563_v15  ;;  %v5838_v36 = vpack.c.bf16 %v4566_v18, %v4565_v60  ;;  %v4839_v60 = vsub.s32 5, %v6411_v9 }
 0xbed   : > { %v4483_v1 = vmul.f32 %v4479_v27, %v6228_v48  ;;  %v4488_v45 = vmul.f32 %v4479_v27, %v6200_v38  ;;  %v4493_v30 = vmul.f32 %v4479_v27, %v6213_v41 }
 0xbee   : > { %5836 = vmatpush1.bf16.msra.mxu1 %v5835_v37 }
 0xbef   : > { %v4484_v35 = vadd.f32 %v4483_v1, %v4482_v57  ;;  %v4489_v10 = vadd.f32 %v4488_v45, %v4487_v54  ;;  %v4494_v43 = vadd.f32 %v4493_v30, %v4492_v46  ;;  %5837 = vmatprep.subr.bf16.mxu1 %v7162_v34  ;;  %v7048_v46 = vld [vmem:[%s7137_s13] sm:$0xff] }
 0xbf0   : > { %v4570_v27 = vrot.slane %v7048_v46, %v6414_v11  ;;  %v5968_v30 = vld [vmem:[%s6150_s19] sm:$0xff]  ;;  %v4670_v11 = vld [vmem:[%s7138_s14 + $0x8] sm:$0xff]  ;;  %v4662_v39 = vrot.slane %v7048_v46, %v4661_v25  ;;  %v4667_v56 = vrot.slane %v7048_v46, %v4666_v3  ;;  %v4676_v6 = vrot.slane %v7048_v46, %v4675_v23 }
 0xbf1   : > { %v4495_v14 = vmul.f32 %v4484_v35, %v4484_v35  ;;  %v4496_v26 = vmul.f32 %v4489_v10, %v4489_v10  ;;  %4521 = vrot.lane.b32.xlu0 %v4489_v10, %s7169_s28  ;;  %4515 = vrot.lane.b32.xlu1 %v4484_v35, %s6014_s21  ;;  %v4498_v4 = vmul.f32 %v4494_v43, %v4494_v43 }
 0xbf2   : > { %5839 = vmatpush1.bf16.msra.mxu1 %v5838_v36  ;;  %v4840_v37 = vrot.slane %v7048_v46, %v4839_v60 }
 0xbf3   : > { %v4497_v32 = vadd.f32 %v4496_v26, %v4495_v14  ;;  %5852 = vmatprep.subr.bf16.mxu1 %v7162_v34 }
 0xbf5   : > { %v4499_v58 = vadd.f32 %v4498_v4, %v4497_v32  ;;  %4527 = vrot.lane.b32.xlu1 %v4494_v43, %s6015_s23 }
 0xbf7   : > { %v4500_v20 = vadd.f32 1e-08, %v4499_v58  ;;  %v4669_v58 = vld [vmem:[%s7138_s14] sm:$0xff] }
 0xbf9   : > { %5961 = vrsqrt.f32 %v4500_v20  ;;  %vm4503_vm14 = vcmp.eq.f32.partialorder %v4500_v20, inf  ;;  %v4506_v41 = vand.u32 2147483648, %v4500_v20  ;;  %vm4505_vm15 = vcmp.eq.f32.partialorder %v4500_v20, 0.0 }
 0xc03   : > { %v5962_v48 = vpop.eup %5961 }
 0xc04   : > { %v4502_v38 = vmul.f32 %v5962_v48, %v4500_v20  ;;  %v4671_v48 = vld [vmem:[%s7138_s14 + $0x10] sm:$0xff] }
 0xc06   : > { %v4504_v5 = vsel %vm4503_vm14, %v4500_v20, %v4502_v38  ;;  %v5841_v20 = vpack.c.bf16 %v4670_v11, %v4669_v58  ;;  %v4672_v38 = vld [vmem:[%s7138_s14 + $0x18] sm:$0xff] }
 0xc07   : > { %v4507_v29 = vsel %vm4505_vm15, %v4506_v41, %v4504_v5  ;;  %v5844_v41 = vpack.c.bf16 %v4672_v38, %v4671_v48 }
 0xc08   : > { %4533 = vrot.lane.b32.xlu1 %v4507_v29, %s6016_s0  ;;  %5842 = vmatpush3.bf16.msra.mxu0 %v5841_v20 }
 0xc09   : > { %5843 = vmatprep.subr.bf16.mxu0 %v7162_v34 }
 0xc0c   : > { %5845 = vmatpush3.bf16.msra.mxu0 %v5844_v41 }
 0xc0d   : > { %5846 = vmatprep.subr.bf16.mxu0 %v7162_v34 }
 0xc51   : > { %v4510_v8 = vpop.permute.xlu0 %4509 }
 0xc52   : > { %4513 = vst.msk [vmem:[#allocation2] sm:$0xff] %vm4512_vm3, %v4510_v8  ;;  %v4836_v8 = vld [vmem:[%s7140_s16 + $0x18] sm:$0xff] }
 0xc63   : > { %v4516_v21 = vpop.permute.xlu1 %4515  ;;  %v4522_v42 = vpop.permute.xlu0 %4521 }
 0xc64   : > { %4519 = vst.msk [vmem:[#allocation2] sm:$0xff] %vm4518_vm4, %v4516_v21  ;;  %v5856_v21 = vpack.c.bf16 %v4836_v8, %v4835_v0 }
 0xc65   : > { %4525 = vst.msk [vmem:[#allocation2] sm:$0xff] %vm4524_vm5, %v4522_v42 }
 0xc67   : > { %v4528_v53 = vpop.permute.xlu1 %4527 }
 0xc68   : > { %4531 = vst.msk [vmem:[#allocation2] sm:$0xff] %vm4530_vm6, %v4528_v53 }
 0xc7a   : > { %v4534_v63 = vpop.permute.xlu1 %4533 }
 0xc7b   : > { %4537 = vst.msk [vmem:[#allocation2] sm:$0xff] %vm4536_vm7, %v4534_v63 }
 0xc82   : > { %v4544_v54 = vld [vmem:[#allocation2] sm:$0xff] }
 0xcb4   : > { %v4473_v40 = vpop.f32.mrb[42].mxu0 }
 0xcb5   : > { %4539 = vrot.lane.b32.xlu0 %v4473_v40, %s7165_s18  ;;  %v5648_v2 = vpop.f32.mrb[43].mxu0  ;;  %s625_s18 = scalar_lea.vmem %s7141_s17, %s6144_s29 }
 0xd27   : > { %v4540_v61 = vpop.permute.xlu0 %4539 }
 0xd28   : > { %4543 = vst.msk [vmem:[#allocation2 + $0x8] sm:$0xff] %vm4542_vm2, %v4540_v61 }
 0xd2f   : > { %v4545_v57 = vld [vmem:[#allocation2 + $0x8] sm:$0xff] }
 0xd30   : > { %5116 = vmatprep.mubr.msk.f32.mxu1 %vm654_vm0, %v4545_v57 }
 0xd31   : > { %4639 = vmatmul.mubr.f32.vlgmr.msra.gmra.mrb[24].mxu1 %v4544_v54 }
 0xd32   : > { %5679 = vmatprep.mubr.msk.f32.mxu1 %vm5990_vm1, %v7161_v13 }
 0xe04   : > { %v4640_v44 = vpop.f32.mrb[24].mxu1 }
 0xe05   : > { %v4641_v1 = vadd.f32 %v4640_v44, %v4570_v27  ;;  %v4642_v45 = vpop.f32.mrb[25].mxu1 }
 0xe07   : > { %v4644_v35 = vadd.f32 %v5968_v30, %v4641_v1 }
 0xe09   : > { %v4645_v10 = vsel %vm654_vm0, %v4644_v35, 0.0 }
 0xe0a   : > { %4646 = vadd.xlane.f32.xlu0 %v4645_v10  ;;  %v4930_v10 = vsub.s32 6, %v6411_v9 }
 0xe97   : > { %v4647_v43 = vpop.xlane.xlu0 %4646 }
 0xe98   : > { %v4649_v14 = vmul.f32 0.03125, %v4647_v43  ;;  %v4935_v43 = vsub.s32 7, %v6411_v9 }
 0xe9a   : > { %v4650_v26 = vsub.f32 %v4644_v35, %v4649_v14  ;;  %v4931_v14 = vrot.slane %v7048_v46, %v4930_v10 }
 0xe9c   : > { %v4651_v32 = vmul.f32 %v4650_v26, %v4650_v26 }
 0xe9e   : > { %v4652_v4 = vsel %vm654_vm0, %v4651_v32, 0.0  ;;  %v4936_v32 = vrot.slane %v7048_v46, %v4935_v43 }
 0xe9f   : > { %4653 = vadd.xlane.f32.xlu1 %v4652_v4 }
 0xf2c   : > { %v4654_v5 = vpop.xlane.xlu1 %4653 }
 0xf2d   : > { %v4655_v29 = vmul.f32 0.03125, %v4654_v5 }
 0xf2f   : > { %v4656_v62 = vadd.f32 1e-05, %v4655_v29 }
 0xf31   : > { %5963 = vrsqrt.f32 %v4656_v62 }
 0xf3b   : > { %v5964_v55 = vpop.eup %5963 }
 0xf3c   : > { %v4658_v51 = vmul.f32 %v5964_v55, %v4650_v26 }
 0xf3e   : > { %v4663_v50 = vmul.f32 %v4662_v39, %v4658_v51 }
 0xf40   : > { %v4668_v12 = vadd.f32 %v4667_v56, %v4663_v50 }
 0xf42   : > { %5658 = vmatmul.mubr.msk.f32.vlgmr.msra.gmra.mrb[44].mxu0 %vm654_vm0, %v4668_v12 }
 0xf43   : > { %5848 = vmatpush3.bf16.msra.mxu0 %v5847_v7  ;;  %5668 = vmatprep.mubr.msk.f32.mxu0 %vm5990_vm1, %v7161_v13  ;;  %v4834_v13 = vld [vmem:[%s7140_s16 + $0x8] sm:$0xff] }
 0xf44   : > { %5849 = vmatprep.subr.bf16.mxu0 %v7162_v34  ;;  %v5853_v52 = vpack.c.bf16 %v4834_v13, %v4833_v47 }
 0xf46   : > { %5854 = vmatpush3.bf16.msra.mxu1 %v5853_v52 }
 0xf47   : > { %5851 = vmatpush3.bf16.msra.mxu0 %v5850_v31  ;;  %5855 = vmatprep.subr.bf16.mxu1 %v7162_v34  ;;  %v4757_v34 = vsub.s32 4, %v6411_v9 }
 0xf49   : > { %v4758_v42 = vrot.slane %v7048_v46, %v4757_v34 }
 0xf4a   : > { %5857 = vmatpush3.bf16.msra.mxu1 %v5856_v21 }
0x1015   : > { %v4746_v22 = vpop.f32.mrb[44].mxu0 }
0x1016   : > { %v4747_v24 = vadd.f32 %v4746_v22, %v4676_v6  ;;  %v5659_v28 = vpop.f32.mrb[45].mxu0 }
0x1018   : > { %v4750_v33 = vmax.f32 %v4747_v24, 0.0 }
0x101a   : > { %5669 = vmatmul.mubr.msk.f32.vlgmr.msra.gmra.mrb[46].mxu0 %vm654_vm0, %v4750_v33 }
0x10ed   : > { %v4828_v53 = vpop.f32.mrb[46].mxu0 }
0x10ee   : > { %v4829_v63 = vadd.f32 %v4828_v53, %v4758_v42  ;;  %v5670_v15 = vpop.f32.mrb[47].mxu0 }
0x10f0   : > { %v4832_v49 = vmax.f32 %v4829_v63, 0.0 }
0x10f2   : > { %5680 = vmatmul.mubr.msk.f32.vlgmr.msra.gmra.mrb[26].mxu1 %vm654_vm0, %v4832_v49 }
0x11c5   : > { %v4910_v18 = vpop.f32.mrb[26].mxu1 }
0x11c6   : > { %v4911_v36 = vadd.f32 %v4910_v18, %v4840_v37  ;;  %v5681_v40 = vpop.f32.mrb[27].mxu1 }
0x11c8   : > { %v4914_v2 = vadd.f32 %v4911_v36, %v4668_v12 }
0x11ca   : > { %v4915_v61 = vsel %vm654_vm0, %v4914_v2, 0.0 }
0x11cb   : > { %4916 = vadd.xlane.f32.xlu0 %v4915_v61 }
0x1258   : > { %v4917_v57 = vpop.xlane.xlu0 %4916 }
0x1259   : > { %v4918_v54 = vmul.f32 0.03125, %v4917_v57 }
0x125b   : > { %v4919_v27 = vsub.f32 %v4914_v2, %v4918_v54 }
0x125d   : > { %v4920_v44 = vmul.f32 %v4919_v27, %v4919_v27 }
0x125f   : > { %v4921_v1 = vsel %vm654_vm0, %v4920_v44, 0.0 }
0x1260   : > { %4922 = vadd.xlane.f32.xlu0 %v4921_v1 }
0x12ed   : > { %v4923_v45 = vpop.xlane.xlu0 %4922 }
0x12ee   : > { %v4924_v30 = vmul.f32 0.03125, %v4923_v45 }
0x12f0   : > { %v4925_v35 = vadd.f32 1e-05, %v4924_v30 }
0x12f2   : > { %5965 = vrsqrt.f32 %v4925_v35 }
0x12fc   : > { %v5966_v26 = vpop.eup %5965 }
0x12fd   : > { %v4927_v4 = vmul.f32 %v5966_v26, %v4919_v27 }
0x12ff   : > { %v4932_v58 = vmul.f32 %v4931_v14, %v4927_v4 }
0x1301   : > { %v4937_v11 = vadd.f32 %v4936_v32, %v4932_v58 }
0x1303   : > { %4938 = vst.msk [vmem:[%s625_s18] sm:$0xff] %vm654_vm0, %v4937_v11 }
0x1304 PF: > { %s27_s24 = sadd.s32 1, %s5975_s24  }
0x1305   : > { %p24_p4 = scmp.ge.s32.totalorder %s27_s24, 4  }
0x1307   :  { %26 = sbr.rel (!%p24_p4) target bundleno = 3 (0x3), region = 133 }

</bundles_post_ra>
